<compile_context>
chip_gen: v7x
topology: tpu7x:2x2x1
jax: 0.10.0
libtpu: 0.0.40
codegen_flags: <defaults>
</compile_context>

<pallas_src>
import functools

import jax
import jax.numpy as jnp
from jax.experimental import pallas as pl
from jax.experimental.pallas import tpu as pltpu

_PAD_W = 896  # 28*28 = 784 spatial lanes padded up to a multiple of 128


# --------------------------------- fused kernel ----------------------------------------

def _lenet_kernel(x_ref, w1_ref, b1_ref, w2_ref, b2_ref,
                  w1p_ref, b1f_ref, w2f_ref, b2f_ref, w3_ref, b3_ref,
                  out_ref):
    f32 = jnp.float32
    width = x_ref.shape[1]  # 896

    def shift(v, d):
        # out[:, m] = v[:, m + d]  (zero-fill past the end; those lanes are never used)
        if d == 0:
            return v
        return jnp.concatenate(
            [v[:, d:], jnp.zeros((v.shape[0], d), v.dtype)], axis=1)

    x = x_ref[...]  # (3, width); lane m = h*28 + w for this batch element

    # ---- conv1 (5x5, 3->6, valid) + bias + ReLU ------------------------------------
    acc1 = jnp.zeros((6, width), f32)
    for t in range(25):
        i, j = divmod(t, 5)
        acc1 = acc1 + jnp.dot(w1_ref[t], shift(x, 28 * i + j),
                              preferred_element_type=f32)
    r1 = jnp.maximum(acc1 + b1_ref[...], 0.0)          # valid at m = 28*oh + ow, oh,ow < 24

    # ---- maxpool1 2x2/2: results live at m = 56*ph + 2*pw, ph,pw < 12 ----------------
    p1 = jnp.maximum(jnp.maximum(r1, shift(r1, 1)),
                     jnp.maximum(shift(r1, 28), shift(r1, 29)))

    # ---- conv2 (5x5, 6->16) on the stride-2 grid + bias + ReLU -----------------------
    acc2 = jnp.zeros((16, width), f32)
    for t in range(25):
        i, j = divmod(t, 5)
        acc2 = acc2 + jnp.dot(w2_ref[t], shift(p1, 56 * i + 2 * j),
                              preferred_element_type=f32)
    r2 = jnp.maximum(acc2 + b2_ref[...], 0.0)          # valid at m = 56*oh + 2*ow, oh,ow < 8

    # ---- maxpool2 2x2/2: results live at m = 112*ph + 4*pw, ph,pw < 4 ----------------
    p2 = jnp.maximum(jnp.maximum(r2, shift(r2, 2)),
                     jnp.maximum(shift(r2, 56), shift(r2, 58)))

    # ---- flatten (C,H,W order, folded into the fc1 weight permutation) + FC head -----
    cols = []
    for s in range(16):                                 # s = ph*4 + pw
        ph, pw = divmod(s, 4)
        off = 112 * ph + 4 * pw
        cols.append(p2[:, off:off + 1])                 # (16, 1) = channels at cell (ph, pw)
    feats = jnp.concatenate(cols, axis=0)               # (256, 1), row index = s*16 + c

    h1 = jnp.maximum(jnp.dot(w1p_ref[...], feats, preferred_element_type=f32)
                     + b1f_ref[...], 0.0)               # (120, 1)
    h2 = jnp.maximum(jnp.dot(w2f_ref[...], h1, preferred_element_type=f32)
                     + b2f_ref[...], 0.0)               # (84, 1)
    logits = jnp.dot(w3_ref[...], h2, preferred_element_type=f32) + b3_ref[...]  # (nc, 1)
    out_ref[0] = logits


# --------------------------------- wrapper / glue ---------------------------------------

def _replicated_spec(shape):
    n = len(shape)
    return pl.BlockSpec(shape, lambda i, _n=n: (0,) * _n)


def _compiler_params():
    if hasattr(pltpu, "CompilerParams"):
        return pltpu.CompilerParams(dimension_semantics=("parallel",))
    if hasattr(pltpu, "TPUCompilerParams"):  # older jax fallback
        return pltpu.TPUCompilerParams(dimension_semantics=("parallel",))
    return None


def model_forward(kp, x_nchw):
    """Fused LeNet forward. x_nchw: (B, 3, 28, 28) f32 -> logits (B, n_classes) f32."""
    batch = x_nchw.shape[0]
    nc = kp["b3c"].shape[0]

    # Tiny layout prep (replaces the old NCHW->NHWC transpose): NCHW -> (C, B, H*W) padded.
    xt = jnp.transpose(x_nchw.astype(jnp.float32), (1, 0, 2, 3)).reshape(3, batch, 784)
    xt = jnp.pad(xt, ((0, 0), (0, 0), (0, _PAD_W - 784)))
    x_flat = xt.reshape(3, batch * _PAD_W)

    weights = (kp["w1r"], kp["b1c"], kp["w2r"], kp["b2c"],
               kp["w1p"], kp["b1f"], kp["w2f"], kp["b2f"], kp["w3"], kp["b3c"])

    out = pl.pallas_call(
        _lenet_kernel,
        out_shape=jax.ShapeDtypeStruct((batch, nc, 1), jnp.float32),
        grid=(batch,),
        in_specs=[pl.BlockSpec((3, _PAD_W), lambda i: (0, i))]
                 + [_replicated_spec(w.shape) for w in weights],
        out_specs=pl.BlockSpec((1, nc, 1), lambda i: (i, 0, 0)),
        compiler_params=_compiler_params(),
    )(x_flat, *weights)
    return out.reshape(batch, nc)


def prepare_kernel_params(p):
    """One-time repack of PyTorch-layout parameters into kernel-friendly layouts."""
    f32 = jnp.float32
    nc = p["fc3_w"].shape[0]
    return {
        # conv taps: w1r[t][co, ci] = conv_w[co, ci, i, j] with t = i*5 + j
        "w1r": jnp.transpose(p["conv1_w"], (2, 3, 0, 1)).reshape(25, 6, 3).astype(f32),
        "b1c": p["conv1_b"].reshape(6, 1).astype(f32),
        "w2r": jnp.transpose(p["conv2_w"], (2, 3, 0, 1)).reshape(25, 16, 6).astype(f32),
        "b2c": p["conv2_b"].reshape(16, 1).astype(f32),
        # fc1 columns permuted from (c*16 + s) to (s*16 + c) to match the in-kernel flatten
        "w1p": jnp.transpose(p["fc1_w"].reshape(120, 16, 16), (0, 2, 1))
                  .reshape(120, 256).astype(f32),
        "b1f": p["fc1_b"].reshape(120, 1).astype(f32),
        "w2f": p["fc2_w"].astype(f32),
        "b2f": p["fc2_b"].reshape(84, 1).astype(f32),
        "w3": p["fc3_w"].astype(f32),
        "b3c": p["fc3_b"].reshape(nc, 1).astype(f32),
    }


# --------------------------------- pure-JAX reference -----------------------------------

def reference_forward(params, x_nchw):
    x = jnp.transpose(x_nchw, (0, 2, 3, 1))

    def conv(z, w_oihw, b):
        w_hwio = jnp.transpose(w_oihw, (2, 3, 1, 0))
        y = jax.lax.conv_general_dilated(
            z, w_hwio, window_strides=(1, 1), padding="VALID",
            dimension_numbers=("NHWC", "HWIO", "NHWC"),
            precision=jax.lax.Precision.HIGHEST)
        return jnp.maximum(y + b, 0.0)

    def pool(y):
        return jax.lax.reduce_window(y, -jnp.inf, jax.lax.max,
                                     (1, 2, 2, 1), (1, 2, 2, 1), "VALID")

    dot = functools.partial(jnp.dot, precision=jax.lax.Precision.HIGHEST)
    y = pool(conv(x, params["conv1_w"], params["conv1_b"]))
    y = pool(conv(y, params["conv2_w"], params["conv2_b"]))
    feats = jnp.transpose(y, (0, 3, 1, 2)).reshape(y.shape[0], -1)   # PyTorch (C,H,W) flatten
    h = jnp.maximum(dot(feats, params["fc1_w"].T) + params["fc1_b"], 0.0)
    h = jnp.maximum(dot(h, params["fc2_w"].T) + params["fc2_b"], 0.0)
    return dot(h, params["fc3_w"].T) + params["fc3_b"]


def init_params(key, n_classes):
    """PyTorch-style uniform(-1/sqrt(fan_in), +1/sqrt(fan_in)) init; weights in (out, in)."""
    ks = jax.random.split(key, 10)

    def unif(k, shape, fan_in):
        bound = 1.0 / float(fan_in) ** 0.5
        return jax.random.uniform(k, shape, jnp.float32, -bound, bound)

    return {
        "conv1_w": unif(ks[0], (6, 3, 5, 5), 75),
        "conv1_b": unif(ks[1], (6,), 75),
        "conv2_w": unif(ks[2], (16, 6, 5, 5), 150),
        "conv2_b": unif(ks[3], (16,), 150),
        "fc1_w": unif(ks[4], (120, 256), 256),
        "fc1_b": unif(ks[5], (120,), 256),
        "fc2_w": unif(ks[6], (84, 120), 120),
        "fc2_b": unif(ks[7], (84,), 120),
        "fc3_w": unif(ks[8], (n_classes, 84), 84),
        "fc3_b": unif(ks[9], (n_classes,), 84),
    }


if __name__ == "__main__":
    n_classes = 10
    batch = 2
    key = jax.random.PRNGKey(0)
    k_x, k_p = jax.random.split(key)
    x = jax.random.normal(k_x, (batch, 3, 28, 28), jnp.float32)  # NCHW like PyTorch
    params = init_params(k_p, n_classes)
    kparams = prepare_kernel_params(params)

    forward = jax.jit(model_forward)
    logits = jax.block_until_ready(forward(kparams, x))
    assert logits.shape == (batch, n_classes), logits.shape

    ref = jax.block_until_ready(reference_forward(params, x))
    max_err = float(jnp.max(jnp.abs(logits - ref)))
    assert jnp.allclose(logits, ref, atol=2e-2, rtol=2e-2), max_err

    print("KERNEL_OK")
</pallas_src>

<mosaic_0001>
module attributes {stable_mosaic.version = 11 : i64} {
  func.func @_lenet_kernel(%arg0: i32, %arg1: memref<3x896xf32, #tpu.memory_space<vmem>>, %arg2: memref<25x6x3xf32, #tpu.memory_space<vmem>>, %arg3: memref<6x1xf32, #tpu.memory_space<vmem>>, %arg4: memref<25x16x6xf32, #tpu.memory_space<vmem>>, %arg5: memref<16x1xf32, #tpu.memory_space<vmem>>, %arg6: memref<120x256xf32, #tpu.memory_space<vmem>>, %arg7: memref<120x1xf32, #tpu.memory_space<vmem>>, %arg8: memref<84x120xf32, #tpu.memory_space<vmem>>, %arg9: memref<84x1xf32, #tpu.memory_space<vmem>>, %arg10: memref<10x84xf32, #tpu.memory_space<vmem>>, %arg11: memref<10x1xf32, #tpu.memory_space<vmem>>, %arg12: memref<1x10x1xf32, #tpu.memory_space<vmem>>) attributes {dimension_semantics = [#tpu.dimension_semantics<parallel>], iteration_bounds = array<i64: 2>, scalar_prefetch = 0 : i64, scratch_operands = 0 : i64, tpu.core_type = #tpu.core_type<tc>, window_params = [{transform_indices = @transform_0, window_bounds = array<i64: 3, 896>}, {pipeline_mode = #tpu.pipeline_mode<synchronous>, transform_indices = @transform_1, window_bounds = array<i64: 25, 6, 3>}, {pipeline_mode = #tpu.pipeline_mode<synchronous>, transform_indices = @transform_2, window_bounds = array<i64: 6, 1>}, {pipeline_mode = #tpu.pipeline_mode<synchronous>, transform_indices = @transform_3, window_bounds = array<i64: 25, 16, 6>}, {pipeline_mode = #tpu.pipeline_mode<synchronous>, transform_indices = @transform_4, window_bounds = array<i64: 16, 1>}, {pipeline_mode = #tpu.pipeline_mode<synchronous>, transform_indices = @transform_5, window_bounds = array<i64: 120, 256>}, {pipeline_mode = #tpu.pipeline_mode<synchronous>, transform_indices = @transform_6, window_bounds = array<i64: 120, 1>}, {pipeline_mode = #tpu.pipeline_mode<synchronous>, transform_indices = @transform_7, window_bounds = array<i64: 84, 120>}, {pipeline_mode = #tpu.pipeline_mode<synchronous>, transform_indices = @transform_8, window_bounds = array<i64: 84, 1>}, {pipeline_mode = #tpu.pipeline_mode<synchronous>, transform_indices = @transform_9, window_bounds = array<i64: 10, 84>}, {pipeline_mode = #tpu.pipeline_mode<synchronous>, transform_indices = @transform_10, window_bounds = array<i64: 10, 1>}, {transform_indices = @transform_11, window_bounds = array<i64: 1, 10, 1>}]} {
    %c0 = arith.constant 0 : index
    %c0_0 = arith.constant 0 : index
    %0 = vector.load %arg1[%c0, %c0_0] : memref<3x896xf32, #tpu.memory_space<vmem>>, vector<3x896xf32>
    %cst = arith.constant 0.000000e+00 : f32
    %1 = vector.broadcast %cst : f32 to vector<6x896xf32>
    %c0_1 = arith.constant 0 : index
    %c0_2 = arith.constant 0 : index
    %c0_3 = arith.constant 0 : index
    %2 = vector.load %arg2[%c0_1, %c0_2, %c0_3] : memref<25x6x3xf32, #tpu.memory_space<vmem>>, vector<1x6x3xf32>
    %3 = vector.shape_cast %2 : vector<1x6x3xf32> to vector<6x3xf32>
    %cst_4 = arith.constant dense<0.000000e+00> : vector<6x896xf32>
    %4 = tpu.matmul %3, %0, %cst_4 {dimension_numbers = #tpu.dot_dimension_numbers<[1], [0], [0], [1], [0, 0, 1, 1], [], []>} : vector<6x3xf32>, vector<3x896xf32>, vector<6x896xf32> -> vector<6x896xf32>
    %5 = arith.addf %1, %4 : vector<6x896xf32>
    %c1 = arith.constant 1 : index
    %c0_5 = arith.constant 0 : index
    %c0_6 = arith.constant 0 : index
    %6 = vector.load %arg2[%c1, %c0_5, %c0_6] : memref<25x6x3xf32, #tpu.memory_space<vmem>>, vector<1x6x3xf32>
    %7 = vector.shape_cast %6 : vector<1x6x3xf32> to vector<6x3xf32>
    %8 = vector.extract_strided_slice %0 {offsets = [0, 1], sizes = [3, 895], strides = [1, 1]} : vector<3x896xf32> to vector<3x895xf32>
    %cst_7 = arith.constant 0.000000e+00 : f32
    %9 = vector.broadcast %cst_7 : f32 to vector<3x1xf32>
    %10 = tpu.concatenate %8, %9 in 1 : vector<3x895xf32>, vector<3x1xf32> -> vector<3x896xf32>
    %cst_8 = arith.constant dense<0.000000e+00> : vector<6x896xf32>
    %11 = tpu.matmul %7, %10, %cst_8 {dimension_numbers = #tpu.dot_dimension_numbers<[1], [0], [0], [1], [0, 0, 1, 1], [], []>} : vector<6x3xf32>, vector<3x896xf32>, vector<6x896xf32> -> vector<6x896xf32>
    %12 = arith.addf %5, %11 : vector<6x896xf32>
    %c2 = arith.constant 2 : index
    %c0_9 = arith.constant 0 : index
    %c0_10 = arith.constant 0 : index
    %13 = vector.load %arg2[%c2, %c0_9, %c0_10] : memref<25x6x3xf32, #tpu.memory_space<vmem>>, vector<1x6x3xf32>
    %14 = vector.shape_cast %13 : vector<1x6x3xf32> to vector<6x3xf32>
    %15 = vector.extract_strided_slice %0 {offsets = [0, 2], sizes = [3, 894], strides = [1, 1]} : vector<3x896xf32> to vector<3x894xf32>
    %cst_11 = arith.constant 0.000000e+00 : f32
    %16 = vector.broadcast %cst_11 : f32 to vector<3x2xf32>
    %17 = tpu.concatenate %15, %16 in 1 : vector<3x894xf32>, vector<3x2xf32> -> vector<3x896xf32>
    %cst_12 = arith.constant dense<0.000000e+00> : vector<6x896xf32>
    %18 = tpu.matmul %14, %17, %cst_12 {dimension_numbers = #tpu.dot_dimension_numbers<[1], [0], [0], [1], [0, 0, 1, 1], [], []>} : vector<6x3xf32>, vector<3x896xf32>, vector<6x896xf32> -> vector<6x896xf32>
    %19 = arith.addf %12, %18 : vector<6x896xf32>
    %c3 = arith.constant 3 : index
    %c0_13 = arith.constant 0 : index
    %c0_14 = arith.constant 0 : index
    %20 = vector.load %arg2[%c3, %c0_13, %c0_14] : memref<25x6x3xf32, #tpu.memory_space<vmem>>, vector<1x6x3xf32>
    %21 = vector.shape_cast %20 : vector<1x6x3xf32> to vector<6x3xf32>
    %22 = vector.extract_strided_slice %0 {offsets = [0, 3], sizes = [3, 893], strides = [1, 1]} : vector<3x896xf32> to vector<3x893xf32>
    %cst_15 = arith.constant 0.000000e+00 : f32
    %23 = vector.broadcast %cst_15 : f32 to vector<3x3xf32>
    %24 = tpu.concatenate %22, %23 in 1 : vector<3x893xf32>, vector<3x3xf32> -> vector<3x896xf32>
    %cst_16 = arith.constant dense<0.000000e+00> : vector<6x896xf32>
    %25 = tpu.matmul %21, %24, %cst_16 {dimension_numbers = #tpu.dot_dimension_numbers<[1], [0], [0], [1], [0, 0, 1, 1], [], []>} : vector<6x3xf32>, vector<3x896xf32>, vector<6x896xf32> -> vector<6x896xf32>
    %26 = arith.addf %19, %25 : vector<6x896xf32>
    %c4 = arith.constant 4 : index
    %c0_17 = arith.constant 0 : index
    %c0_18 = arith.constant 0 : index
    %27 = vector.load %arg2[%c4, %c0_17, %c0_18] : memref<25x6x3xf32, #tpu.memory_space<vmem>>, vector<1x6x3xf32>
    %28 = vector.shape_cast %27 : vector<1x6x3xf32> to vector<6x3xf32>
    %29 = vector.extract_strided_slice %0 {offsets = [0, 4], sizes = [3, 892], strides = [1, 1]} : vector<3x896xf32> to vector<3x892xf32>
    %cst_19 = arith.constant 0.000000e+00 : f32
    %30 = vector.broadcast %cst_19 : f32 to vector<3x4xf32>
    %31 = tpu.concatenate %29, %30 in 1 : vector<3x892xf32>, vector<3x4xf32> -> vector<3x896xf32>
    %cst_20 = arith.constant dense<0.000000e+00> : vector<6x896xf32>
    %32 = tpu.matmul %28, %31, %cst_20 {dimension_numbers = #tpu.dot_dimension_numbers<[1], [0], [0], [1], [0, 0, 1, 1], [], []>} : vector<6x3xf32>, vector<3x896xf32>, vector<6x896xf32> -> vector<6x896xf32>
    %33 = arith.addf %26, %32 : vector<6x896xf32>
    %c5 = arith.constant 5 : index
    %c0_21 = arith.constant 0 : index
    %c0_22 = arith.constant 0 : index
    %34 = vector.load %arg2[%c5, %c0_21, %c0_22] : memref<25x6x3xf32, #tpu.memory_space<vmem>>, vector<1x6x3xf32>
    %35 = vector.shape_cast %34 : vector<1x6x3xf32> to vector<6x3xf32>
    %36 = vector.extract_strided_slice %0 {offsets = [0, 28], sizes = [3, 868], strides = [1, 1]} : vector<3x896xf32> to vector<3x868xf32>
    %cst_23 = arith.constant 0.000000e+00 : f32
    %37 = vector.broadcast %cst_23 : f32 to vector<3x28xf32>
    %38 = tpu.concatenate %36, %37 in 1 : vector<3x868xf32>, vector<3x28xf32> -> vector<3x896xf32>
    %cst_24 = arith.constant dense<0.000000e+00> : vector<6x896xf32>
    %39 = tpu.matmul %35, %38, %cst_24 {dimension_numbers = #tpu.dot_dimension_numbers<[1], [0], [0], [1], [0, 0, 1, 1], [], []>} : vector<6x3xf32>, vector<3x896xf32>, vector<6x896xf32> -> vector<6x896xf32>
    %40 = arith.addf %33, %39 : vector<6x896xf32>
    %c6 = arith.constant 6 : index
    %c0_25 = arith.constant 0 : index
    %c0_26 = arith.constant 0 : index
    %41 = vector.load %arg2[%c6, %c0_25, %c0_26] : memref<25x6x3xf32, #tpu.memory_space<vmem>>, vector<1x6x3xf32>
    %42 = vector.shape_cast %41 : vector<1x6x3xf32> to vector<6x3xf32>
    %43 = vector.extract_strided_slice %0 {offsets = [0, 29], sizes = [3, 867], strides = [1, 1]} : vector<3x896xf32> to vector<3x867xf32>
    %cst_27 = arith.constant 0.000000e+00 : f32
    %44 = vector.broadcast %cst_27 : f32 to vector<3x29xf32>
    %45 = tpu.concatenate %43, %44 in 1 : vector<3x867xf32>, vector<3x29xf32> -> vector<3x896xf32>
    %cst_28 = arith.constant dense<0.000000e+00> : vector<6x896xf32>
    %46 = tpu.matmul %42, %45, %cst_28 {dimension_numbers = #tpu.dot_dimension_numbers<[1], [0], [0], [1], [0, 0, 1, 1], [], []>} : vector<6x3xf32>, vector<3x896xf32>, vector<6x896xf32> -> vector<6x896xf32>
    %47 = arith.addf %40, %46 : vector<6x896xf32>
    %c7 = arith.constant 7 : index
    %c0_29 = arith.constant 0 : index
    %c0_30 = arith.constant 0 : index
    %48 = vector.load %arg2[%c7, %c0_29, %c0_30] : memref<25x6x3xf32, #tpu.memory_space<vmem>>, vector<1x6x3xf32>
    %49 = vector.shape_cast %48 : vector<1x6x3xf32> to vector<6x3xf32>
    %50 = vector.extract_strided_slice %0 {offsets = [0, 30], sizes = [3, 866], strides = [1, 1]} : vector<3x896xf32> to vector<3x866xf32>
    %cst_31 = arith.constant 0.000000e+00 : f32
    %51 = vector.broadcast %cst_31 : f32 to vector<3x30xf32>
    %52 = tpu.concatenate %50, %51 in 1 : vector<3x866xf32>, vector<3x30xf32> -> vector<3x896xf32>
    %cst_32 = arith.constant dense<0.000000e+00> : vector<6x896xf32>
    %53 = tpu.matmul %49, %52, %cst_32 {dimension_numbers = #tpu.dot_dimension_numbers<[1], [0], [0], [1], [0, 0, 1, 1], [], []>} : vector<6x3xf32>, vector<3x896xf32>, vector<6x896xf32> -> vector<6x896xf32>
    %54 = arith.addf %47, %53 : vector<6x896xf32>
    %c8 = arith.constant 8 : index
    %c0_33 = arith.constant 0 : index
    %c0_34 = arith.constant 0 : index
    %55 = vector.load %arg2[%c8, %c0_33, %c0_34] : memref<25x6x3xf32, #tpu.memory_space<vmem>>, vector<1x6x3xf32>
    %56 = vector.shape_cast %55 : vector<1x6x3xf32> to vector<6x3xf32>
    %57 = vector.extract_strided_slice %0 {offsets = [0, 31], sizes = [3, 865], strides = [1, 1]} : vector<3x896xf32> to vector<3x865xf32>
    %cst_35 = arith.constant 0.000000e+00 : f32
    %58 = vector.broadcast %cst_35 : f32 to vector<3x31xf32>
    %59 = tpu.concatenate %57, %58 in 1 : vector<3x865xf32>, vector<3x31xf32> -> vector<3x896xf32>
    %cst_36 = arith.constant dense<0.000000e+00> : vector<6x896xf32>
    %60 = tpu.matmul %56, %59, %cst_36 {dimension_numbers = #tpu.dot_dimension_numbers<[1], [0], [0], [1], [0, 0, 1, 1], [], []>} : vector<6x3xf32>, vector<3x896xf32>, vector<6x896xf32> -> vector<6x896xf32>
    %61 = arith.addf %54, %60 : vector<6x896xf32>
    %c9 = arith.constant 9 : index
    %c0_37 = arith.constant 0 : index
    %c0_38 = arith.constant 0 : index
    %62 = vector.load %arg2[%c9, %c0_37, %c0_38] : memref<25x6x3xf32, #tpu.memory_space<vmem>>, vector<1x6x3xf32>
    %63 = vector.shape_cast %62 : vector<1x6x3xf32> to vector<6x3xf32>
    %64 = vector.extract_strided_slice %0 {offsets = [0, 32], sizes = [3, 864], strides = [1, 1]} : vector<3x896xf32> to vector<3x864xf32>
    %cst_39 = arith.constant 0.000000e+00 : f32
    %65 = vector.broadcast %cst_39 : f32 to vector<3x32xf32>
    %66 = tpu.concatenate %64, %65 in 1 : vector<3x864xf32>, vector<3x32xf32> -> vector<3x896xf32>
    %cst_40 = arith.constant dense<0.000000e+00> : vector<6x896xf32>
    %67 = tpu.matmul %63, %66, %cst_40 {dimension_numbers = #tpu.dot_dimension_numbers<[1], [0], [0], [1], [0, 0, 1, 1], [], []>} : vector<6x3xf32>, vector<3x896xf32>, vector<6x896xf32> -> vector<6x896xf32>
    %68 = arith.addf %61, %67 : vector<6x896xf32>
    %c10 = arith.constant 10 : index
    %c0_41 = arith.constant 0 : index
    %c0_42 = arith.constant 0 : index
    %69 = vector.load %arg2[%c10, %c0_41, %c0_42] : memref<25x6x3xf32, #tpu.memory_space<vmem>>, vector<1x6x3xf32>
    %70 = vector.shape_cast %69 : vector<1x6x3xf32> to vector<6x3xf32>
    %71 = vector.extract_strided_slice %0 {offsets = [0, 56], sizes = [3, 840], strides = [1, 1]} : vector<3x896xf32> to vector<3x840xf32>
    %cst_43 = arith.constant 0.000000e+00 : f32
    %72 = vector.broadcast %cst_43 : f32 to vector<3x56xf32>
    %73 = tpu.concatenate %71, %72 in 1 : vector<3x840xf32>, vector<3x56xf32> -> vector<3x896xf32>
    %cst_44 = arith.constant dense<0.000000e+00> : vector<6x896xf32>
    %74 = tpu.matmul %70, %73, %cst_44 {dimension_numbers = #tpu.dot_dimension_numbers<[1], [0], [0], [1], [0, 0, 1, 1], [], []>} : vector<6x3xf32>, vector<3x896xf32>, vector<6x896xf32> -> vector<6x896xf32>
    %75 = arith.addf %68, %74 : vector<6x896xf32>
    %c11 = arith.constant 11 : index
    %c0_45 = arith.constant 0 : index
    %c0_46 = arith.constant 0 : index
    %76 = vector.load %arg2[%c11, %c0_45, %c0_46] : memref<25x6x3xf32, #tpu.memory_space<vmem>>, vector<1x6x3xf32>
    %77 = vector.shape_cast %76 : vector<1x6x3xf32> to vector<6x3xf32>
    %78 = vector.extract_strided_slice %0 {offsets = [0, 57], sizes = [3, 839], strides = [1, 1]} : vector<3x896xf32> to vector<3x839xf32>
    %cst_47 = arith.constant 0.000000e+00 : f32
    %79 = vector.broadcast %cst_47 : f32 to vector<3x57xf32>
    %80 = tpu.concatenate %78, %79 in 1 : vector<3x839xf32>, vector<3x57xf32> -> vector<3x896xf32>
    %cst_48 = arith.constant dense<0.000000e+00> : vector<6x896xf32>
    %81 = tpu.matmul %77, %80, %cst_48 {dimension_numbers = #tpu.dot_dimension_numbers<[1], [0], [0], [1], [0, 0, 1, 1], [], []>} : vector<6x3xf32>, vector<3x896xf32>, vector<6x896xf32> -> vector<6x896xf32>
    %82 = arith.addf %75, %81 : vector<6x896xf32>
    %c12 = arith.constant 12 : index
    %c0_49 = arith.constant 0 : index
    %c0_50 = arith.constant 0 : index
    %83 = vector.load %arg2[%c12, %c0_49, %c0_50] : memref<25x6x3xf32, #tpu.memory_space<vmem>>, vector<1x6x3xf32>
    %84 = vector.shape_cast %83 : vector<1x6x3xf32> to vector<6x3xf32>
    %85 = vector.extract_strided_slice %0 {offsets = [0, 58], sizes = [3, 838], strides = [1, 1]} : vector<3x896xf32> to vector<3x838xf32>
    %cst_51 = arith.constant 0.000000e+00 : f32
    %86 = vector.broadcast %cst_51 : f32 to vector<3x58xf32>
    %87 = tpu.concatenate %85, %86 in 1 : vector<3x838xf32>, vector<3x58xf32> -> vector<3x896xf32>
    %cst_52 = arith.constant dense<0.000000e+00> : vector<6x896xf32>
    %88 = tpu.matmul %84, %87, %cst_52 {dimension_numbers = #tpu.dot_dimension_numbers<[1], [0], [0], [1], [0, 0, 1, 1], [], []>} : vector<6x3xf32>, vector<3x896xf32>, vector<6x896xf32> -> vector<6x896xf32>
    %89 = arith.addf %82, %88 : vector<6x896xf32>
    %c13 = arith.constant 13 : index
    %c0_53 = arith.constant 0 : index
    %c0_54 = arith.constant 0 : index
    %90 = vector.load %arg2[%c13, %c0_53, %c0_54] : memref<25x6x3xf32, #tpu.memory_space<vmem>>, vector<1x6x3xf32>
    %91 = vector.shape_cast %90 : vector<1x6x3xf32> to vector<6x3xf32>
    %92 = vector.extract_strided_slice %0 {offsets = [0, 59], sizes = [3, 837], strides = [1, 1]} : vector<3x896xf32> to vector<3x837xf32>
    %cst_55 = arith.constant 0.000000e+00 : f32
    %93 = vector.broadcast %cst_55 : f32 to vector<3x59xf32>
    %94 = tpu.concatenate %92, %93 in 1 : vector<3x837xf32>, vector<3x59xf32> -> vector<3x896xf32>
    %cst_56 = arith.constant dense<0.000000e+00> : vector<6x896xf32>
    %95 = tpu.matmul %91, %94, %cst_56 {dimension_numbers = #tpu.dot_dimension_numbers<[1], [0], [0], [1], [0, 0, 1, 1], [], []>} : vector<6x3xf32>, vector<3x896xf32>, vector<6x896xf32> -> vector<6x896xf32>
    %96 = arith.addf %89, %95 : vector<6x896xf32>
    %c14 = arith.constant 14 : index
    %c0_57 = arith.constant 0 : index
    %c0_58 = arith.constant 0 : index
    %97 = vector.load %arg2[%c14, %c0_57, %c0_58] : memref<25x6x3xf32, #tpu.memory_space<vmem>>, vector<1x6x3xf32>
    %98 = vector.shape_cast %97 : vector<1x6x3xf32> to vector<6x3xf32>
    %99 = vector.extract_strided_slice %0 {offsets = [0, 60], sizes = [3, 836], strides = [1, 1]} : vector<3x896xf32> to vector<3x836xf32>
    %cst_59 = arith.constant 0.000000e+00 : f32
    %100 = vector.broadcast %cst_59 : f32 to vector<3x60xf32>
    %101 = tpu.concatenate %99, %100 in 1 : vector<3x836xf32>, vector<3x60xf32> -> vector<3x896xf32>
    %cst_60 = arith.constant dense<0.000000e+00> : vector<6x896xf32>
    %102 = tpu.matmul %98, %101, %cst_60 {dimension_numbers = #tpu.dot_dimension_numbers<[1], [0], [0], [1], [0, 0, 1, 1], [], []>} : vector<6x3xf32>, vector<3x896xf32>, vector<6x896xf32> -> vector<6x896xf32>
    %103 = arith.addf %96, %102 : vector<6x896xf32>
    %c15 = arith.constant 15 : index
    %c0_61 = arith.constant 0 : index
    %c0_62 = arith.constant 0 : index
    %104 = vector.load %arg2[%c15, %c0_61, %c0_62] : memref<25x6x3xf32, #tpu.memory_space<vmem>>, vector<1x6x3xf32>
    %105 = vector.shape_cast %104 : vector<1x6x3xf32> to vector<6x3xf32>
    %106 = vector.extract_strided_slice %0 {offsets = [0, 84], sizes = [3, 812], strides = [1, 1]} : vector<3x896xf32> to vector<3x812xf32>
    %cst_63 = arith.constant 0.000000e+00 : f32
    %107 = vector.broadcast %cst_63 : f32 to vector<3x84xf32>
    %108 = tpu.concatenate %106, %107 in 1 : vector<3x812xf32>, vector<3x84xf32> -> vector<3x896xf32>
    %cst_64 = arith.constant dense<0.000000e+00> : vector<6x896xf32>
    %109 = tpu.matmul %105, %108, %cst_64 {dimension_numbers = #tpu.dot_dimension_numbers<[1], [0], [0], [1], [0, 0, 1, 1], [], []>} : vector<6x3xf32>, vector<3x896xf32>, vector<6x896xf32> -> vector<6x896xf32>
    %110 = arith.addf %103, %109 : vector<6x896xf32>
    %c16 = arith.constant 16 : index
    %c0_65 = arith.constant 0 : index
    %c0_66 = arith.constant 0 : index
    %111 = vector.load %arg2[%c16, %c0_65, %c0_66] : memref<25x6x3xf32, #tpu.memory_space<vmem>>, vector<1x6x3xf32>
    %112 = vector.shape_cast %111 : vector<1x6x3xf32> to vector<6x3xf32>
    %113 = vector.extract_strided_slice %0 {offsets = [0, 85], sizes = [3, 811], strides = [1, 1]} : vector<3x896xf32> to vector<3x811xf32>
    %cst_67 = arith.constant 0.000000e+00 : f32
    %114 = vector.broadcast %cst_67 : f32 to vector<3x85xf32>
    %115 = tpu.concatenate %113, %114 in 1 : vector<3x811xf32>, vector<3x85xf32> -> vector<3x896xf32>
    %cst_68 = arith.constant dense<0.000000e+00> : vector<6x896xf32>
    %116 = tpu.matmul %112, %115, %cst_68 {dimension_numbers = #tpu.dot_dimension_numbers<[1], [0], [0], [1], [0, 0, 1, 1], [], []>} : vector<6x3xf32>, vector<3x896xf32>, vector<6x896xf32> -> vector<6x896xf32>
    %117 = arith.addf %110, %116 : vector<6x896xf32>
    %c17 = arith.constant 17 : index
    %c0_69 = arith.constant 0 : index
    %c0_70 = arith.constant 0 : index
    %118 = vector.load %arg2[%c17, %c0_69, %c0_70] : memref<25x6x3xf32, #tpu.memory_space<vmem>>, vector<1x6x3xf32>
    %119 = vector.shape_cast %118 : vector<1x6x3xf32> to vector<6x3xf32>
    %120 = vector.extract_strided_slice %0 {offsets = [0, 86], sizes = [3, 810], strides = [1, 1]} : vector<3x896xf32> to vector<3x810xf32>
    %cst_71 = arith.constant 0.000000e+00 : f32
    %121 = vector.broadcast %cst_71 : f32 to vector<3x86xf32>
    %122 = tpu.concatenate %120, %121 in 1 : vector<3x810xf32>, vector<3x86xf32> -> vector<3x896xf32>
    %cst_72 = arith.constant dense<0.000000e+00> : vector<6x896xf32>
    %123 = tpu.matmul %119, %122, %cst_72 {dimension_numbers = #tpu.dot_dimension_numbers<[1], [0], [0], [1], [0, 0, 1, 1], [], []>} : vector<6x3xf32>, vector<3x896xf32>, vector<6x896xf32> -> vector<6x896xf32>
    %124 = arith.addf %117, %123 : vector<6x896xf32>
    %c18 = arith.constant 18 : index
    %c0_73 = arith.constant 0 : index
    %c0_74 = arith.constant 0 : index
    %125 = vector.load %arg2[%c18, %c0_73, %c0_74] : memref<25x6x3xf32, #tpu.memory_space<vmem>>, vector<1x6x3xf32>
    %126 = vector.shape_cast %125 : vector<1x6x3xf32> to vector<6x3xf32>
    %127 = vector.extract_strided_slice %0 {offsets = [0, 87], sizes = [3, 809], strides = [1, 1]} : vector<3x896xf32> to vector<3x809xf32>
    %cst_75 = arith.constant 0.000000e+00 : f32
    %128 = vector.broadcast %cst_75 : f32 to vector<3x87xf32>
    %129 = tpu.concatenate %127, %128 in 1 : vector<3x809xf32>, vector<3x87xf32> -> vector<3x896xf32>
    %cst_76 = arith.constant dense<0.000000e+00> : vector<6x896xf32>
    %130 = tpu.matmul %126, %129, %cst_76 {dimension_numbers = #tpu.dot_dimension_numbers<[1], [0], [0], [1], [0, 0, 1, 1], [], []>} : vector<6x3xf32>, vector<3x896xf32>, vector<6x896xf32> -> vector<6x896xf32>
    %131 = arith.addf %124, %130 : vector<6x896xf32>
    %c19 = arith.constant 19 : index
    %c0_77 = arith.constant 0 : index
    %c0_78 = arith.constant 0 : index
    %132 = vector.load %arg2[%c19, %c0_77, %c0_78] : memref<25x6x3xf32, #tpu.memory_space<vmem>>, vector<1x6x3xf32>
    %133 = vector.shape_cast %132 : vector<1x6x3xf32> to vector<6x3xf32>
    %134 = vector.extract_strided_slice %0 {offsets = [0, 88], sizes = [3, 808], strides = [1, 1]} : vector<3x896xf32> to vector<3x808xf32>
    %cst_79 = arith.constant 0.000000e+00 : f32
    %135 = vector.broadcast %cst_79 : f32 to vector<3x88xf32>
    %136 = tpu.concatenate %134, %135 in 1 : vector<3x808xf32>, vector<3x88xf32> -> vector<3x896xf32>
    %cst_80 = arith.constant dense<0.000000e+00> : vector<6x896xf32>
    %137 = tpu.matmul %133, %136, %cst_80 {dimension_numbers = #tpu.dot_dimension_numbers<[1], [0], [0], [1], [0, 0, 1, 1], [], []>} : vector<6x3xf32>, vector<3x896xf32>, vector<6x896xf32> -> vector<6x896xf32>
    %138 = arith.addf %131, %137 : vector<6x896xf32>
    %c20 = arith.constant 20 : index
    %c0_81 = arith.constant 0 : index
    %c0_82 = arith.constant 0 : index
    %139 = vector.load %arg2[%c20, %c0_81, %c0_82] : memref<25x6x3xf32, #tpu.memory_space<vmem>>, vector<1x6x3xf32>
    %140 = vector.shape_cast %139 : vector<1x6x3xf32> to vector<6x3xf32>
    %141 = vector.extract_strided_slice %0 {offsets = [0, 112], sizes = [3, 784], strides = [1, 1]} : vector<3x896xf32> to vector<3x784xf32>
    %cst_83 = arith.constant 0.000000e+00 : f32
    %142 = vector.broadcast %cst_83 : f32 to vector<3x112xf32>
    %143 = tpu.concatenate %141, %142 in 1 : vector<3x784xf32>, vector<3x112xf32> -> vector<3x896xf32>
    %cst_84 = arith.constant dense<0.000000e+00> : vector<6x896xf32>
    %144 = tpu.matmul %140, %143, %cst_84 {dimension_numbers = #tpu.dot_dimension_numbers<[1], [0], [0], [1], [0, 0, 1, 1], [], []>} : vector<6x3xf32>, vector<3x896xf32>, vector<6x896xf32> -> vector<6x896xf32>
    %145 = arith.addf %138, %144 : vector<6x896xf32>
    %c21 = arith.constant 21 : index
    %c0_85 = arith.constant 0 : index
    %c0_86 = arith.constant 0 : index
    %146 = vector.load %arg2[%c21, %c0_85, %c0_86] : memref<25x6x3xf32, #tpu.memory_space<vmem>>, vector<1x6x3xf32>
    %147 = vector.shape_cast %146 : vector<1x6x3xf32> to vector<6x3xf32>
    %148 = vector.extract_strided_slice %0 {offsets = [0, 113], sizes = [3, 783], strides = [1, 1]} : vector<3x896xf32> to vector<3x783xf32>
    %cst_87 = arith.constant 0.000000e+00 : f32
    %149 = vector.broadcast %cst_87 : f32 to vector<3x113xf32>
    %150 = tpu.concatenate %148, %149 in 1 : vector<3x783xf32>, vector<3x113xf32> -> vector<3x896xf32>
    %cst_88 = arith.constant dense<0.000000e+00> : vector<6x896xf32>
    %151 = tpu.matmul %147, %150, %cst_88 {dimension_numbers = #tpu.dot_dimension_numbers<[1], [0], [0], [1], [0, 0, 1, 1], [], []>} : vector<6x3xf32>, vector<3x896xf32>, vector<6x896xf32> -> vector<6x896xf32>
    %152 = arith.addf %145, %151 : vector<6x896xf32>
    %c22 = arith.constant 22 : index
    %c0_89 = arith.constant 0 : index
    %c0_90 = arith.constant 0 : index
    %153 = vector.load %arg2[%c22, %c0_89, %c0_90] : memref<25x6x3xf32, #tpu.memory_space<vmem>>, vector<1x6x3xf32>
    %154 = vector.shape_cast %153 : vector<1x6x3xf32> to vector<6x3xf32>
    %155 = vector.extract_strided_slice %0 {offsets = [0, 114], sizes = [3, 782], strides = [1, 1]} : vector<3x896xf32> to vector<3x782xf32>
    %cst_91 = arith.constant 0.000000e+00 : f32
    %156 = vector.broadcast %cst_91 : f32 to vector<3x114xf32>
    %157 = tpu.concatenate %155, %156 in 1 : vector<3x782xf32>, vector<3x114xf32> -> vector<3x896xf32>
    %cst_92 = arith.constant dense<0.000000e+00> : vector<6x896xf32>
    %158 = tpu.matmul %154, %157, %cst_92 {dimension_numbers = #tpu.dot_dimension_numbers<[1], [0], [0], [1], [0, 0, 1, 1], [], []>} : vector<6x3xf32>, vector<3x896xf32>, vector<6x896xf32> -> vector<6x896xf32>
    %159 = arith.addf %152, %158 : vector<6x896xf32>
    %c23 = arith.constant 23 : index
    %c0_93 = arith.constant 0 : index
    %c0_94 = arith.constant 0 : index
    %160 = vector.load %arg2[%c23, %c0_93, %c0_94] : memref<25x6x3xf32, #tpu.memory_space<vmem>>, vector<1x6x3xf32>
    %161 = vector.shape_cast %160 : vector<1x6x3xf32> to vector<6x3xf32>
    %162 = vector.extract_strided_slice %0 {offsets = [0, 115], sizes = [3, 781], strides = [1, 1]} : vector<3x896xf32> to vector<3x781xf32>
    %cst_95 = arith.constant 0.000000e+00 : f32
    %163 = vector.broadcast %cst_95 : f32 to vector<3x115xf32>
    %164 = tpu.concatenate %162, %163 in 1 : vector<3x781xf32>, vector<3x115xf32> -> vector<3x896xf32>
    %cst_96 = arith.constant dense<0.000000e+00> : vector<6x896xf32>
    %165 = tpu.matmul %161, %164, %cst_96 {dimension_numbers = #tpu.dot_dimension_numbers<[1], [0], [0], [1], [0, 0, 1, 1], [], []>} : vector<6x3xf32>, vector<3x896xf32>, vector<6x896xf32> -> vector<6x896xf32>
    %166 = arith.addf %159, %165 : vector<6x896xf32>
    %c24 = arith.constant 24 : index
    %c0_97 = arith.constant 0 : index
    %c0_98 = arith.constant 0 : index
    %167 = vector.load %arg2[%c24, %c0_97, %c0_98] : memref<25x6x3xf32, #tpu.memory_space<vmem>>, vector<1x6x3xf32>
    %168 = vector.shape_cast %167 : vector<1x6x3xf32> to vector<6x3xf32>
    %169 = vector.extract_strided_slice %0 {offsets = [0, 116], sizes = [3, 780], strides = [1, 1]} : vector<3x896xf32> to vector<3x780xf32>
    %cst_99 = arith.constant 0.000000e+00 : f32
    %170 = vector.broadcast %cst_99 : f32 to vector<3x116xf32>
    %171 = tpu.concatenate %169, %170 in 1 : vector<3x780xf32>, vector<3x116xf32> -> vector<3x896xf32>
    %cst_100 = arith.constant dense<0.000000e+00> : vector<6x896xf32>
    %172 = tpu.matmul %168, %171, %cst_100 {dimension_numbers = #tpu.dot_dimension_numbers<[1], [0], [0], [1], [0, 0, 1, 1], [], []>} : vector<6x3xf32>, vector<3x896xf32>, vector<6x896xf32> -> vector<6x896xf32>
    %173 = arith.addf %166, %172 : vector<6x896xf32>
    %c0_101 = arith.constant 0 : index
    %c0_102 = arith.constant 0 : index
    %174 = vector.load %arg3[%c0_101, %c0_102] : memref<6x1xf32, #tpu.memory_space<vmem>>, vector<6x1xf32>
    %175 = vector.broadcast %174 : vector<6x1xf32> to vector<6x896xf32>
    %176 = arith.addf %173, %175 : vector<6x896xf32>
    %cst_103 = arith.constant 0.000000e+00 : f32
    %177 = vector.broadcast %cst_103 : f32 to vector<6x896xf32>
    %178 = arith.maximumf %176, %177 : vector<6x896xf32>
    %179 = vector.extract_strided_slice %178 {offsets = [0, 1], sizes = [6, 895], strides = [1, 1]} : vector<6x896xf32> to vector<6x895xf32>
    %cst_104 = arith.constant 0.000000e+00 : f32
    %180 = vector.broadcast %cst_104 : f32 to vector<6x1xf32>
    %181 = tpu.concatenate %179, %180 in 1 : vector<6x895xf32>, vector<6x1xf32> -> vector<6x896xf32>
    %182 = arith.maximumf %178, %181 : vector<6x896xf32>
    %183 = vector.extract_strided_slice %178 {offsets = [0, 28], sizes = [6, 868], strides = [1, 1]} : vector<6x896xf32> to vector<6x868xf32>
    %cst_105 = arith.constant 0.000000e+00 : f32
    %184 = vector.broadcast %cst_105 : f32 to vector<6x28xf32>
    %185 = tpu.concatenate %183, %184 in 1 : vector<6x868xf32>, vector<6x28xf32> -> vector<6x896xf32>
    %186 = vector.extract_strided_slice %178 {offsets = [0, 29], sizes = [6, 867], strides = [1, 1]} : vector<6x896xf32> to vector<6x867xf32>
    %cst_106 = arith.constant 0.000000e+00 : f32
    %187 = vector.broadcast %cst_106 : f32 to vector<6x29xf32>
    %188 = tpu.concatenate %186, %187 in 1 : vector<6x867xf32>, vector<6x29xf32> -> vector<6x896xf32>
    %189 = arith.maximumf %185, %188 : vector<6x896xf32>
    %190 = arith.maximumf %182, %189 : vector<6x896xf32>
    %cst_107 = arith.constant 0.000000e+00 : f32
    %191 = vector.broadcast %cst_107 : f32 to vector<16x896xf32>
    %c0_108 = arith.constant 0 : index
    %c0_109 = arith.constant 0 : index
    %c0_110 = arith.constant 0 : index
    %192 = vector.load %arg4[%c0_108, %c0_109, %c0_110] : memref<25x16x6xf32, #tpu.memory_space<vmem>>, vector<1x16x6xf32>
    %193 = vector.shape_cast %192 : vector<1x16x6xf32> to vector<16x6xf32>
    %cst_111 = arith.constant dense<0.000000e+00> : vector<16x896xf32>
    %194 = tpu.matmul %193, %190, %cst_111 {dimension_numbers = #tpu.dot_dimension_numbers<[1], [0], [0], [1], [0, 0, 1, 1], [], []>} : vector<16x6xf32>, vector<6x896xf32>, vector<16x896xf32> -> vector<16x896xf32>
    %195 = arith.addf %191, %194 : vector<16x896xf32>
    %c1_112 = arith.constant 1 : index
    %c0_113 = arith.constant 0 : index
    %c0_114 = arith.constant 0 : index
    %196 = vector.load %arg4[%c1_112, %c0_113, %c0_114] : memref<25x16x6xf32, #tpu.memory_space<vmem>>, vector<1x16x6xf32>
    %197 = vector.shape_cast %196 : vector<1x16x6xf32> to vector<16x6xf32>
    %198 = vector.extract_strided_slice %190 {offsets = [0, 2], sizes = [6, 894], strides = [1, 1]} : vector<6x896xf32> to vector<6x894xf32>
    %cst_115 = arith.constant 0.000000e+00 : f32
    %199 = vector.broadcast %cst_115 : f32 to vector<6x2xf32>
    %200 = tpu.concatenate %198, %199 in 1 : vector<6x894xf32>, vector<6x2xf32> -> vector<6x896xf32>
    %cst_116 = arith.constant dense<0.000000e+00> : vector<16x896xf32>
    %201 = tpu.matmul %197, %200, %cst_116 {dimension_numbers = #tpu.dot_dimension_numbers<[1], [0], [0], [1], [0, 0, 1, 1], [], []>} : vector<16x6xf32>, vector<6x896xf32>, vector<16x896xf32> -> vector<16x896xf32>
    %202 = arith.addf %195, %201 : vector<16x896xf32>
    %c2_117 = arith.constant 2 : index
    %c0_118 = arith.constant 0 : index
    %c0_119 = arith.constant 0 : index
    %203 = vector.load %arg4[%c2_117, %c0_118, %c0_119] : memref<25x16x6xf32, #tpu.memory_space<vmem>>, vector<1x16x6xf32>
    %204 = vector.shape_cast %203 : vector<1x16x6xf32> to vector<16x6xf32>
    %205 = vector.extract_strided_slice %190 {offsets = [0, 4], sizes = [6, 892], strides = [1, 1]} : vector<6x896xf32> to vector<6x892xf32>
    %cst_120 = arith.constant 0.000000e+00 : f32
    %206 = vector.broadcast %cst_120 : f32 to vector<6x4xf32>
    %207 = tpu.concatenate %205, %206 in 1 : vector<6x892xf32>, vector<6x4xf32> -> vector<6x896xf32>
    %cst_121 = arith.constant dense<0.000000e+00> : vector<16x896xf32>
    %208 = tpu.matmul %204, %207, %cst_121 {dimension_numbers = #tpu.dot_dimension_numbers<[1], [0], [0], [1], [0, 0, 1, 1], [], []>} : vector<16x6xf32>, vector<6x896xf32>, vector<16x896xf32> -> vector<16x896xf32>
    %209 = arith.addf %202, %208 : vector<16x896xf32>
    %c3_122 = arith.constant 3 : index
    %c0_123 = arith.constant 0 : index
    %c0_124 = arith.constant 0 : index
    %210 = vector.load %arg4[%c3_122, %c0_123, %c0_124] : memref<25x16x6xf32, #tpu.memory_space<vmem>>, vector<1x16x6xf32>
    %211 = vector.shape_cast %210 : vector<1x16x6xf32> to vector<16x6xf32>
    %212 = vector.extract_strided_slice %190 {offsets = [0, 6], sizes = [6, 890], strides = [1, 1]} : vector<6x896xf32> to vector<6x890xf32>
    %cst_125 = arith.constant 0.000000e+00 : f32
    %213 = vector.broadcast %cst_125 : f32 to vector<6x6xf32>
    %214 = tpu.concatenate %212, %213 in 1 : vector<6x890xf32>, vector<6x6xf32> -> vector<6x896xf32>
    %cst_126 = arith.constant dense<0.000000e+00> : vector<16x896xf32>
    %215 = tpu.matmul %211, %214, %cst_126 {dimension_numbers = #tpu.dot_dimension_numbers<[1], [0], [0], [1], [0, 0, 1, 1], [], []>} : vector<16x6xf32>, vector<6x896xf32>, vector<16x896xf32> -> vector<16x896xf32>
    %216 = arith.addf %209, %215 : vector<16x896xf32>
    %c4_127 = arith.constant 4 : index
    %c0_128 = arith.constant 0 : index
    %c0_129 = arith.constant 0 : index
    %217 = vector.load %arg4[%c4_127, %c0_128, %c0_129] : memref<25x16x6xf32, #tpu.memory_space<vmem>>, vector<1x16x6xf32>
    %218 = vector.shape_cast %217 : vector<1x16x6xf32> to vector<16x6xf32>
    %219 = vector.extract_strided_slice %190 {offsets = [0, 8], sizes = [6, 888], strides = [1, 1]} : vector<6x896xf32> to vector<6x888xf32>
    %cst_130 = arith.constant 0.000000e+00 : f32
    %220 = vector.broadcast %cst_130 : f32 to vector<6x8xf32>
    %221 = tpu.concatenate %219, %220 in 1 : vector<6x888xf32>, vector<6x8xf32> -> vector<6x896xf32>
    %cst_131 = arith.constant dense<0.000000e+00> : vector<16x896xf32>
    %222 = tpu.matmul %218, %221, %cst_131 {dimension_numbers = #tpu.dot_dimension_numbers<[1], [0], [0], [1], [0, 0, 1, 1], [], []>} : vector<16x6xf32>, vector<6x896xf32>, vector<16x896xf32> -> vector<16x896xf32>
    %223 = arith.addf %216, %222 : vector<16x896xf32>
    %c5_132 = arith.constant 5 : index
    %c0_133 = arith.constant 0 : index
    %c0_134 = arith.constant 0 : index
    %224 = vector.load %arg4[%c5_132, %c0_133, %c0_134] : memref<25x16x6xf32, #tpu.memory_space<vmem>>, vector<1x16x6xf32>
    %225 = vector.shape_cast %224 : vector<1x16x6xf32> to vector<16x6xf32>
    %226 = vector.extract_strided_slice %190 {offsets = [0, 56], sizes = [6, 840], strides = [1, 1]} : vector<6x896xf32> to vector<6x840xf32>
    %cst_135 = arith.constant 0.000000e+00 : f32
    %227 = vector.broadcast %cst_135 : f32 to vector<6x56xf32>
    %228 = tpu.concatenate %226, %227 in 1 : vector<6x840xf32>, vector<6x56xf32> -> vector<6x896xf32>
    %cst_136 = arith.constant dense<0.000000e+00> : vector<16x896xf32>
    %229 = tpu.matmul %225, %228, %cst_136 {dimension_numbers = #tpu.dot_dimension_numbers<[1], [0], [0], [1], [0, 0, 1, 1], [], []>} : vector<16x6xf32>, vector<6x896xf32>, vector<16x896xf32> -> vector<16x896xf32>
    %230 = arith.addf %223, %229 : vector<16x896xf32>
    %c6_137 = arith.constant 6 : index
    %c0_138 = arith.constant 0 : index
    %c0_139 = arith.constant 0 : index
    %231 = vector.load %arg4[%c6_137, %c0_138, %c0_139] : memref<25x16x6xf32, #tpu.memory_space<vmem>>, vector<1x16x6xf32>
    %232 = vector.shape_cast %231 : vector<1x16x6xf32> to vector<16x6xf32>
    %233 = vector.extract_strided_slice %190 {offsets = [0, 58], sizes = [6, 838], strides = [1, 1]} : vector<6x896xf32> to vector<6x838xf32>
    %cst_140 = arith.constant 0.000000e+00 : f32
    %234 = vector.broadcast %cst_140 : f32 to vector<6x58xf32>
    %235 = tpu.concatenate %233, %234 in 1 : vector<6x838xf32>, vector<6x58xf32> -> vector<6x896xf32>
    %cst_141 = arith.constant dense<0.000000e+00> : vector<16x896xf32>
    %236 = tpu.matmul %232, %235, %cst_141 {dimension_numbers = #tpu.dot_dimension_numbers<[1], [0], [0], [1], [0, 0, 1, 1], [], []>} : vector<16x6xf32>, vector<6x896xf32>, vector<16x896xf32> -> vector<16x896xf32>
    %237 = arith.addf %230, %236 : vector<16x896xf32>
    %c7_142 = arith.constant 7 : index
    %c0_143 = arith.constant 0 : index
    %c0_144 = arith.constant 0 : index
    %238 = vector.load %arg4[%c7_142, %c0_143, %c0_144] : memref<25x16x6xf32, #tpu.memory_space<vmem>>, vector<1x16x6xf32>
    %239 = vector.shape_cast %238 : vector<1x16x6xf32> to vector<16x6xf32>
    %240 = vector.extract_strided_slice %190 {offsets = [0, 60], sizes = [6, 836], strides = [1, 1]} : vector<6x896xf32> to vector<6x836xf32>
    %cst_145 = arith.constant 0.000000e+00 : f32
    %241 = vector.broadcast %cst_145 : f32 to vector<6x60xf32>
    %242 = tpu.concatenate %240, %241 in 1 : vector<6x836xf32>, vector<6x60xf32> -> vector<6x896xf32>
    %cst_146 = arith.constant dense<0.000000e+00> : vector<16x896xf32>
    %243 = tpu.matmul %239, %242, %cst_146 {dimension_numbers = #tpu.dot_dimension_numbers<[1], [0], [0], [1], [0, 0, 1, 1], [], []>} : vector<16x6xf32>, vector<6x896xf32>, vector<16x896xf32> -> vector<16x896xf32>
    %244 = arith.addf %237, %243 : vector<16x896xf32>
    %c8_147 = arith.constant 8 : index
    %c0_148 = arith.constant 0 : index
    %c0_149 = arith.constant 0 : index
    %245 = vector.load %arg4[%c8_147, %c0_148, %c0_149] : memref<25x16x6xf32, #tpu.memory_space<vmem>>, vector<1x16x6xf32>
    %246 = vector.shape_cast %245 : vector<1x16x6xf32> to vector<16x6xf32>
    %247 = vector.extract_strided_slice %190 {offsets = [0, 62], sizes = [6, 834], strides = [1, 1]} : vector<6x896xf32> to vector<6x834xf32>
    %cst_150 = arith.constant 0.000000e+00 : f32
    %248 = vector.broadcast %cst_150 : f32 to vector<6x62xf32>
    %249 = tpu.concatenate %247, %248 in 1 : vector<6x834xf32>, vector<6x62xf32> -> vector<6x896xf32>
    %cst_151 = arith.constant dense<0.000000e+00> : vector<16x896xf32>
    %250 = tpu.matmul %246, %249, %cst_151 {dimension_numbers = #tpu.dot_dimension_numbers<[1], [0], [0], [1], [0, 0, 1, 1], [], []>} : vector<16x6xf32>, vector<6x896xf32>, vector<16x896xf32> -> vector<16x896xf32>
    %251 = arith.addf %244, %250 : vector<16x896xf32>
    %c9_152 = arith.constant 9 : index
    %c0_153 = arith.constant 0 : index
    %c0_154 = arith.constant 0 : index
    %252 = vector.load %arg4[%c9_152, %c0_153, %c0_154] : memref<25x16x6xf32, #tpu.memory_space<vmem>>, vector<1x16x6xf32>
    %253 = vector.shape_cast %252 : vector<1x16x6xf32> to vector<16x6xf32>
    %254 = vector.extract_strided_slice %190 {offsets = [0, 64], sizes = [6, 832], strides = [1, 1]} : vector<6x896xf32> to vector<6x832xf32>
    %cst_155 = arith.constant 0.000000e+00 : f32
    %255 = vector.broadcast %cst_155 : f32 to vector<6x64xf32>
    %256 = tpu.concatenate %254, %255 in 1 : vector<6x832xf32>, vector<6x64xf32> -> vector<6x896xf32>
    %cst_156 = arith.constant dense<0.000000e+00> : vector<16x896xf32>
    %257 = tpu.matmul %253, %256, %cst_156 {dimension_numbers = #tpu.dot_dimension_numbers<[1], [0], [0], [1], [0, 0, 1, 1], [], []>} : vector<16x6xf32>, vector<6x896xf32>, vector<16x896xf32> -> vector<16x896xf32>
    %258 = arith.addf %251, %257 : vector<16x896xf32>
    %c10_157 = arith.constant 10 : index
    %c0_158 = arith.constant 0 : index
    %c0_159 = arith.constant 0 : index
    %259 = vector.load %arg4[%c10_157, %c0_158, %c0_159] : memref<25x16x6xf32, #tpu.memory_space<vmem>>, vector<1x16x6xf32>
    %260 = vector.shape_cast %259 : vector<1x16x6xf32> to vector<16x6xf32>
    %261 = vector.extract_strided_slice %190 {offsets = [0, 112], sizes = [6, 784], strides = [1, 1]} : vector<6x896xf32> to vector<6x784xf32>
    %cst_160 = arith.constant 0.000000e+00 : f32
    %262 = vector.broadcast %cst_160 : f32 to vector<6x112xf32>
    %263 = tpu.concatenate %261, %262 in 1 : vector<6x784xf32>, vector<6x112xf32> -> vector<6x896xf32>
    %cst_161 = arith.constant dense<0.000000e+00> : vector<16x896xf32>
    %264 = tpu.matmul %260, %263, %cst_161 {dimension_numbers = #tpu.dot_dimension_numbers<[1], [0], [0], [1], [0, 0, 1, 1], [], []>} : vector<16x6xf32>, vector<6x896xf32>, vector<16x896xf32> -> vector<16x896xf32>
    %265 = arith.addf %258, %264 : vector<16x896xf32>
    %c11_162 = arith.constant 11 : index
    %c0_163 = arith.constant 0 : index
    %c0_164 = arith.constant 0 : index
    %266 = vector.load %arg4[%c11_162, %c0_163, %c0_164] : memref<25x16x6xf32, #tpu.memory_space<vmem>>, vector<1x16x6xf32>
    %267 = vector.shape_cast %266 : vector<1x16x6xf32> to vector<16x6xf32>
    %268 = vector.extract_strided_slice %190 {offsets = [0, 114], sizes = [6, 782], strides = [1, 1]} : vector<6x896xf32> to vector<6x782xf32>
    %cst_165 = arith.constant 0.000000e+00 : f32
    %269 = vector.broadcast %cst_165 : f32 to vector<6x114xf32>
    %270 = tpu.concatenate %268, %269 in 1 : vector<6x782xf32>, vector<6x114xf32> -> vector<6x896xf32>
    %cst_166 = arith.constant dense<0.000000e+00> : vector<16x896xf32>
    %271 = tpu.matmul %267, %270, %cst_166 {dimension_numbers = #tpu.dot_dimension_numbers<[1], [0], [0], [1], [0, 0, 1, 1], [], []>} : vector<16x6xf32>, vector<6x896xf32>, vector<16x896xf32> -> vector<16x896xf32>
    %272 = arith.addf %265, %271 : vector<16x896xf32>
    %c12_167 = arith.constant 12 : index
    %c0_168 = arith.constant 0 : index
    %c0_169 = arith.constant 0 : index
    %273 = vector.load %arg4[%c12_167, %c0_168, %c0_169] : memref<25x16x6xf32, #tpu.memory_space<vmem>>, vector<1x16x6xf32>
    %274 = vector.shape_cast %273 : vector<1x16x6xf32> to vector<16x6xf32>
    %275 = vector.extract_strided_slice %190 {offsets = [0, 116], sizes = [6, 780], strides = [1, 1]} : vector<6x896xf32> to vector<6x780xf32>
    %cst_170 = arith.constant 0.000000e+00 : f32
    %276 = vector.broadcast %cst_170 : f32 to vector<6x116xf32>
    %277 = tpu.concatenate %275, %276 in 1 : vector<6x780xf32>, vector<6x116xf32> -> vector<6x896xf32>
    %cst_171 = arith.constant dense<0.000000e+00> : vector<16x896xf32>
    %278 = tpu.matmul %274, %277, %cst_171 {dimension_numbers = #tpu.dot_dimension_numbers<[1], [0], [0], [1], [0, 0, 1, 1], [], []>} : vector<16x6xf32>, vector<6x896xf32>, vector<16x896xf32> -> vector<16x896xf32>
    %279 = arith.addf %272, %278 : vector<16x896xf32>
    %c13_172 = arith.constant 13 : index
    %c0_173 = arith.constant 0 : index
    %c0_174 = arith.constant 0 : index
    %280 = vector.load %arg4[%c13_172, %c0_173, %c0_174] : memref<25x16x6xf32, #tpu.memory_space<vmem>>, vector<1x16x6xf32>
    %281 = vector.shape_cast %280 : vector<1x16x6xf32> to vector<16x6xf32>
    %282 = vector.extract_strided_slice %190 {offsets = [0, 118], sizes = [6, 778], strides = [1, 1]} : vector<6x896xf32> to vector<6x778xf32>
    %cst_175 = arith.constant 0.000000e+00 : f32
    %283 = vector.broadcast %cst_175 : f32 to vector<6x118xf32>
    %284 = tpu.concatenate %282, %283 in 1 : vector<6x778xf32>, vector<6x118xf32> -> vector<6x896xf32>
    %cst_176 = arith.constant dense<0.000000e+00> : vector<16x896xf32>
    %285 = tpu.matmul %281, %284, %cst_176 {dimension_numbers = #tpu.dot_dimension_numbers<[1], [0], [0], [1], [0, 0, 1, 1], [], []>} : vector<16x6xf32>, vector<6x896xf32>, vector<16x896xf32> -> vector<16x896xf32>
    %286 = arith.addf %279, %285 : vector<16x896xf32>
    %c14_177 = arith.constant 14 : index
    %c0_178 = arith.constant 0 : index
    %c0_179 = arith.constant 0 : index
    %287 = vector.load %arg4[%c14_177, %c0_178, %c0_179] : memref<25x16x6xf32, #tpu.memory_space<vmem>>, vector<1x16x6xf32>
    %288 = vector.shape_cast %287 : vector<1x16x6xf32> to vector<16x6xf32>
    %289 = vector.extract_strided_slice %190 {offsets = [0, 120], sizes = [6, 776], strides = [1, 1]} : vector<6x896xf32> to vector<6x776xf32>
    %cst_180 = arith.constant 0.000000e+00 : f32
    %290 = vector.broadcast %cst_180 : f32 to vector<6x120xf32>
    %291 = tpu.concatenate %289, %290 in 1 : vector<6x776xf32>, vector<6x120xf32> -> vector<6x896xf32>
    %cst_181 = arith.constant dense<0.000000e+00> : vector<16x896xf32>
    %292 = tpu.matmul %288, %291, %cst_181 {dimension_numbers = #tpu.dot_dimension_numbers<[1], [0], [0], [1], [0, 0, 1, 1], [], []>} : vector<16x6xf32>, vector<6x896xf32>, vector<16x896xf32> -> vector<16x896xf32>
    %293 = arith.addf %286, %292 : vector<16x896xf32>
    %c15_182 = arith.constant 15 : index
    %c0_183 = arith.constant 0 : index
    %c0_184 = arith.constant 0 : index
    %294 = vector.load %arg4[%c15_182, %c0_183, %c0_184] : memref<25x16x6xf32, #tpu.memory_space<vmem>>, vector<1x16x6xf32>
    %295 = vector.shape_cast %294 : vector<1x16x6xf32> to vector<16x6xf32>
    %296 = vector.extract_strided_slice %190 {offsets = [0, 168], sizes = [6, 728], strides = [1, 1]} : vector<6x896xf32> to vector<6x728xf32>
    %cst_185 = arith.constant 0.000000e+00 : f32
    %297 = vector.broadcast %cst_185 : f32 to vector<6x168xf32>
    %298 = tpu.concatenate %296, %297 in 1 : vector<6x728xf32>, vector<6x168xf32> -> vector<6x896xf32>
    %cst_186 = arith.constant dense<0.000000e+00> : vector<16x896xf32>
    %299 = tpu.matmul %295, %298, %cst_186 {dimension_numbers = #tpu.dot_dimension_numbers<[1], [0], [0], [1], [0, 0, 1, 1], [], []>} : vector<16x6xf32>, vector<6x896xf32>, vector<16x896xf32> -> vector<16x896xf32>
    %300 = arith.addf %293, %299 : vector<16x896xf32>
    %c16_187 = arith.constant 16 : index
    %c0_188 = arith.constant 0 : index
    %c0_189 = arith.constant 0 : index
    %301 = vector.load %arg4[%c16_187, %c0_188, %c0_189] : memref<25x16x6xf32, #tpu.memory_space<vmem>>, vector<1x16x6xf32>
    %302 = vector.shape_cast %301 : vector<1x16x6xf32> to vector<16x6xf32>
    %303 = vector.extract_strided_slice %190 {offsets = [0, 170], sizes = [6, 726], strides = [1, 1]} : vector<6x896xf32> to vector<6x726xf32>
    %cst_190 = arith.constant 0.000000e+00 : f32
    %304 = vector.broadcast %cst_190 : f32 to vector<6x170xf32>
    %305 = tpu.concatenate %303, %304 in 1 : vector<6x726xf32>, vector<6x170xf32> -> vector<6x896xf32>
    %cst_191 = arith.constant dense<0.000000e+00> : vector<16x896xf32>
    %306 = tpu.matmul %302, %305, %cst_191 {dimension_numbers = #tpu.dot_dimension_numbers<[1], [0], [0], [1], [0, 0, 1, 1], [], []>} : vector<16x6xf32>, vector<6x896xf32>, vector<16x896xf32> -> vector<16x896xf32>
    %307 = arith.addf %300, %306 : vector<16x896xf32>
    %c17_192 = arith.constant 17 : index
    %c0_193 = arith.constant 0 : index
    %c0_194 = arith.constant 0 : index
    %308 = vector.load %arg4[%c17_192, %c0_193, %c0_194] : memref<25x16x6xf32, #tpu.memory_space<vmem>>, vector<1x16x6xf32>
    %309 = vector.shape_cast %308 : vector<1x16x6xf32> to vector<16x6xf32>
    %310 = vector.extract_strided_slice %190 {offsets = [0, 172], sizes = [6, 724], strides = [1, 1]} : vector<6x896xf32> to vector<6x724xf32>
    %cst_195 = arith.constant 0.000000e+00 : f32
    %311 = vector.broadcast %cst_195 : f32 to vector<6x172xf32>
    %312 = tpu.concatenate %310, %311 in 1 : vector<6x724xf32>, vector<6x172xf32> -> vector<6x896xf32>
    %cst_196 = arith.constant dense<0.000000e+00> : vector<16x896xf32>
    %313 = tpu.matmul %309, %312, %cst_196 {dimension_numbers = #tpu.dot_dimension_numbers<[1], [0], [0], [1], [0, 0, 1, 1], [], []>} : vector<16x6xf32>, vector<6x896xf32>, vector<16x896xf32> -> vector<16x896xf32>
    %314 = arith.addf %307, %313 : vector<16x896xf32>
    %c18_197 = arith.constant 18 : index
    %c0_198 = arith.constant 0 : index
    %c0_199 = arith.constant 0 : index
    %315 = vector.load %arg4[%c18_197, %c0_198, %c0_199] : memref<25x16x6xf32, #tpu.memory_space<vmem>>, vector<1x16x6xf32>
    %316 = vector.shape_cast %315 : vector<1x16x6xf32> to vector<16x6xf32>
    %317 = vector.extract_strided_slice %190 {offsets = [0, 174], sizes = [6, 722], strides = [1, 1]} : vector<6x896xf32> to vector<6x722xf32>
    %cst_200 = arith.constant 0.000000e+00 : f32
    %318 = vector.broadcast %cst_200 : f32 to vector<6x174xf32>
    %319 = tpu.concatenate %317, %318 in 1 : vector<6x722xf32>, vector<6x174xf32> -> vector<6x896xf32>
    %cst_201 = arith.constant dense<0.000000e+00> : vector<16x896xf32>
    %320 = tpu.matmul %316, %319, %cst_201 {dimension_numbers = #tpu.dot_dimension_numbers<[1], [0], [0], [1], [0, 0, 1, 1], [], []>} : vector<16x6xf32>, vector<6x896xf32>, vector<16x896xf32> -> vector<16x896xf32>
    %321 = arith.addf %314, %320 : vector<16x896xf32>
    %c19_202 = arith.constant 19 : index
    %c0_203 = arith.constant 0 : index
    %c0_204 = arith.constant 0 : index
    %322 = vector.load %arg4[%c19_202, %c0_203, %c0_204] : memref<25x16x6xf32, #tpu.memory_space<vmem>>, vector<1x16x6xf32>
    %323 = vector.shape_cast %322 : vector<1x16x6xf32> to vector<16x6xf32>
    %324 = vector.extract_strided_slice %190 {offsets = [0, 176], sizes = [6, 720], strides = [1, 1]} : vector<6x896xf32> to vector<6x720xf32>
    %cst_205 = arith.constant 0.000000e+00 : f32
    %325 = vector.broadcast %cst_205 : f32 to vector<6x176xf32>
    %326 = tpu.concatenate %324, %325 in 1 : vector<6x720xf32>, vector<6x176xf32> -> vector<6x896xf32>
    %cst_206 = arith.constant dense<0.000000e+00> : vector<16x896xf32>
    %327 = tpu.matmul %323, %326, %cst_206 {dimension_numbers = #tpu.dot_dimension_numbers<[1], [0], [0], [1], [0, 0, 1, 1], [], []>} : vector<16x6xf32>, vector<6x896xf32>, vector<16x896xf32> -> vector<16x896xf32>
    %328 = arith.addf %321, %327 : vector<16x896xf32>
    %c20_207 = arith.constant 20 : index
    %c0_208 = arith.constant 0 : index
    %c0_209 = arith.constant 0 : index
    %329 = vector.load %arg4[%c20_207, %c0_208, %c0_209] : memref<25x16x6xf32, #tpu.memory_space<vmem>>, vector<1x16x6xf32>
    %330 = vector.shape_cast %329 : vector<1x16x6xf32> to vector<16x6xf32>
    %331 = vector.extract_strided_slice %190 {offsets = [0, 224], sizes = [6, 672], strides = [1, 1]} : vector<6x896xf32> to vector<6x672xf32>
    %cst_210 = arith.constant 0.000000e+00 : f32
    %332 = vector.broadcast %cst_210 : f32 to vector<6x224xf32>
    %333 = tpu.concatenate %331, %332 in 1 : vector<6x672xf32>, vector<6x224xf32> -> vector<6x896xf32>
    %cst_211 = arith.constant dense<0.000000e+00> : vector<16x896xf32>
    %334 = tpu.matmul %330, %333, %cst_211 {dimension_numbers = #tpu.dot_dimension_numbers<[1], [0], [0], [1], [0, 0, 1, 1], [], []>} : vector<16x6xf32>, vector<6x896xf32>, vector<16x896xf32> -> vector<16x896xf32>
    %335 = arith.addf %328, %334 : vector<16x896xf32>
    %c21_212 = arith.constant 21 : index
    %c0_213 = arith.constant 0 : index
    %c0_214 = arith.constant 0 : index
    %336 = vector.load %arg4[%c21_212, %c0_213, %c0_214] : memref<25x16x6xf32, #tpu.memory_space<vmem>>, vector<1x16x6xf32>
    %337 = vector.shape_cast %336 : vector<1x16x6xf32> to vector<16x6xf32>
    %338 = vector.extract_strided_slice %190 {offsets = [0, 226], sizes = [6, 670], strides = [1, 1]} : vector<6x896xf32> to vector<6x670xf32>
    %cst_215 = arith.constant 0.000000e+00 : f32
    %339 = vector.broadcast %cst_215 : f32 to vector<6x226xf32>
    %340 = tpu.concatenate %338, %339 in 1 : vector<6x670xf32>, vector<6x226xf32> -> vector<6x896xf32>
    %cst_216 = arith.constant dense<0.000000e+00> : vector<16x896xf32>
    %341 = tpu.matmul %337, %340, %cst_216 {dimension_numbers = #tpu.dot_dimension_numbers<[1], [0], [0], [1], [0, 0, 1, 1], [], []>} : vector<16x6xf32>, vector<6x896xf32>, vector<16x896xf32> -> vector<16x896xf32>
    %342 = arith.addf %335, %341 : vector<16x896xf32>
    %c22_217 = arith.constant 22 : index
    %c0_218 = arith.constant 0 : index
    %c0_219 = arith.constant 0 : index
    %343 = vector.load %arg4[%c22_217, %c0_218, %c0_219] : memref<25x16x6xf32, #tpu.memory_space<vmem>>, vector<1x16x6xf32>
    %344 = vector.shape_cast %343 : vector<1x16x6xf32> to vector<16x6xf32>
    %345 = vector.extract_strided_slice %190 {offsets = [0, 228], sizes = [6, 668], strides = [1, 1]} : vector<6x896xf32> to vector<6x668xf32>
    %cst_220 = arith.constant 0.000000e+00 : f32
    %346 = vector.broadcast %cst_220 : f32 to vector<6x228xf32>
    %347 = tpu.concatenate %345, %346 in 1 : vector<6x668xf32>, vector<6x228xf32> -> vector<6x896xf32>
    %cst_221 = arith.constant dense<0.000000e+00> : vector<16x896xf32>
    %348 = tpu.matmul %344, %347, %cst_221 {dimension_numbers = #tpu.dot_dimension_numbers<[1], [0], [0], [1], [0, 0, 1, 1], [], []>} : vector<16x6xf32>, vector<6x896xf32>, vector<16x896xf32> -> vector<16x896xf32>
    %349 = arith.addf %342, %348 : vector<16x896xf32>
    %c23_222 = arith.constant 23 : index
    %c0_223 = arith.constant 0 : index
    %c0_224 = arith.constant 0 : index
    %350 = vector.load %arg4[%c23_222, %c0_223, %c0_224] : memref<25x16x6xf32, #tpu.memory_space<vmem>>, vector<1x16x6xf32>
    %351 = vector.shape_cast %350 : vector<1x16x6xf32> to vector<16x6xf32>
    %352 = vector.extract_strided_slice %190 {offsets = [0, 230], sizes = [6, 666], strides = [1, 1]} : vector<6x896xf32> to vector<6x666xf32>
    %cst_225 = arith.constant 0.000000e+00 : f32
    %353 = vector.broadcast %cst_225 : f32 to vector<6x230xf32>
    %354 = tpu.concatenate %352, %353 in 1 : vector<6x666xf32>, vector<6x230xf32> -> vector<6x896xf32>
    %cst_226 = arith.constant dense<0.000000e+00> : vector<16x896xf32>
    %355 = tpu.matmul %351, %354, %cst_226 {dimension_numbers = #tpu.dot_dimension_numbers<[1], [0], [0], [1], [0, 0, 1, 1], [], []>} : vector<16x6xf32>, vector<6x896xf32>, vector<16x896xf32> -> vector<16x896xf32>
    %356 = arith.addf %349, %355 : vector<16x896xf32>
    %c24_227 = arith.constant 24 : index
    %c0_228 = arith.constant 0 : index
    %c0_229 = arith.constant 0 : index
    %357 = vector.load %arg4[%c24_227, %c0_228, %c0_229] : memref<25x16x6xf32, #tpu.memory_space<vmem>>, vector<1x16x6xf32>
    %358 = vector.shape_cast %357 : vector<1x16x6xf32> to vector<16x6xf32>
    %359 = vector.extract_strided_slice %190 {offsets = [0, 232], sizes = [6, 664], strides = [1, 1]} : vector<6x896xf32> to vector<6x664xf32>
    %cst_230 = arith.constant 0.000000e+00 : f32
    %360 = vector.broadcast %cst_230 : f32 to vector<6x232xf32>
    %361 = tpu.concatenate %359, %360 in 1 : vector<6x664xf32>, vector<6x232xf32> -> vector<6x896xf32>
    %cst_231 = arith.constant dense<0.000000e+00> : vector<16x896xf32>
    %362 = tpu.matmul %358, %361, %cst_231 {dimension_numbers = #tpu.dot_dimension_numbers<[1], [0], [0], [1], [0, 0, 1, 1], [], []>} : vector<16x6xf32>, vector<6x896xf32>, vector<16x896xf32> -> vector<16x896xf32>
    %363 = arith.addf %356, %362 : vector<16x896xf32>
    %c0_232 = arith.constant 0 : index
    %c0_233 = arith.constant 0 : index
    %364 = vector.load %arg5[%c0_232, %c0_233] : memref<16x1xf32, #tpu.memory_space<vmem>>, vector<16x1xf32>
    %365 = vector.broadcast %364 : vector<16x1xf32> to vector<16x896xf32>
    %366 = arith.addf %363, %365 : vector<16x896xf32>
    %cst_234 = arith.constant 0.000000e+00 : f32
    %367 = vector.broadcast %cst_234 : f32 to vector<16x896xf32>
    %368 = arith.maximumf %366, %367 : vector<16x896xf32>
    %369 = vector.extract_strided_slice %368 {offsets = [0, 2], sizes = [16, 894], strides = [1, 1]} : vector<16x896xf32> to vector<16x894xf32>
    %cst_235 = arith.constant 0.000000e+00 : f32
    %370 = vector.broadcast %cst_235 : f32 to vector<16x2xf32>
    %371 = tpu.concatenate %369, %370 in 1 : vector<16x894xf32>, vector<16x2xf32> -> vector<16x896xf32>
    %372 = arith.maximumf %368, %371 : vector<16x896xf32>
    %373 = vector.extract_strided_slice %368 {offsets = [0, 56], sizes = [16, 840], strides = [1, 1]} : vector<16x896xf32> to vector<16x840xf32>
    %cst_236 = arith.constant 0.000000e+00 : f32
    %374 = vector.broadcast %cst_236 : f32 to vector<16x56xf32>
    %375 = tpu.concatenate %373, %374 in 1 : vector<16x840xf32>, vector<16x56xf32> -> vector<16x896xf32>
    %376 = vector.extract_strided_slice %368 {offsets = [0, 58], sizes = [16, 838], strides = [1, 1]} : vector<16x896xf32> to vector<16x838xf32>
    %cst_237 = arith.constant 0.000000e+00 : f32
    %377 = vector.broadcast %cst_237 : f32 to vector<16x58xf32>
    %378 = tpu.concatenate %376, %377 in 1 : vector<16x838xf32>, vector<16x58xf32> -> vector<16x896xf32>
    %379 = arith.maximumf %375, %378 : vector<16x896xf32>
    %380 = arith.maximumf %372, %379 : vector<16x896xf32>
    %381 = vector.extract_strided_slice %380 {offsets = [0, 0], sizes = [16, 1], strides = [1, 1]} : vector<16x896xf32> to vector<16x1xf32>
    %382 = vector.extract_strided_slice %380 {offsets = [0, 4], sizes = [16, 1], strides = [1, 1]} : vector<16x896xf32> to vector<16x1xf32>
    %383 = vector.extract_strided_slice %380 {offsets = [0, 8], sizes = [16, 1], strides = [1, 1]} : vector<16x896xf32> to vector<16x1xf32>
    %384 = vector.extract_strided_slice %380 {offsets = [0, 12], sizes = [16, 1], strides = [1, 1]} : vector<16x896xf32> to vector<16x1xf32>
    %385 = vector.extract_strided_slice %380 {offsets = [0, 112], sizes = [16, 1], strides = [1, 1]} : vector<16x896xf32> to vector<16x1xf32>
    %386 = vector.extract_strided_slice %380 {offsets = [0, 116], sizes = [16, 1], strides = [1, 1]} : vector<16x896xf32> to vector<16x1xf32>
    %387 = vector.extract_strided_slice %380 {offsets = [0, 120], sizes = [16, 1], strides = [1, 1]} : vector<16x896xf32> to vector<16x1xf32>
    %388 = vector.extract_strided_slice %380 {offsets = [0, 124], sizes = [16, 1], strides = [1, 1]} : vector<16x896xf32> to vector<16x1xf32>
    %389 = vector.extract_strided_slice %380 {offsets = [0, 224], sizes = [16, 1], strides = [1, 1]} : vector<16x896xf32> to vector<16x1xf32>
    %390 = vector.extract_strided_slice %380 {offsets = [0, 228], sizes = [16, 1], strides = [1, 1]} : vector<16x896xf32> to vector<16x1xf32>
    %391 = vector.extract_strided_slice %380 {offsets = [0, 232], sizes = [16, 1], strides = [1, 1]} : vector<16x896xf32> to vector<16x1xf32>
    %392 = vector.extract_strided_slice %380 {offsets = [0, 236], sizes = [16, 1], strides = [1, 1]} : vector<16x896xf32> to vector<16x1xf32>
    %393 = vector.extract_strided_slice %380 {offsets = [0, 336], sizes = [16, 1], strides = [1, 1]} : vector<16x896xf32> to vector<16x1xf32>
    %394 = vector.extract_strided_slice %380 {offsets = [0, 340], sizes = [16, 1], strides = [1, 1]} : vector<16x896xf32> to vector<16x1xf32>
    %395 = vector.extract_strided_slice %380 {offsets = [0, 344], sizes = [16, 1], strides = [1, 1]} : vector<16x896xf32> to vector<16x1xf32>
    %396 = vector.extract_strided_slice %380 {offsets = [0, 348], sizes = [16, 1], strides = [1, 1]} : vector<16x896xf32> to vector<16x1xf32>
    %397 = tpu.concatenate %381, %382, %383, %384, %385, %386, %387, %388, %389, %390, %391, %392, %393, %394, %395, %396 in 0 : vector<16x1xf32>, vector<16x1xf32>, vector<16x1xf32>, vector<16x1xf32>, vector<16x1xf32>, vector<16x1xf32>, vector<16x1xf32>, vector<16x1xf32>, vector<16x1xf32>, vector<16x1xf32>, vector<16x1xf32>, vector<16x1xf32>, vector<16x1xf32>, vector<16x1xf32>, vector<16x1xf32>, vector<16x1xf32> -> vector<256x1xf32>
    %c0_238 = arith.constant 0 : index
    %c0_239 = arith.constant 0 : index
    %398 = vector.load %arg6[%c0_238, %c0_239] : memref<120x256xf32, #tpu.memory_space<vmem>>, vector<120x256xf32>
    %cst_240 = arith.constant dense<0.000000e+00> : vector<120x1xf32>
    %399 = tpu.matmul %398, %397, %cst_240 {dimension_numbers = #tpu.dot_dimension_numbers<[1], [0], [0], [1], [0, 0, 1, 1], [], []>} : vector<120x256xf32>, vector<256x1xf32>, vector<120x1xf32> -> vector<120x1xf32>
    %c0_241 = arith.constant 0 : index
    %c0_242 = arith.constant 0 : index
    %400 = vector.load %arg7[%c0_241, %c0_242] : memref<120x1xf32, #tpu.memory_space<vmem>>, vector<120x1xf32>
    %401 = arith.addf %399, %400 : vector<120x1xf32>
    %cst_243 = arith.constant 0.000000e+00 : f32
    %402 = vector.broadcast %cst_243 : f32 to vector<120x1xf32>
    %403 = arith.maximumf %401, %402 : vector<120x1xf32>
    %c0_244 = arith.constant 0 : index
    %c0_245 = arith.constant 0 : index
    %404 = vector.load %arg8[%c0_244, %c0_245] : memref<84x120xf32, #tpu.memory_space<vmem>>, vector<84x120xf32>
    %cst_246 = arith.constant dense<0.000000e+00> : vector<84x1xf32>
    %405 = tpu.matmul %404, %403, %cst_246 {dimension_numbers = #tpu.dot_dimension_numbers<[1], [0], [0], [1], [0, 0, 1, 1], [], []>} : vector<84x120xf32>, vector<120x1xf32>, vector<84x1xf32> -> vector<84x1xf32>
    %c0_247 = arith.constant 0 : index
    %c0_248 = arith.constant 0 : index
    %406 = vector.load %arg9[%c0_247, %c0_248] : memref<84x1xf32, #tpu.memory_space<vmem>>, vector<84x1xf32>
    %407 = arith.addf %405, %406 : vector<84x1xf32>
    %cst_249 = arith.constant 0.000000e+00 : f32
    %408 = vector.broadcast %cst_249 : f32 to vector<84x1xf32>
    %409 = arith.maximumf %407, %408 : vector<84x1xf32>
    %c0_250 = arith.constant 0 : index
    %c0_251 = arith.constant 0 : index
    %410 = vector.load %arg10[%c0_250, %c0_251] : memref<10x84xf32, #tpu.memory_space<vmem>>, vector<10x84xf32>
    %cst_252 = arith.constant dense<0.000000e+00> : vector<10x1xf32>
    %411 = tpu.matmul %410, %409, %cst_252 {dimension_numbers = #tpu.dot_dimension_numbers<[1], [0], [0], [1], [0, 0, 1, 1], [], []>} : vector<10x84xf32>, vector<84x1xf32>, vector<10x1xf32> -> vector<10x1xf32>
    %c0_253 = arith.constant 0 : index
    %c0_254 = arith.constant 0 : index
    %412 = vector.load %arg11[%c0_253, %c0_254] : memref<10x1xf32, #tpu.memory_space<vmem>>, vector<10x1xf32>
    %413 = arith.addf %411, %412 : vector<10x1xf32>
    %c0_255 = arith.constant 0 : index
    %c0_256 = arith.constant 0 : index
    %c0_257 = arith.constant 0 : index
    %414 = vector.load %arg12[%c0_255, %c0_256, %c0_257] : memref<1x10x1xf32, #tpu.memory_space<vmem>>, vector<1x10x1xf32>
    %415 = vector.shape_cast %414 : vector<1x10x1xf32> to vector<10x1xf32>
    %416 = vector.shape_cast %413 : vector<10x1xf32> to vector<1x10x1xf32>
    tpu.vector_store %arg12[%c0_255, %c0_256, %c0_257], %416 {strides = array<i32>} : memref<1x10x1xf32, #tpu.memory_space<vmem>>, vector<1x10x1xf32>,
    return
  }
  func.func @transform_0(%arg0: i32) -> (i32, i32) {
    %c0_i32 = arith.constant 0 : i32
    %c0_i32_0 = arith.constant 0 : i32
    return %c0_i32, %arg0 : i32, i32
  }
  func.func @transform_1(%arg0: i32) -> (i32, i32, i32) {
    %c0_i32 = arith.constant 0 : i32
    %c0_i32_0 = arith.constant 0 : i32
    %c0_i32_1 = arith.constant 0 : i32
    %c0_i32_2 = arith.constant 0 : i32
    return %c0_i32, %c0_i32_0, %c0_i32_1 : i32, i32, i32
  }
  func.func @transform_2(%arg0: i32) -> (i32, i32) {
    %c0_i32 = arith.constant 0 : i32
    %c0_i32_0 = arith.constant 0 : i32
    %c0_i32_1 = arith.constant 0 : i32
    return %c0_i32, %c0_i32_0 : i32, i32
  }
  func.func @transform_3(%arg0: i32) -> (i32, i32, i32) {
    %c0_i32 = arith.constant 0 : i32
    %c0_i32_0 = arith.constant 0 : i32
    %c0_i32_1 = arith.constant 0 : i32
    %c0_i32_2 = arith.constant 0 : i32
    return %c0_i32, %c0_i32_0, %c0_i32_1 : i32, i32, i32
  }
  func.func @transform_4(%arg0: i32) -> (i32, i32) {
    %c0_i32 = arith.constant 0 : i32
    %c0_i32_0 = arith.constant 0 : i32
    %c0_i32_1 = arith.constant 0 : i32
    return %c0_i32, %c0_i32_0 : i32, i32
  }
  func.func @transform_5(%arg0: i32) -> (i32, i32) {
    %c0_i32 = arith.constant 0 : i32
    %c0_i32_0 = arith.constant 0 : i32
    %c0_i32_1 = arith.constant 0 : i32
    return %c0_i32, %c0_i32_0 : i32, i32
  }
  func.func @transform_6(%arg0: i32) -> (i32, i32) {
    %c0_i32 = arith.constant 0 : i32
    %c0_i32_0 = arith.constant 0 : i32
    %c0_i32_1 = arith.constant 0 : i32
    return %c0_i32, %c0_i32_0 : i32, i32
  }
  func.func @transform_7(%arg0: i32) -> (i32, i32) {
    %c0_i32 = arith.constant 0 : i32
    %c0_i32_0 = arith.constant 0 : i32
    %c0_i32_1 = arith.constant 0 : i32
    return %c0_i32, %c0_i32_0 : i32, i32
  }
  func.func @transform_8(%arg0: i32) -> (i32, i32) {
    %c0_i32 = arith.constant 0 : i32
    %c0_i32_0 = arith.constant 0 : i32
    %c0_i32_1 = arith.constant 0 : i32
    return %c0_i32, %c0_i32_0 : i32, i32
  }
  func.func @transform_9(%arg0: i32) -> (i32, i32) {
    %c0_i32 = arith.constant 0 : i32
    %c0_i32_0 = arith.constant 0 : i32
    %c0_i32_1 = arith.constant 0 : i32
    return %c0_i32, %c0_i32_0 : i32, i32
  }
  func.func @transform_10(%arg0: i32) -> (i32, i32) {
    %c0_i32 = arith.constant 0 : i32
    %c0_i32_0 = arith.constant 0 : i32
    %c0_i32_1 = arith.constant 0 : i32
    return %c0_i32, %c0_i32_0 : i32, i32
  }
  func.func @transform_11(%arg0: i32) -> (i32, i32, i32) {
    %c0_i32 = arith.constant 0 : i32
    %c0_i32_0 = arith.constant 0 : i32
    %c0_i32_1 = arith.constant 0 : i32
    return %arg0, %c0_i32, %c0_i32_0 : i32, i32, i32
  }
}

</mosaic_0001>

<bundles_post_ra>
// kernel: model_forward.1
= control target key start
LH: loop header
LB: loop body
LE: loop exit
PB: predicated region body
PF: predicated region fallthrough
CT: control target
= control target key end

     0   :  { %s16075_s17 = smov 0   ;;  %s18632_s0 = inlined_call_operand.vmem [shape: f32[3,1792], index: 0, kind: input, shape index: {}]   ;;  %s18633_s1 = inlined_call_operand.vmem [shape: f32[25,6,3], index: 1, kind: input, shape index: {}]   ;;  %s18634_s2 = inlined_call_operand.vmem [shape: f32[6,1], index: 2, kind: input, shape index: {}]   ;;  %s18635_s3 = inlined_call_operand.vmem [shape: f32[25,16,6], index: 3, kind: input, shape index: {}]   ;;  %s18636_s4 = inlined_call_operand.vmem [shape: f32[16,1], index: 4, kind: input, shape index: {}]   ;;  %s18637_s5 = inlined_call_operand.vmem [shape: f32[120,256], index: 5, kind: input, shape index: {}]   ;;  %s18638_s6 = inlined_call_operand.vmem [shape: f32[120,1], index: 6, kind: input, shape index: {}]   ;;  %s18639_s7 = inlined_call_operand.vmem [shape: f32[84,120], index: 7, kind: input, shape index: {}]   ;;  %s18640_s8 = inlined_call_operand.vmem [shape: f32[84,1], index: 8, kind: input, shape index: {}]   ;;  %s18641_s9 = inlined_call_operand.vmem [shape: f32[10,84], index: 9, kind: input, shape index: {}]   ;;  %s18642_s10 = inlined_call_operand.vmem [shape: f32[10,1], index: 10, kind: input, shape index: {}]   ;;  %s18643_s11 = inlined_call_operand.vmem [shape: f32[2,10,1], index: 11, kind: output, shape index: {}]  }
   0x1 LB: > { %s16081_s18 = sadd.s32 4294967295, %s15964_s17   ;;  %p14401_p0 = scmp.ge.s32.totalorder %s15964_s17, 1  ;;  %s15964_s17 = sphi %s16075_s17, %s21_s17  }
   0x2   : > { %p338_p1 = scmp.lt.s32.totalorder %s15964_s17, 3 }
   0x4   : > { %p339_p2 = pnand %p14401_p0, %p338_p1 }
   0x5   : > { %s378_s19 = smul.u32 (!%p339_p2), 7, %s16081_s18  ;;  %v15966_v0 = vmov (!%p339_p2), 0.0   ;;  %s15967_s24 = smov (!%p339_p2), 127   ;;  %vm417_vm0 = vcmask (!%p339_p2), 1039360   ;;  %vm430_vm1 = vcmask (!%p339_p2), 1042432   ;;  %vm426_vm2 = vcmask (!%p339_p2), 23552  }
   0x6   : > { %342 = sbr.rel (%p339_p2) target bundleno = 2456 (0x998), region = 64  ;;  %581 = vmatprep.mubr.f32.mxu1 (!%p339_p2), %v15966_v0  ;;  %510 = vmatprep.mubr.f32.mxu0 (!%p339_p2), %v15966_v0  ;;  %s15968_s25 = smov (!%p339_p2), 126   ;;  %v14405_v14 = vld [vmem:[%s18633_s1 + $0x8] sm:$0x3f] (!%p339_p2)  ;;  %vm15976_vm3 = vmmov (!%p339_p2), 0   ;;  %vm1045_vm4 = vcmask (!%p339_p2), 1031168  }
   0x7   : > { %p379_p3 = scmp.lt.s32.totalorder (!%p339_p2), %s378_s19, 13  ;;  %s15969_s26 = smov (!%p339_p2), 125   ;;  %v393_v26 = vld [vmem:[%s18633_s1] sm:$0x3f] (!%p339_p2)  ;;  %v14428_v38 = vld [vmem:[%s18633_s1 + $0x10] sm:$0x3f] (!%p339_p2) }
   0x8   : > { %s15970_s27 = smov (!%p339_p2), 124   ;;  %s15971_s28 = smov (!%p339_p2), 100   ;;  %vm1378_vm5 = vcmask (!%p339_p2), 1022976   ;;  %v14440_v51 = vld [vmem:[%s18633_s1 + $0x18] sm:$0x3f] (!%p339_p2)  ;;  %vm1711_vm6 = vcmask (!%p339_p2), 1014784  }
   0x9   : > { %s15972_s29 = smov (!%p339_p2), 99   ;;  %s15973_s30 = smov (!%p339_p2), 98   ;;  %v14452_v62 = vld [vmem:[%s18633_s1 + $0x20] sm:$0x3f] (!%p339_p2)  ;;  %vm2044_vm7 = vcmask (!%p339_p2), 818176   ;;  %vm2377_vm8 = vcmask (!%p339_p2), 809984  }
   0xa   : > { %s15974_s12 = smov (!%p339_p2), 97   ;;  %s15975_s13 = smov (!%p339_p2), 96   ;;  %vm2710_vm9 = vcmask (!%p339_p2), 801792   ;;  %vm3043_vm10 = vcmask (!%p339_p2), 793600   ;;  %vm3376_vm11 = vcmask (!%p339_p2), 785408   ;;  %vm3709_vm12 = vcmask (!%p339_p2), 588800  }
   0xb   : > { %s15977_s16 = smov (!%p339_p2), 72   ;;  %s15978_s21 = smov (!%p339_p2), 71   ;;  %vm4042_vm13 = vcmask (!%p339_p2), 580608   ;;  %vm4375_vm14 = vcmask (!%p339_p2), 572416   ;;  %vm4708_vm15 = vcmask (!%p339_p2), 564224  }
   0xc   : > { %s15981_s22 = smov (!%p339_p2), 68   ;;  %s15985_s15 = smov (!%p339_p2), 41  }
   0xd   : > { %s18647_s19 = smov (!%p379_p3, %s378_s19), 13  ;;  %s15987_s14 = smov 16  }
   0xe   : > { %s14402_s20 = sshll.u32 %s18647_s19, 2  ;;  %s15980_s19 = smov 69  }
   0xf   : > { %s16091_s23 = scalar_lea.vmem %s18632_s0, %s14402_s20  ;;  %s15995_s20 = smov 66  }
  0x10   : > { %v16094_v1 = vld [vmem:[%s16091_s23 + $0x10] sm:$0x77]  ;;  %v16097_v2 = vld [vmem:[%s16091_s23 + $0x8] sm:$0x77]  ;;  %v16108_v4 = vld [vmem:[%s16091_s23] sm:$0x77] }
  0x11   : > { %411 = vrot.lane.b32.xlu1 %v16094_v1, %s15967_s24  ;;  %407 = vrot.lane.b32.xlu0 %v16097_v2, %s15967_s24  ;;  %v16105_v3 = vcombine.high %v16097_v2, %v16097_v2  ;;  %v16116_v5 = vcombine.high %v16094_v1, %v16094_v1  ;;  %v16120_v6 = vcombine.high %v16108_v4, %v16108_v4  ;;  %v16127_v7 = vld [vmem:[%s16091_s23 + $0x18] sm:$0x7]  ;;  %p384_p4 = scmp.lt.s32.totalorder %s16081_s18, 1 }
  0x13   : > { %s18649_s18 = smov (!%p384_p4, %s16081_s18), 1 }
  0x15   : > { %409 = vrot.lane.b32.xlu1 %v16105_v3, %s15967_s24  ;;  %403 = vrot.lane.b32.xlu0 %v16108_v4, %s15967_s24 }
  0x19   : > { %413 = vrot.lane.b32.xlu1 %v16116_v5, %s15967_s24  ;;  %405 = vrot.lane.b32.xlu0 %v16120_v6, %s15967_s24 }
  0x1d   : > { %1033 = vrot.lane.b32.xlu1 %v16120_v6, %s15968_s25  ;;  %415 = vrot.lane.b32.xlu0 %v16127_v7, %s15967_s24 }
  0x21   : > { %1037 = vrot.lane.b32.xlu1 %v16105_v3, %s15968_s25  ;;  %1035 = vrot.lane.b32.xlu0 %v16097_v2, %s15968_s25 }
  0x25   : > { %1031 = vrot.lane.b32.xlu1 %v16108_v4, %s15968_s25  ;;  %1039 = vrot.lane.b32.xlu0 %v16094_v1, %s15968_s25 }
  0x29   : > { %1043 = vrot.lane.b32.xlu1 %v16127_v7, %s15968_s25  ;;  %1041 = vrot.lane.b32.xlu0 %v16116_v5, %s15968_s25 }
  0x2d   : > { %1368 = vrot.lane.b32.xlu1 %v16097_v2, %s15969_s26  ;;  %1366 = vrot.lane.b32.xlu0 %v16120_v6, %s15969_s26 }
  0x31   : > { %1372 = vrot.lane.b32.xlu1 %v16094_v1, %s15969_s26  ;;  %1370 = vrot.lane.b32.xlu0 %v16105_v3, %s15969_s26 }
  0x35   : > { %1374 = vrot.lane.b32.xlu1 %v16116_v5, %s15969_s26  ;;  %1364 = vrot.lane.b32.xlu0 %v16108_v4, %s15969_s26 }
  0x39   : > { %1699 = vrot.lane.b32.xlu1 %v16120_v6, %s15970_s27  ;;  %1376 = vrot.lane.b32.xlu0 %v16127_v7, %s15969_s26  ;;  %s15984_s26 = smov 42  }
  0x3d   : > { %1703 = vrot.lane.b32.xlu1 %v16105_v3, %s15970_s27  ;;  %1701 = vrot.lane.b32.xlu0 %v16097_v2, %s15970_s27 }
  0x41   : > { %1697 = vrot.lane.b32.xlu1 %v16108_v4, %s15970_s27  ;;  %1705 = vrot.lane.b32.xlu0 %v16094_v1, %s15970_s27 }
  0x45   : > { %1709 = vrot.lane.b32.xlu1 %v16127_v7, %s15970_s27  ;;  %1707 = vrot.lane.b32.xlu0 %v16116_v5, %s15970_s27 }
  0x49   : > { %2034 = vrot.lane.b32.xlu1 %v16097_v2, %s15971_s28  ;;  %2032 = vrot.lane.b32.xlu0 %v16120_v6, %s15971_s28 }
  0x4d   : > { %2038 = vrot.lane.b32.xlu1 %v16094_v1, %s15971_s28  ;;  %2036 = vrot.lane.b32.xlu0 %v16105_v3, %s15971_s28 }
  0x51   : > { %2040 = vrot.lane.b32.xlu1 %v16116_v5, %s15971_s28  ;;  %2030 = vrot.lane.b32.xlu0 %v16108_v4, %s15971_s28 }
  0x55   : > { %2365 = vrot.lane.b32.xlu1 %v16120_v6, %s15972_s29  ;;  %2042 = vrot.lane.b32.xlu0 %v16127_v7, %s15971_s28 }
  0x59   : > { %2369 = vrot.lane.b32.xlu1 %v16105_v3, %s15972_s29  ;;  %2367 = vrot.lane.b32.xlu0 %v16097_v2, %s15972_s29 }
  0x5d   : > { %2363 = vrot.lane.b32.xlu1 %v16108_v4, %s15972_s29  ;;  %2371 = vrot.lane.b32.xlu0 %v16094_v1, %s15972_s29 }
  0x61   : > { %2375 = vrot.lane.b32.xlu1 %v16127_v7, %s15972_s29  ;;  %2373 = vrot.lane.b32.xlu0 %v16116_v5, %s15972_s29 }
  0x65   : > { %2700 = vrot.lane.b32.xlu1 %v16097_v2, %s15973_s30  ;;  %2698 = vrot.lane.b32.xlu0 %v16120_v6, %s15973_s30 }
  0x69   : > { %2704 = vrot.lane.b32.xlu1 %v16094_v1, %s15973_s30  ;;  %2702 = vrot.lane.b32.xlu0 %v16105_v3, %s15973_s30 }
  0x6d   : > { %2706 = vrot.lane.b32.xlu1 %v16116_v5, %s15973_s30  ;;  %2696 = vrot.lane.b32.xlu0 %v16108_v4, %s15973_s30 }
  0x71   : > { %3031 = vrot.lane.b32.xlu1 %v16120_v6, %s15974_s12  ;;  %2708 = vrot.lane.b32.xlu0 %v16127_v7, %s15973_s30  ;;  %s15989_s30 = smov 14  }
  0x75   : > { %3035 = vrot.lane.b32.xlu1 %v16105_v3, %s15974_s12  ;;  %3033 = vrot.lane.b32.xlu0 %v16097_v2, %s15974_s12 }
  0x79   : > { %3029 = vrot.lane.b32.xlu1 %v16108_v4, %s15974_s12  ;;  %3037 = vrot.lane.b32.xlu0 %v16094_v1, %s15974_s12 }
  0x7d   : > { %3041 = vrot.lane.b32.xlu1 %v16127_v7, %s15974_s12  ;;  %3039 = vrot.lane.b32.xlu0 %v16116_v5, %s15974_s12  ;;  %s15982_s12 = smov 44  }
  0x81   : > { %3366 = vrot.lane.b32.xlu1 %v16097_v2, %s15975_s13  ;;  %3364 = vrot.lane.b32.xlu0 %v16120_v6, %s15975_s13 }
  0x83   : > { %v412_v8 = vpop.permute.xlu1 %411  ;;  %v408_v9 = vpop.permute.xlu0 %407 }
  0x85   : > { %3370 = vrot.lane.b32.xlu1 %v16094_v1, %s15975_s13  ;;  %3368 = vrot.lane.b32.xlu0 %v16105_v3, %s15975_s13 }
  0x87   : > { %v410_v10 = vpop.permute.xlu1 %409  ;;  %v404_v11 = vpop.permute.xlu0 %403 }
  0x88   : > { %v421_v12 = vsel %vm417_vm0, %v410_v10, %v412_v8  ;;  %v420_v13 = vsel %vm417_vm0, %v408_v9, %v410_v10 }
  0x89   : > { %14409 = vmatprep.subr.msk.mxu1 %vm430_vm1, %v421_v12  ;;  %3372 = vrot.lane.b32.xlu1 %v16116_v5, %s15975_s13 }
  0x8a   : > { %3362 = vrot.lane.b32.xlu0 %v16108_v4, %s15975_s13  ;;  %14410 = vmatpush1.msk.msra.mxu1 %vm430_vm1, %v420_v13 }
  0x8b   : > { %v414_v15 = vpop.permute.xlu1 %413  ;;  %v406_v16 = vpop.permute.xlu0 %405  ;;  %14411 = vmatmul.mubr.msk.f32.vlgmr.msra.gmra.mrb[0].mxu1 %vm426_vm2, %v14405_v14  ;;  %15135 = vmatprep.subr.mxu1 %v15966_v0 }
  0x8c   : > { %v419_v17 = vsel %vm417_vm0, %v406_v16, %v408_v9  ;;  %v418_v18 = vsel %vm417_vm0, %v404_v11, %v406_v16  ;;  %15137 = vmatprep.mubr.msk.f32.mxu1 %vm15976_vm3, %v15966_v0  ;;  %v422_v23 = vsel %vm417_vm0, %v412_v8, %v414_v15 }
  0x8d   : > { %3697 = vrot.lane.b32.xlu1 %v16120_v6, %s15977_s16  ;;  %14406 = vmatprep.subr.msk.mxu0 %vm430_vm1, %v419_v17 }
  0x8e   : > { %3374 = vrot.lane.b32.xlu0 %v16127_v7, %s15975_s13  ;;  %14407 = vmatpush1.msk.msra.mxu0 %vm430_vm1, %v418_v18  ;;  %s15979_s13 = smov 70  }
  0x8f   : > { %v1034_v19 = vpop.permute.xlu1 %1033  ;;  %14408 = vmatmul.mubr.msk.f32.vlgmr.msra.gmra.mrb[0].mxu0 %vm426_vm2, %v14405_v14  ;;  %v416_v20 = vpop.permute.xlu0 %415 }
  0x90   : > { %v425_v21 = vsel %vm417_vm0, %v416_v20, 0.0  ;;  %v423_v22 = vsel %vm417_vm0, %v414_v15, %v416_v20  ;;  %652 = vmatprep.mubr.f32.mxu0 %v15966_v0  ;;  %v14464_v20 = vld [vmem:[%s18633_s1 + $0x28] sm:$0x3f] }
  0x91   : > { %3701 = vrot.lane.b32.xlu1 %v16105_v3, %s15977_s16  ;;  %14412 = vmatprep.subr.msk.mxu0 %vm430_vm1, %v423_v22 }
  0x92   : > { %3699 = vrot.lane.b32.xlu0 %v16097_v2, %s15977_s16  ;;  %15136 = vmatpush3.msk.msra.mxu1 %vm430_vm1, %v425_v21 }
  0x93   : > { %14413 = vmatpush1.msk.msra.mxu0 %vm430_vm1, %v422_v23  ;;  %15138 = vmatmul.mubr.msk.f32.vlgmr.msra.gmra.mrb[2].mxu1 %vm426_vm2, %v14405_v14  ;;  %v1038_v24 = vpop.permute.xlu1 %1037  ;;  %v1036_v25 = vpop.permute.xlu0 %1035 }
  0x94   : > { %14414 = vmatmul.mubr.msk.f32.vlgmr.msra.gmra.mrb[2].mxu0 %vm426_vm2, %v14405_v14  ;;  %14417 = vmatprep.subr.msk.mxu0 %vm430_vm1, %v16120_v6  ;;  %v1047_v29 = vsel %vm1045_vm4, %v1034_v19, %v1036_v25  ;;  %v1048_v33 = vsel %vm1045_vm4, %v1036_v25, %v1038_v24 }
  0x95   : > { %14420 = vmatprep.subr.msk.mxu1 %vm430_vm1, %v16105_v3  ;;  %3695 = vrot.lane.b32.xlu1 %v16108_v4, %s15977_s16 }
  0x96   : > { %3703 = vrot.lane.b32.xlu0 %v16094_v1, %s15977_s16  ;;  %14418 = vmatpush1.msk.msra.mxu0 %vm430_vm1, %v16108_v4 }
  0x97   : > { %14421 = vmatpush1.msk.msra.mxu1 %vm430_vm1, %v16097_v2  ;;  %881 = vmatprep.mubr.f32.mxu1 %v15966_v0  ;;  %v1032_v27 = vpop.permute.xlu1 %1031  ;;  %v1040_v28 = vpop.permute.xlu0 %1039 }
  0x98   : > { %810 = vmatprep.mubr.f32.mxu0 %v15966_v0  ;;  %14422 = vmatmul.mubr.msk.f32.vlgmr.msra.gmra.mrb[0].mxu1 %vm426_vm2, %v393_v26  ;;  %v1049_v30 = vsel %vm1045_vm4, %v1038_v24, %v1040_v28  ;;  %v1046_v35 = vsel %vm1045_vm4, %v1032_v27, %v1034_v19 }
  0x99   : > { %14423 = vmatprep.subr.msk.mxu0 %vm430_vm1, %v16116_v5  ;;  %14419 = vmatmul.mubr.msk.f32.vlgmr.msra.gmra.mrb[0].mxu0 %vm426_vm2, %v393_v26 }
  0x9a   : > { %14424 = vmatpush1.msk.msra.mxu0 %vm430_vm1, %v16094_v1  ;;  %15140 = vmatprep.subr.mxu1 %v15966_v0 }
  0x9b   : > { %15141 = vmatpush3.msk.msra.mxu1 %vm430_vm1, %v16127_v7  ;;  %14429 = vmatprep.subr.msk.mxu0 %vm430_vm1, %v1047_v29  ;;  %v1044_v31 = vpop.permute.xlu1 %1043  ;;  %v1042_v32 = vpop.permute.xlu0 %1041 }
  0x9c   : > { %3707 = vrot.lane.b32.xlu1 %v16127_v7, %s15977_s16  ;;  %3705 = vrot.lane.b32.xlu0 %v16116_v5, %s15977_s16  ;;  %v1051_v34 = vsel %vm1045_vm4, %v1042_v32, %v1044_v31  ;;  %v1053_v39 = vsel %vm1045_vm4, %v1044_v31, 0.0  ;;  %v1050_v40 = vsel %vm1045_vm4, %v1040_v28, %v1042_v32 }
  0x9d   : > { %15142 = vmatprep.mubr.msk.f32.mxu1 %vm15976_vm3, %v15966_v0  ;;  %14432 = vmatprep.subr.msk.mxu1 %vm430_vm1, %v1049_v30 }
  0x9e   : > { %952 = vmatprep.mubr.f32.mxu0 %v15966_v0  ;;  %15143 = vmatmul.mubr.msk.f32.vlgmr.msra.gmra.mrb[4].mxu1 %vm426_vm2, %v393_v26 }
  0x9f   : > { %14433 = vmatpush1.msk.msra.mxu1 %vm430_vm1, %v1048_v33  ;;  %14425 = vmatmul.mubr.msk.f32.vlgmr.msra.gmra.mrb[2].mxu0 %vm426_vm2, %v393_v26  ;;  %v1369_v36 = vpop.permute.xlu1 %1368  ;;  %v1367_v37 = vpop.permute.xlu0 %1366 }
  0xa0   : > { %14430 = vmatpush1.msk.msra.mxu0 %vm430_vm1, %v1046_v35  ;;  %4032 = vrot.lane.b32.xlu1 %v16097_v2, %s15978_s21  ;;  %v1380_v41 = vsel %vm1378_vm5, %v1367_v37, %v1369_v36 }
  0xa1   : > { %4030 = vrot.lane.b32.xlu0 %v16120_v6, %s15978_s21  ;;  %14435 = vmatprep.subr.msk.mxu0 %vm430_vm1, %v1051_v34  ;;  %v14476_v34 = vld [vmem:[%s18633_s1 + $0x30] sm:$0x3f] }
  0xa2   : > { %1136 = vmatprep.mubr.f32.mxu0 %v15966_v0  ;;  %1207 = vmatprep.mubr.f32.mxu1 %v15966_v0 }
  0xa3   : > { %14431 = vmatmul.mubr.msk.f32.vlgmr.msra.gmra.mrb[0].mxu0 %vm426_vm2, %v14428_v38  ;;  %15145 = vmatprep.subr.mxu1 %v15966_v0  ;;  %v1373_v42 = vpop.permute.xlu1 %1372  ;;  %v1371_v43 = vpop.permute.xlu0 %1370 }
  0xa4   : > { %14436 = vmatpush1.msk.msra.mxu0 %vm430_vm1, %v1050_v40  ;;  %4036 = vrot.lane.b32.xlu1 %v16094_v1, %s15978_s21  ;;  %v1382_v44 = vsel %vm1378_vm5, %v1371_v43, %v1373_v42  ;;  %v1381_v45 = vsel %vm1378_vm5, %v1369_v36, %v1371_v43 }
  0xa5   : > { %4034 = vrot.lane.b32.xlu0 %v16105_v3, %s15978_s21  ;;  %14434 = vmatmul.mubr.msk.f32.vlgmr.msra.gmra.mrb[0].mxu1 %vm426_vm2, %v14428_v38 }
  0xa6   : > { %15146 = vmatpush3.msk.msra.mxu1 %vm430_vm1, %v1053_v39  ;;  %14441 = vmatprep.subr.msk.mxu0 %vm430_vm1, %v1380_v41 }
  0xa7   : > { %15147 = vmatprep.mubr.msk.f32.mxu1 %vm15976_vm3, %v15966_v0  ;;  %14444 = vmatprep.subr.msk.mxu1 %vm430_vm1, %v1382_v44  ;;  %v1375_v46 = vpop.permute.xlu1 %1374  ;;  %v1365_v47 = vpop.permute.xlu0 %1364 }
  0xa8   : > { %4038 = vrot.lane.b32.xlu1 %v16116_v5, %s15978_s21  ;;  %v1379_v48 = vsel %vm1378_vm5, %v1365_v47, %v1367_v37  ;;  %1278 = vmatprep.mubr.f32.mxu0 %v15966_v0  ;;  %v1383_v54 = vsel %vm1378_vm5, %v1373_v42, %v1375_v46 }
  0xa9   : > { %4028 = vrot.lane.b32.xlu0 %v16108_v4, %s15978_s21  ;;  %15148 = vmatmul.mubr.msk.f32.vlgmr.msra.gmra.mrb[6].mxu1 %vm426_vm2, %v14428_v38 }
  0xaa   : > { %14445 = vmatpush1.msk.msra.mxu1 %vm430_vm1, %v1381_v45  ;;  %14437 = vmatmul.mubr.msk.f32.vlgmr.msra.gmra.mrb[2].mxu0 %vm426_vm2, %v14428_v38 }
  0xab   : > { %14442 = vmatpush1.msk.msra.mxu0 %vm430_vm1, %v1379_v48  ;;  %v1700_v49 = vpop.permute.xlu1 %1699  ;;  %v1377_v50 = vpop.permute.xlu0 %1376  ;;  %1540 = vmatprep.mubr.f32.mxu1 %v15966_v0 }
  0xac   : > { %4363 = vrot.lane.b32.xlu1 %v16120_v6, %s15979_s13  ;;  %v1386_v52 = vsel %vm1378_vm5, %v1377_v50, 0.0  ;;  %15150 = vmatprep.subr.mxu1 %v15966_v0  ;;  %v1384_v53 = vsel %vm1378_vm5, %v1375_v46, %v1377_v50  ;;  %v14488_v50 = vld [vmem:[%s18633_s1 + $0x38] sm:$0x3f]  ;;  %vm5041_vm5 = vcmask 556032  }
  0xad   : > { %4040 = vrot.lane.b32.xlu0 %v16127_v7, %s15978_s21  ;;  %1469 = vmatprep.mubr.f32.mxu0 %v15966_v0  ;;  %s15986_s21 = smov 40  }
  0xae   : > { %14446 = vmatmul.mubr.msk.f32.vlgmr.msra.gmra.mrb[0].mxu1 %vm426_vm2, %v14440_v51  ;;  %14447 = vmatprep.subr.msk.mxu0 %vm430_vm1, %v1384_v53 }
  0xaf   : > { %15151 = vmatpush3.msk.msra.mxu1 %vm430_vm1, %v1386_v52  ;;  %14443 = vmatmul.mubr.msk.f32.vlgmr.msra.gmra.mrb[0].mxu0 %vm426_vm2, %v14440_v51  ;;  %v1704_v55 = vpop.permute.xlu1 %1703  ;;  %v1702_v56 = vpop.permute.xlu0 %1701 }
  0xb0   : > { %4367 = vrot.lane.b32.xlu1 %v16105_v3, %s15979_s13  ;;  %14448 = vmatpush1.msk.msra.mxu0 %vm430_vm1, %v1383_v54  ;;  %v1713_v57 = vsel %vm1711_vm6, %v1700_v49, %v1702_v56  ;;  %v1714_v63 = vsel %vm1711_vm6, %v1702_v56, %v1704_v55 }
  0xb1   : > { %4365 = vrot.lane.b32.xlu0 %v16097_v2, %s15979_s13  ;;  %14453 = vmatprep.subr.msk.mxu0 %vm430_vm1, %v1713_v57 }
  0xb2   : > { %1611 = vmatprep.mubr.f32.mxu0 %v15966_v0  ;;  %15152 = vmatprep.mubr.msk.f32.mxu1 %vm15976_vm3, %v15966_v0 }
  0xb3   : > { %v1698_v58 = vpop.permute.xlu1 %1697  ;;  %v1706_v59 = vpop.permute.xlu0 %1705  ;;  %14449 = vmatmul.mubr.msk.f32.vlgmr.msra.gmra.mrb[2].mxu0 %vm426_vm2, %v14440_v51  ;;  %15153 = vmatmul.mubr.msk.f32.vlgmr.msra.gmra.mrb[8].mxu1 %vm426_vm2, %v14440_v51 }
  0xb4   : > { %4361 = vrot.lane.b32.xlu1 %v16108_v4, %s15979_s13  ;;  %v1712_v60 = vsel %vm1711_vm6, %v1698_v58, %v1700_v49  ;;  %v1715_v61 = vsel %vm1711_vm6, %v1704_v55, %v1706_v59  ;;  %1802 = vmatprep.mubr.f32.mxu0 %v15966_v0 }
  0xb5   : > { %4369 = vrot.lane.b32.xlu0 %v16094_v1, %s15979_s13  ;;  %14454 = vmatpush1.msk.msra.mxu0 %vm430_vm1, %v1712_v60 }
  0xb6   : > { %14456 = vmatprep.subr.msk.mxu1 %vm430_vm1, %v1715_v61  ;;  %1873 = vmatprep.mubr.f32.mxu1 %v15966_v0 }
  0xb7   : > { %14457 = vmatpush1.msk.msra.mxu1 %vm430_vm1, %v1714_v63  ;;  %v1710_v8 = vpop.permute.xlu1 %1709  ;;  %v1708_v9 = vpop.permute.xlu0 %1707  ;;  %14455 = vmatmul.mubr.msk.f32.vlgmr.msra.gmra.mrb[0].mxu0 %vm426_vm2, %v14452_v62 }
  0xb8   : > { %4373 = vrot.lane.b32.xlu1 %v16127_v7, %s15979_s13  ;;  %v1719_v10 = vsel %vm1711_vm6, %v1710_v8, 0.0  ;;  %v1716_v11 = vsel %vm1711_vm6, %v1706_v59, %v1708_v9  ;;  %v1717_v12 = vsel %vm1711_vm6, %v1708_v9, %v1710_v8  ;;  %15155 = vmatprep.subr.mxu1 %v15966_v0  ;;  %v14500_v8 = vld [vmem:[%s18633_s1 + $0x40] sm:$0x3f] }
  0xb9   : > { %4371 = vrot.lane.b32.xlu0 %v16116_v5, %s15979_s13  ;;  %14459 = vmatprep.subr.msk.mxu0 %vm430_vm1, %v1717_v12 }
  0xba   : > { %14460 = vmatpush1.msk.msra.mxu0 %vm430_vm1, %v1716_v11  ;;  %14458 = vmatmul.mubr.msk.f32.vlgmr.msra.gmra.mrb[0].mxu1 %vm426_vm2, %v14452_v62 }
  0xbb   : > { %v2035_v13 = vpop.permute.xlu1 %2034  ;;  %v2033_v14 = vpop.permute.xlu0 %2032  ;;  %15156 = vmatpush3.msk.msra.mxu1 %vm430_vm1, %v1719_v10  ;;  %15157 = vmatprep.mubr.msk.f32.mxu1 %vm15976_vm3, %v15966_v0 }
  0xbc   : > { %4698 = vrot.lane.b32.xlu1 %v16097_v2, %s15980_s19  ;;  %v2046_v15 = vsel %vm2044_vm7, %v2033_v14, %v2035_v13  ;;  %1944 = vmatprep.mubr.f32.mxu0 %v15966_v0 }
  0xbd   : > { %4696 = vrot.lane.b32.xlu0 %v16120_v6, %s15980_s19  ;;  %14465 = vmatprep.subr.msk.mxu0 %vm430_vm1, %v2046_v15 }
  0xbe   : > { %15158 = vmatmul.mubr.msk.f32.vlgmr.msra.gmra.mrb[10].mxu1 %vm426_vm2, %v14452_v62  ;;  %14461 = vmatmul.mubr.msk.f32.vlgmr.msra.gmra.mrb[2].mxu0 %vm426_vm2, %v14452_v62 }
  0xbf   : > { %v2039_v16 = vpop.permute.xlu1 %2038  ;;  %v2037_v17 = vpop.permute.xlu0 %2036  ;;  %2206 = vmatprep.mubr.f32.mxu1 %v15966_v0  ;;  %2135 = vmatprep.mubr.f32.mxu0 %v15966_v0 }
  0xc0   : > { %4702 = vrot.lane.b32.xlu1 %v16094_v1, %s15980_s19  ;;  %v2047_v18 = vsel %vm2044_vm7, %v2035_v13, %v2037_v17  ;;  %v2048_v19 = vsel %vm2044_vm7, %v2037_v17, %v2039_v16 }
  0xc1   : > { %4700 = vrot.lane.b32.xlu0 %v16105_v3, %s15980_s19  ;;  %14468 = vmatprep.subr.msk.mxu1 %vm430_vm1, %v2048_v19 }
  0xc2   : > { %14469 = vmatpush1.msk.msra.mxu1 %vm430_vm1, %v2047_v18 }
  0xc3   : > { %v2041_v21 = vpop.permute.xlu1 %2040  ;;  %v2031_v22 = vpop.permute.xlu0 %2030  ;;  %15160 = vmatprep.subr.mxu1 %v15966_v0  ;;  %14470 = vmatmul.mubr.msk.f32.vlgmr.msra.gmra.mrb[0].mxu1 %vm426_vm2, %v14464_v20 }
  0xc4   : > { %4704 = vrot.lane.b32.xlu1 %v16116_v5, %s15980_s19  ;;  %v2045_v23 = vsel %vm2044_vm7, %v2031_v22, %v2033_v14  ;;  %15162 = vmatprep.mubr.msk.f32.mxu1 %vm15976_vm3, %v15966_v0  ;;  %v2049_v28 = vsel %vm2044_vm7, %v2039_v16, %v2041_v21 }
  0xc5   : > { %4694 = vrot.lane.b32.xlu0 %v16108_v4, %s15980_s19  ;;  %14466 = vmatpush1.msk.msra.mxu0 %vm430_vm1, %v2045_v23 }
  0xc6   : > { %14467 = vmatmul.mubr.msk.f32.vlgmr.msra.gmra.mrb[0].mxu0 %vm426_vm2, %v14464_v20 }
  0xc7   : > { %v2366_v24 = vpop.permute.xlu1 %2365  ;;  %v2043_v25 = vpop.permute.xlu0 %2042  ;;  %2277 = vmatprep.mubr.f32.mxu0 %v15966_v0 }
  0xc8   : > { %5029 = vrot.lane.b32.xlu1 %v16120_v6, %s15981_s22  ;;  %v2052_v26 = vsel %vm2044_vm7, %v2043_v25, 0.0  ;;  %v2050_v27 = vsel %vm2044_vm7, %v2041_v21, %v2043_v25 }
  0xc9   : > { %4706 = vrot.lane.b32.xlu0 %v16127_v7, %s15980_s19  ;;  %14471 = vmatprep.subr.msk.mxu0 %vm430_vm1, %v2050_v27  ;;  %s15983_s19 = smov 43  }
  0xca   : > { %15161 = vmatpush3.msk.msra.mxu1 %vm430_vm1, %v2052_v26  ;;  %14472 = vmatpush1.msk.msra.mxu0 %vm430_vm1, %v2049_v28 }
  0xcb   : > { %v2370_v29 = vpop.permute.xlu1 %2369  ;;  %v2368_v30 = vpop.permute.xlu0 %2367  ;;  %14473 = vmatmul.mubr.msk.f32.vlgmr.msra.gmra.mrb[2].mxu0 %vm426_vm2, %v14464_v20  ;;  %15163 = vmatmul.mubr.msk.f32.vlgmr.msra.gmra.mrb[12].mxu1 %vm426_vm2, %v14464_v20 }
  0xcc   : > { %5033 = vrot.lane.b32.xlu1 %v16105_v3, %s15981_s22  ;;  %v2379_v31 = vsel %vm2377_vm8, %v2366_v24, %v2368_v30  ;;  %2468 = vmatprep.mubr.f32.mxu0 %v15966_v0  ;;  %v2380_v37 = vsel %vm2377_vm8, %v2368_v30, %v2370_v29 }
  0xcd   : > { %5031 = vrot.lane.b32.xlu0 %v16097_v2, %s15981_s22  ;;  %14477 = vmatprep.subr.msk.mxu0 %vm430_vm1, %v2379_v31 }
  0xce   : > { %2539 = vmatprep.mubr.f32.mxu1 %v15966_v0 }
  0xcf   : > { %v2364_v32 = vpop.permute.xlu1 %2363  ;;  %v2372_v33 = vpop.permute.xlu0 %2371 }
  0xd0   : > { %5027 = vrot.lane.b32.xlu1 %v16108_v4, %s15981_s22  ;;  %v2378_v35 = vsel %vm2377_vm8, %v2364_v32, %v2366_v24  ;;  %v2381_v36 = vsel %vm2377_vm8, %v2370_v29, %v2372_v33  ;;  %v14512_v24 = vld [vmem:[%s18633_s1 + $0x48] sm:$0x3f] }
  0xd1   : > { %5035 = vrot.lane.b32.xlu0 %v16094_v1, %s15981_s22  ;;  %14478 = vmatpush1.msk.msra.mxu0 %vm430_vm1, %v2378_v35 }
  0xd2   : > { %14480 = vmatprep.subr.msk.mxu1 %vm430_vm1, %v2381_v36  ;;  %14479 = vmatmul.mubr.msk.f32.vlgmr.msra.gmra.mrb[0].mxu0 %vm426_vm2, %v14476_v34 }
  0xd3   : > { %14481 = vmatpush1.msk.msra.mxu1 %vm430_vm1, %v2380_v37  ;;  %v2376_v38 = vpop.permute.xlu1 %2375  ;;  %v2374_v39 = vpop.permute.xlu0 %2373  ;;  %2610 = vmatprep.mubr.f32.mxu0 %v15966_v0  ;;  %v14524_v37 = vld [vmem:[%s18633_s1 + $0x50] sm:$0x3f] }
  0xd4   : > { %5039 = vrot.lane.b32.xlu1 %v16127_v7, %s15981_s22  ;;  %v2385_v40 = vsel %vm2377_vm8, %v2376_v38, 0.0  ;;  %v2382_v41 = vsel %vm2377_vm8, %v2372_v33, %v2374_v39  ;;  %v2383_v42 = vsel %vm2377_vm8, %v2374_v39, %v2376_v38  ;;  %15165 = vmatprep.subr.mxu1 %v15966_v0 }
  0xd5   : > { %5037 = vrot.lane.b32.xlu0 %v16116_v5, %s15981_s22  ;;  %14483 = vmatprep.subr.msk.mxu0 %vm430_vm1, %v2383_v42 }
  0xd6   : > { %14484 = vmatpush1.msk.msra.mxu0 %vm430_vm1, %v2382_v41  ;;  %14482 = vmatmul.mubr.msk.f32.vlgmr.msra.gmra.mrb[0].mxu1 %vm426_vm2, %v14476_v34 }
  0xd7   : > { %v2701_v43 = vpop.permute.xlu1 %2700  ;;  %v2699_v44 = vpop.permute.xlu0 %2698  ;;  %15166 = vmatpush3.msk.msra.mxu1 %vm430_vm1, %v2385_v40  ;;  %15167 = vmatprep.mubr.msk.f32.mxu1 %vm15976_vm3, %v15966_v0 }
  0xd8   : > { %5364 = vrot.lane.b32.xlu1 %v16097_v2, %s15982_s12  ;;  %v2712_v45 = vsel %vm2710_vm9, %v2699_v44, %v2701_v43  ;;  %14485 = vmatmul.mubr.msk.f32.vlgmr.msra.gmra.mrb[2].mxu0 %vm426_vm2, %v14476_v34 }
  0xd9   : > { %5362 = vrot.lane.b32.xlu0 %v16120_v6, %s15982_s12  ;;  %14489 = vmatprep.subr.msk.mxu0 %vm430_vm1, %v2712_v45 }
  0xda   : > { %15168 = vmatmul.mubr.msk.f32.vlgmr.msra.gmra.mrb[14].mxu1 %vm426_vm2, %v14476_v34  ;;  %2801 = vmatprep.mubr.f32.mxu0 %v15966_v0 }
  0xdb   : > { %v2705_v46 = vpop.permute.xlu1 %2704  ;;  %v2703_v47 = vpop.permute.xlu0 %2702  ;;  %2872 = vmatprep.mubr.f32.mxu1 %v15966_v0 }
  0xdc   : > { %5368 = vrot.lane.b32.xlu1 %v16094_v1, %s15982_s12  ;;  %v2713_v48 = vsel %vm2710_vm9, %v2701_v43, %v2703_v47  ;;  %v2714_v49 = vsel %vm2710_vm9, %v2703_v47, %v2705_v46 }
  0xdd   : > { %5366 = vrot.lane.b32.xlu0 %v16105_v3, %s15982_s12  ;;  %14492 = vmatprep.subr.msk.mxu1 %vm430_vm1, %v2714_v49 }
  0xde   : > { %14493 = vmatpush1.msk.msra.mxu1 %vm430_vm1, %v2713_v48 }
  0xdf   : > { %v2707_v51 = vpop.permute.xlu1 %2706  ;;  %v2697_v52 = vpop.permute.xlu0 %2696  ;;  %15170 = vmatprep.subr.mxu1 %v15966_v0  ;;  %14494 = vmatmul.mubr.msk.f32.vlgmr.msra.gmra.mrb[0].mxu1 %vm426_vm2, %v14488_v50 }
  0xe0   : > { %5370 = vrot.lane.b32.xlu1 %v16116_v5, %s15982_s12  ;;  %v2711_v53 = vsel %vm2710_vm9, %v2697_v52, %v2699_v44  ;;  %15172 = vmatprep.mubr.msk.f32.mxu1 %vm15976_vm3, %v15966_v0  ;;  %v2715_v58 = vsel %vm2710_vm9, %v2705_v46, %v2707_v51 }
  0xe1   : > { %5360 = vrot.lane.b32.xlu0 %v16108_v4, %s15982_s12  ;;  %14490 = vmatpush1.msk.msra.mxu0 %vm430_vm1, %v2711_v53 }
  0xe2   : > { %14491 = vmatmul.mubr.msk.f32.vlgmr.msra.gmra.mrb[0].mxu0 %vm426_vm2, %v14488_v50 }
  0xe3   : > { %v3032_v54 = vpop.permute.xlu1 %3031  ;;  %v2709_v55 = vpop.permute.xlu0 %2708  ;;  %2943 = vmatprep.mubr.f32.mxu0 %v15966_v0 }
  0xe4   : > { %5695 = vrot.lane.b32.xlu1 %v16120_v6, %s15983_s19  ;;  %v2718_v56 = vsel %vm2710_vm9, %v2709_v55, 0.0  ;;  %v2716_v57 = vsel %vm2710_vm9, %v2707_v51, %v2709_v55  ;;  %vm5374_vm9 = vcmask 359424  }
  0xe5   : > { %5372 = vrot.lane.b32.xlu0 %v16127_v7, %s15982_s12  ;;  %14495 = vmatprep.subr.msk.mxu0 %vm430_vm1, %v2716_v57 }
  0xe6   : > { %15171 = vmatpush3.msk.msra.mxu1 %vm430_vm1, %v2718_v56  ;;  %14496 = vmatpush1.msk.msra.mxu0 %vm430_vm1, %v2715_v58 }
  0xe7   : > { %v3036_v59 = vpop.permute.xlu1 %3035  ;;  %v3034_v60 = vpop.permute.xlu0 %3033  ;;  %14497 = vmatmul.mubr.msk.f32.vlgmr.msra.gmra.mrb[2].mxu0 %vm426_vm2, %v14488_v50  ;;  %15173 = vmatmul.mubr.msk.f32.vlgmr.msra.gmra.mrb[16].mxu1 %vm426_vm2, %v14488_v50 }
  0xe8   : > { %5699 = vrot.lane.b32.xlu1 %v16105_v3, %s15983_s19  ;;  %v3045_v61 = vsel %vm3043_vm10, %v3032_v54, %v3034_v60  ;;  %3134 = vmatprep.mubr.f32.mxu0 %v15966_v0  ;;  %v3046_v11 = vsel %vm3043_vm10, %v3034_v60, %v3036_v59 }
  0xe9   : > { %5697 = vrot.lane.b32.xlu0 %v16097_v2, %s15983_s19  ;;  %14501 = vmatprep.subr.msk.mxu0 %vm430_vm1, %v3045_v61 }
  0xea   : > { %3205 = vmatprep.mubr.f32.mxu1 %v15966_v0 }
  0xeb   : > { %v3030_v62 = vpop.permute.xlu1 %3029  ;;  %v3038_v63 = vpop.permute.xlu0 %3037 }
  0xec   : > { %5693 = vrot.lane.b32.xlu1 %v16108_v4, %s15983_s19  ;;  %v3044_v9 = vsel %vm3043_vm10, %v3030_v62, %v3032_v54  ;;  %v3047_v10 = vsel %vm3043_vm10, %v3036_v59, %v3038_v63  ;;  %v16687_v62 = vld [vmem:[%s16091_s23] sm:$0x77] }
  0xed   : > { %5701 = vrot.lane.b32.xlu0 %v16094_v1, %s15983_s19  ;;  %14502 = vmatpush1.msk.msra.mxu0 %vm430_vm1, %v3044_v9 }
  0xee   : > { %14504 = vmatprep.subr.msk.mxu1 %vm430_vm1, %v3047_v10  ;;  %14503 = vmatmul.mubr.msk.f32.vlgmr.msra.gmra.mrb[0].mxu0 %vm426_vm2, %v14500_v8 }
  0xef   : > { %14505 = vmatpush1.msk.msra.mxu1 %vm430_vm1, %v3046_v11  ;;  %v3042_v12 = vpop.permute.xlu1 %3041  ;;  %v3040_v13 = vpop.permute.xlu0 %3039  ;;  %3276 = vmatprep.mubr.f32.mxu0 %v15966_v0 }
  0xf0   : > { %5705 = vrot.lane.b32.xlu1 %v16127_v7, %s15983_s19  ;;  %v3051_v14 = vsel %vm3043_vm10, %v3042_v12, 0.0  ;;  %v3048_v15 = vsel %vm3043_vm10, %v3038_v63, %v3040_v13  ;;  %v3049_v16 = vsel %vm3043_vm10, %v3040_v13, %v3042_v12  ;;  %15175 = vmatprep.subr.mxu1 %v15966_v0  ;;  %v16702_v12 = vld [vmem:[%s16091_s23 + $0x18] sm:$0x7]  ;;  %vm5707_vm10 = vcmask 351232  }
  0xf1   : > { %5703 = vrot.lane.b32.xlu0 %v16116_v5, %s15983_s19  ;;  %14507 = vmatprep.subr.msk.mxu0 %vm430_vm1, %v3049_v16  ;;  %s15993_s19 = smov 122  }
  0xf2   : > { %14508 = vmatpush1.msk.msra.mxu0 %vm430_vm1, %v3048_v15  ;;  %14506 = vmatmul.mubr.msk.f32.vlgmr.msra.gmra.mrb[0].mxu1 %vm426_vm2, %v14500_v8 }
  0xf3   : > { %v3367_v17 = vpop.permute.xlu1 %3366  ;;  %v3365_v18 = vpop.permute.xlu0 %3364  ;;  %15176 = vmatpush3.msk.msra.mxu1 %vm430_vm1, %v3051_v14  ;;  %15177 = vmatprep.mubr.msk.f32.mxu1 %vm15976_vm3, %v15966_v0  ;;  %v14548_v14 = vld [vmem:[%s18633_s1 + $0x60] sm:$0x3f] }
  0xf4   : > { %6030 = vrot.lane.b32.xlu1 %v16097_v2, %s15984_s26  ;;  %v3378_v19 = vsel %vm3376_vm11, %v3365_v18, %v3367_v17  ;;  %14509 = vmatmul.mubr.msk.f32.vlgmr.msra.gmra.mrb[2].mxu0 %vm426_vm2, %v14500_v8 }
  0xf5   : > { %6028 = vrot.lane.b32.xlu0 %v16120_v6, %s15984_s26  ;;  %14513 = vmatprep.subr.msk.mxu0 %vm430_vm1, %v3378_v19 }
  0xf6   : > { %15178 = vmatmul.mubr.msk.f32.vlgmr.msra.gmra.mrb[18].mxu1 %vm426_vm2, %v14500_v8  ;;  %3467 = vmatprep.mubr.f32.mxu0 %v15966_v0  ;;  %v16694_v8 = vld [vmem:[%s16091_s23 + $0x10] sm:$0x77] }
  0xf7   : > { %v3371_v20 = vpop.permute.xlu1 %3370  ;;  %v3369_v21 = vpop.permute.xlu0 %3368  ;;  %3538 = vmatprep.mubr.f32.mxu1 %v15966_v0 }
  0xf8   : > { %6034 = vrot.lane.b32.xlu1 %v16094_v1, %s15984_s26  ;;  %v3379_v22 = vsel %vm3376_vm11, %v3367_v17, %v3369_v21  ;;  %v3380_v23 = vsel %vm3376_vm11, %v3369_v21, %v3371_v20 }
  0xf9   : > { %6032 = vrot.lane.b32.xlu0 %v16105_v3, %s15984_s26  ;;  %14516 = vmatprep.subr.msk.mxu1 %vm430_vm1, %v3380_v23 }
  0xfa   : > { %14517 = vmatpush1.msk.msra.mxu1 %vm430_vm1, %v3379_v22 }
  0xfb   : > { %v3373_v25 = vpop.permute.xlu1 %3372  ;;  %15180 = vmatprep.subr.mxu1 %v15966_v0  ;;  %14518 = vmatmul.mubr.msk.f32.vlgmr.msra.gmra.mrb[0].mxu1 %vm426_vm2, %v14512_v24 }
  0xfc   : > { %6036 = vrot.lane.b32.xlu1 %v16116_v5, %s15984_s26  ;;  %v3363_v26 = vpop.permute.xlu0 %3362  ;;  %15182 = vmatprep.mubr.msk.f32.mxu1 %vm15976_vm3, %v15966_v0  ;;  %v3381_v32 = vsel %vm3376_vm11, %v3371_v20, %v3373_v25 }
  0xfd   : > { %6026 = vrot.lane.b32.xlu0 %v16108_v4, %s15984_s26  ;;  %v3377_v27 = vsel %vm3376_vm11, %v3363_v26, %v3365_v18 }
  0xfe   : > { %14514 = vmatpush1.msk.msra.mxu0 %vm430_vm1, %v3377_v27 }
  0xff   : > { %v3698_v28 = vpop.permute.xlu1 %3697  ;;  %14515 = vmatmul.mubr.msk.f32.vlgmr.msra.gmra.mrb[0].mxu0 %vm426_vm2, %v14512_v24 }
 0x100   : > { %6361 = vrot.lane.b32.xlu1 %v16120_v6, %s15985_s15  ;;  %v3375_v29 = vpop.permute.xlu0 %3374  ;;  %3609 = vmatprep.mubr.f32.mxu0 %v15966_v0 }
 0x101   : > { %6038 = vrot.lane.b32.xlu0 %v16127_v7, %s15984_s26  ;;  %v3384_v30 = vsel %vm3376_vm11, %v3375_v29, 0.0  ;;  %v3382_v31 = vsel %vm3376_vm11, %v3373_v25, %v3375_v29  ;;  %vm6040_vm11 = vcmask 343040   ;;  %s15996_s26 = smov 64  }
 0x102   : > { %14519 = vmatprep.subr.msk.mxu0 %vm430_vm1, %v3382_v31  ;;  %15181 = vmatpush3.msk.msra.mxu1 %vm430_vm1, %v3384_v30 }
 0x103   : > { %14520 = vmatpush1.msk.msra.mxu0 %vm430_vm1, %v3381_v32  ;;  %v3702_v33 = vpop.permute.xlu1 %3701  ;;  %15183 = vmatmul.mubr.msk.f32.vlgmr.msra.gmra.mrb[20].mxu1 %vm426_vm2, %v14512_v24 }
 0x104   : > { %6365 = vrot.lane.b32.xlu1 %v16105_v3, %s15985_s15  ;;  %v3700_v34 = vpop.permute.xlu0 %3699  ;;  %14521 = vmatmul.mubr.msk.f32.vlgmr.msra.gmra.mrb[2].mxu0 %vm426_vm2, %v14512_v24 }
 0x105   : > { %6363 = vrot.lane.b32.xlu0 %v16097_v2, %s15985_s15  ;;  %v3711_v35 = vsel %vm3709_vm12, %v3698_v28, %v3700_v34  ;;  %3800 = vmatprep.mubr.f32.mxu0 %v15966_v0  ;;  %v3712_v41 = vsel %vm3709_vm12, %v3700_v34, %v3702_v33 }
 0x106   : > { %14525 = vmatprep.subr.msk.mxu0 %vm430_vm1, %v3711_v35  ;;  %3871 = vmatprep.mubr.f32.mxu1 %v15966_v0 }
 0x107   : > { %v3696_v36 = vpop.permute.xlu1 %3695 }
 0x108   : > { %6359 = vrot.lane.b32.xlu1 %v16108_v4, %s15985_s15  ;;  %v3710_v38 = vsel %vm3709_vm12, %v3696_v36, %v3698_v28  ;;  %v3704_v39 = vpop.permute.xlu0 %3703  ;;  %v14560_v28 = vld [vmem:[%s18633_s1 + $0x68] sm:$0x3f] }
 0x109   : > { %6367 = vrot.lane.b32.xlu0 %v16094_v1, %s15985_s15  ;;  %14526 = vmatpush1.msk.msra.mxu0 %vm430_vm1, %v3710_v38  ;;  %v3713_v40 = vsel %vm3709_vm12, %v3702_v33, %v3704_v39 }
 0x10a   : > { %14528 = vmatprep.subr.msk.mxu1 %vm430_vm1, %v3713_v40  ;;  %14527 = vmatmul.mubr.msk.f32.vlgmr.msra.gmra.mrb[0].mxu0 %vm426_vm2, %v14524_v37 }
 0x10b   : > { %14529 = vmatpush1.msk.msra.mxu1 %vm430_vm1, %v3712_v41  ;;  %3942 = vmatprep.mubr.f32.mxu0 %v15966_v0 }
 0x10c   : > { %6371 = vrot.lane.b32.xlu1 %v16127_v7, %s15985_s15  ;;  %15185 = vmatprep.subr.mxu1 %v15966_v0 }
 0x10d   : > { %6369 = vrot.lane.b32.xlu0 %v16116_v5, %s15985_s15  ;;  %14530 = vmatmul.mubr.msk.f32.vlgmr.msra.gmra.mrb[0].mxu1 %vm426_vm2, %v14524_v37  ;;  %s15991_s15 = smov 12  }
 0x10e   : > { %v3708_v42 = vpop.permute.xlu1 %3707  ;;  %v3706_v43 = vpop.permute.xlu0 %3705  ;;  %15187 = vmatprep.mubr.msk.f32.mxu1 %vm15976_vm3, %v15966_v0 }
 0x10f   : > { %v3717_v44 = vsel %vm3709_vm12, %v3708_v42, 0.0  ;;  %v3714_v45 = vsel %vm3709_vm12, %v3704_v39, %v3706_v43  ;;  %v3715_v46 = vsel %vm3709_vm12, %v3706_v43, %v3708_v42 }
 0x110   : > { %6696 = vrot.lane.b32.xlu1 %v16097_v2, %s15986_s21  ;;  %14531 = vmatprep.subr.msk.mxu0 %vm430_vm1, %v3715_v46 }
 0x111   : > { %6694 = vrot.lane.b32.xlu0 %v16120_v6, %s15986_s21  ;;  %14532 = vmatpush1.msk.msra.mxu0 %vm430_vm1, %v3714_v45 }
 0x112   : > { %v4033_v47 = vpop.permute.xlu1 %4032  ;;  %15186 = vmatpush3.msk.msra.mxu1 %vm430_vm1, %v3717_v44  ;;  %14533 = vmatmul.mubr.msk.f32.vlgmr.msra.gmra.mrb[2].mxu0 %vm426_vm2, %v14524_v37  ;;  %v14572_v44 = vld [vmem:[%s18633_s1 + $0x70] sm:$0x3f] }
 0x113   : > { %v4031_v48 = vpop.permute.xlu0 %4030  ;;  %15188 = vmatmul.mubr.msk.f32.vlgmr.msra.gmra.mrb[22].mxu1 %vm426_vm2, %v14524_v37  ;;  %4133 = vmatprep.mubr.f32.mxu0 %v15966_v0 }
 0x114   : > { %6700 = vrot.lane.b32.xlu1 %v16094_v1, %s15986_s21  ;;  %v4044_v2 = vsel %vm4042_vm13, %v4031_v48, %v4033_v47  ;;  %4204 = vmatprep.mubr.f32.mxu1 %v15966_v0  ;;  %v14536_v1 = vld [vmem:[%s18633_s1 + $0x58] sm:$0x3f] }
 0x115   : > { %6698 = vrot.lane.b32.xlu0 %v16105_v3, %s15986_s21  ;;  %14537 = vmatprep.subr.msk.mxu0 %vm430_vm1, %v4044_v2 }
 0x116   : > { %v4037_v49 = vpop.permute.xlu1 %4036 }
 0x117   : > { %v4035_v50 = vpop.permute.xlu0 %4034 }
 0x118   : > { %v4045_v51 = vsel %vm4042_vm13, %v4033_v47, %v4035_v50  ;;  %6702 = vrot.lane.b32.xlu1 %v16116_v5, %s15986_s21  ;;  %v4046_v52 = vsel %vm4042_vm13, %v4035_v50, %v4037_v49 }
 0x119   : > { %6692 = vrot.lane.b32.xlu0 %v16108_v4, %s15986_s21  ;;  %14540 = vmatprep.subr.msk.mxu1 %vm430_vm1, %v4046_v52 }
 0x11a   : > { %14541 = vmatpush1.msk.msra.mxu1 %vm430_vm1, %v4045_v51  ;;  %v4039_v53 = vpop.permute.xlu1 %4038 }
 0x11b   : > { %v4029_v54 = vpop.permute.xlu0 %4028  ;;  %15190 = vmatprep.subr.mxu1 %v15966_v0  ;;  %14542 = vmatmul.mubr.msk.f32.vlgmr.msra.gmra.mrb[0].mxu1 %vm426_vm2, %v14536_v1  ;;  %v4047_v59 = vsel %vm4042_vm13, %v4037_v49, %v4039_v53 }
 0x11c   : > { %v4043_v55 = vsel %vm4042_vm13, %v4029_v54, %v4031_v48  ;;  %7027 = vrot.lane.b32.xlu1 %v16120_v6, %s15987_s14  ;;  %15192 = vmatprep.mubr.msk.f32.mxu1 %vm15976_vm3, %v15966_v0 }
 0x11d   : > { %6704 = vrot.lane.b32.xlu0 %v16127_v7, %s15986_s21  ;;  %14538 = vmatpush1.msk.msra.mxu0 %vm430_vm1, %v4043_v55  ;;  %v16677_v7 = vld [vmem:[%s16091_s23 + $0x8] sm:$0x77]  ;;  %s15988_s23 = smov 15  }
 0x11e   : > { %v4364_v4 = vpop.permute.xlu1 %4363  ;;  %14539 = vmatmul.mubr.msk.f32.vlgmr.msra.gmra.mrb[0].mxu0 %vm426_vm2, %v14536_v1 }
 0x11f   : > { %v4041_v56 = vpop.permute.xlu0 %4040  ;;  %4275 = vmatprep.mubr.f32.mxu0 %v15966_v0 }
 0x120   : > { %v4050_v57 = vsel %vm4042_vm13, %v4041_v56, 0.0  ;;  %7031 = vrot.lane.b32.xlu1 %v16105_v3, %s15987_s14  ;;  %v4048_v58 = vsel %vm4042_vm13, %v4039_v53, %v4041_v56  ;;  %vm6373_vm13 = vcmask 334848  }
 0x121   : > { %7029 = vrot.lane.b32.xlu0 %v16677_v7, %s15987_s14  ;;  %14543 = vmatprep.subr.msk.mxu0 %vm430_vm1, %v4048_v58 }
 0x122   : > { %15191 = vmatpush3.msk.msra.mxu1 %vm430_vm1, %v4050_v57  ;;  %14544 = vmatpush1.msk.msra.mxu0 %vm430_vm1, %v4047_v59  ;;  %v4368_v60 = vpop.permute.xlu1 %4367 }
 0x123   : > { %v4366_v61 = vpop.permute.xlu0 %4365  ;;  %15193 = vmatmul.mubr.msk.f32.vlgmr.msra.gmra.mrb[24].mxu1 %vm426_vm2, %v14536_v1  ;;  %14545 = vmatmul.mubr.msk.f32.vlgmr.msra.gmra.mrb[2].mxu0 %vm426_vm2, %v14536_v1 }
 0x124   : > { %7025 = vrot.lane.b32.xlu1 %v16687_v62, %s15987_s14  ;;  %v4377_v63 = vsel %vm4375_vm14, %v4364_v4, %v4366_v61  ;;  %4537 = vmatprep.mubr.f32.mxu1 %v15966_v0  ;;  %v4378_v15 = vsel %vm4375_vm14, %v4366_v61, %v4368_v60 }
 0x125   : > { %7033 = vrot.lane.b32.xlu0 %v16694_v8, %s15987_s14  ;;  %14549 = vmatprep.subr.msk.mxu0 %vm430_vm1, %v4377_v63 }
 0x126   : > { %v4362_v9 = vpop.permute.xlu1 %4361  ;;  %4466 = vmatprep.mubr.f32.mxu0 %v15966_v0 }
 0x127   : > { %v4376_v10 = vsel %vm4375_vm14, %v4362_v9, %v4364_v4  ;;  %v4370_v11 = vpop.permute.xlu0 %4369  ;;  %v14584_v4 = vld [vmem:[%s18633_s1 + $0x78] sm:$0x3f] }
 0x128   : > { %7037 = vrot.lane.b32.xlu1 %v16702_v12, %s15987_s14  ;;  %14550 = vmatpush1.msk.msra.mxu0 %vm430_vm1, %v4376_v10  ;;  %v4379_v13 = vsel %vm4375_vm14, %v4368_v60, %v4370_v11 }
 0x129   : > { %7035 = vrot.lane.b32.xlu0 %v16116_v5, %s15987_s14  ;;  %14552 = vmatprep.subr.msk.mxu1 %vm430_vm1, %v4379_v13 }
 0x12a   : > { %14553 = vmatpush1.msk.msra.mxu1 %vm430_vm1, %v4378_v15  ;;  %v4374_v16 = vpop.permute.xlu1 %4373  ;;  %14551 = vmatmul.mubr.msk.f32.vlgmr.msra.gmra.mrb[0].mxu0 %vm426_vm2, %v14548_v14 }
 0x12b   : > { %v4383_v17 = vsel %vm4375_vm14, %v4374_v16, 0.0  ;;  %14554 = vmatmul.mubr.msk.f32.vlgmr.msra.gmra.mrb[0].mxu1 %vm426_vm2, %v14548_v14  ;;  %v4372_v18 = vpop.permute.xlu0 %4371  ;;  %15195 = vmatprep.subr.mxu1 %v15966_v0 }
 0x12c   : > { %v4380_v19 = vsel %vm4375_vm14, %v4370_v11, %v4372_v18  ;;  %7362 = vrot.lane.b32.xlu1 %v16677_v7, %s15988_s23  ;;  %v4381_v20 = vsel %vm4375_vm14, %v4372_v18, %v4374_v16  ;;  %15196 = vmatpush3.msk.msra.mxu1 %vm430_vm1, %v4383_v17 }
 0x12d   : > { %7360 = vrot.lane.b32.xlu0 %v16120_v6, %s15988_s23  ;;  %14555 = vmatprep.subr.msk.mxu0 %vm430_vm1, %v4381_v20 }
 0x12e   : > { %14556 = vmatpush1.msk.msra.mxu0 %vm430_vm1, %v4380_v19  ;;  %15197 = vmatprep.mubr.msk.f32.mxu1 %vm15976_vm3, %v15966_v0  ;;  %v4699_v21 = vpop.permute.xlu1 %4698 }
 0x12f   : > { %15198 = vmatmul.mubr.msk.f32.vlgmr.msra.gmra.mrb[26].mxu1 %vm426_vm2, %v14548_v14  ;;  %v4697_v22 = vpop.permute.xlu0 %4696  ;;  %4608 = vmatprep.mubr.f32.mxu0 %v15966_v0 }
 0x130   : > { %7366 = vrot.lane.b32.xlu1 %v16694_v8, %s15988_s23  ;;  %v4710_v23 = vsel %vm4708_vm15, %v4697_v22, %v4699_v21  ;;  %14557 = vmatmul.mubr.msk.f32.vlgmr.msra.gmra.mrb[2].mxu0 %vm426_vm2, %v14548_v14  ;;  %v14596_v14 = vld [vmem:[%s18633_s1 + $0x80] sm:$0x3f] }
 0x131   : > { %7364 = vrot.lane.b32.xlu0 %v16105_v3, %s15988_s23  ;;  %14561 = vmatprep.subr.msk.mxu0 %vm430_vm1, %v4710_v23 }
 0x132   : > { %v4703_v24 = vpop.permute.xlu1 %4702  ;;  %4870 = vmatprep.mubr.f32.mxu1 %v15966_v0  ;;  %4799 = vmatprep.mubr.f32.mxu0 %v15966_v0 }
 0x133   : > { %v4701_v25 = vpop.permute.xlu0 %4700 }
 0x134   : > { %v4711_v26 = vsel %vm4708_vm15, %v4699_v21, %v4701_v25  ;;  %7368 = vrot.lane.b32.xlu1 %v16116_v5, %s15988_s23  ;;  %v4712_v27 = vsel %vm4708_vm15, %v4701_v25, %v4703_v24 }
 0x135   : > { %7358 = vrot.lane.b32.xlu0 %v16687_v62, %s15988_s23  ;;  %14564 = vmatprep.subr.msk.mxu1 %vm430_vm1, %v4712_v27  ;;  %v14608_v27 = vld [vmem:[%s18633_s1 + $0x88] sm:$0x3f] }
 0x136   : > { %14565 = vmatpush1.msk.msra.mxu1 %vm430_vm1, %v4711_v26  ;;  %v4705_v29 = vpop.permute.xlu1 %4704 }
 0x137   : > { %v4695_v30 = vpop.permute.xlu0 %4694  ;;  %14566 = vmatmul.mubr.msk.f32.vlgmr.msra.gmra.mrb[0].mxu1 %vm426_vm2, %v14560_v28  ;;  %15200 = vmatprep.subr.mxu1 %v15966_v0  ;;  %v4713_v36 = vsel %vm4708_vm15, %v4703_v24, %v4705_v29 }
 0x138   : > { %v4709_v31 = vsel %vm4708_vm15, %v4695_v30, %v4697_v22  ;;  %7693 = vrot.lane.b32.xlu1 %v16120_v6, %s15989_s30  ;;  %15202 = vmatprep.mubr.msk.f32.mxu1 %vm15976_vm3, %v15966_v0 }
 0x139   : > { %7370 = vrot.lane.b32.xlu0 %v16702_v12, %s15988_s23  ;;  %14562 = vmatpush1.msk.msra.mxu0 %vm430_vm1, %v4709_v31  ;;  %s15990_s23 = smov 13  }
 0x13a   : > { %v5030_v32 = vpop.permute.xlu1 %5029  ;;  %14563 = vmatmul.mubr.msk.f32.vlgmr.msra.gmra.mrb[0].mxu0 %vm426_vm2, %v14560_v28 }
 0x13b   : > { %v4707_v33 = vpop.permute.xlu0 %4706  ;;  %4941 = vmatprep.mubr.f32.mxu0 %v15966_v0 }
 0x13c   : > { %v4716_v34 = vsel %vm4708_vm15, %v4707_v33, 0.0  ;;  %7697 = vrot.lane.b32.xlu1 %v16105_v3, %s15989_s30  ;;  %v4714_v35 = vsel %vm4708_vm15, %v4705_v29, %v4707_v33  ;;  %vm6706_vm15 = vcmask 326656  }
 0x13d   : > { %7695 = vrot.lane.b32.xlu0 %v16677_v7, %s15989_s30  ;;  %14567 = vmatprep.subr.msk.mxu0 %vm430_vm1, %v4714_v35 }
 0x13e   : > { %15201 = vmatpush3.msk.msra.mxu1 %vm430_vm1, %v4716_v34  ;;  %14568 = vmatpush1.msk.msra.mxu0 %vm430_vm1, %v4713_v36  ;;  %v5034_v37 = vpop.permute.xlu1 %5033 }
 0x13f   : > { %15203 = vmatmul.mubr.msk.f32.vlgmr.msra.gmra.mrb[28].mxu1 %vm426_vm2, %v14560_v28  ;;  %v5032_v38 = vpop.permute.xlu0 %5031  ;;  %14569 = vmatmul.mubr.msk.f32.vlgmr.msra.gmra.mrb[2].mxu0 %vm426_vm2, %v14560_v28 }
 0x140   : > { %7691 = vrot.lane.b32.xlu1 %v16687_v62, %s15989_s30  ;;  %v5043_v39 = vsel %vm5041_vm5, %v5030_v32, %v5032_v38  ;;  %5203 = vmatprep.mubr.f32.mxu1 %v15966_v0  ;;  %v5044_v45 = vsel %vm5041_vm5, %v5032_v38, %v5034_v37 }
 0x141   : > { %7699 = vrot.lane.b32.xlu0 %v16694_v8, %s15989_s30  ;;  %14573 = vmatprep.subr.msk.mxu0 %vm430_vm1, %v5043_v39 }
 0x142   : > { %v5028_v40 = vpop.permute.xlu1 %5027  ;;  %5132 = vmatprep.mubr.f32.mxu0 %v15966_v0 }
 0x143   : > { %v5042_v41 = vsel %vm5041_vm5, %v5028_v40, %v5030_v32  ;;  %v5036_v42 = vpop.permute.xlu0 %5035 }
 0x144   : > { %7703 = vrot.lane.b32.xlu1 %v16702_v12, %s15989_s30  ;;  %14574 = vmatpush1.msk.msra.mxu0 %vm430_vm1, %v5042_v41  ;;  %v5045_v43 = vsel %vm5041_vm5, %v5034_v37, %v5036_v42 }
 0x145   : > { %7701 = vrot.lane.b32.xlu0 %v16116_v5, %s15989_s30  ;;  %14576 = vmatprep.subr.msk.mxu1 %vm430_vm1, %v5045_v43 }
 0x146   : > { %14577 = vmatpush1.msk.msra.mxu1 %vm430_vm1, %v5044_v45  ;;  %v5040_v46 = vpop.permute.xlu1 %5039  ;;  %14575 = vmatmul.mubr.msk.f32.vlgmr.msra.gmra.mrb[0].mxu0 %vm426_vm2, %v14572_v44 }
 0x147   : > { %v5049_v47 = vsel %vm5041_vm5, %v5040_v46, 0.0  ;;  %14578 = vmatmul.mubr.msk.f32.vlgmr.msra.gmra.mrb[0].mxu1 %vm426_vm2, %v14572_v44  ;;  %v5038_v48 = vpop.permute.xlu0 %5037  ;;  %15205 = vmatprep.subr.mxu1 %v15966_v0 }
 0x148   : > { %v5046_v2 = vsel %vm5041_vm5, %v5036_v42, %v5038_v48  ;;  %8028 = vrot.lane.b32.xlu1 %v16677_v7, %s15990_s23  ;;  %v5047_v49 = vsel %vm5041_vm5, %v5038_v48, %v5040_v46  ;;  %15206 = vmatpush3.msk.msra.mxu1 %vm430_vm1, %v5049_v47  ;;  %v14620_v46 = vld [vmem:[%s18633_s1 + $0x90] sm:$0x3f] }
 0x149   : > { %8026 = vrot.lane.b32.xlu0 %v16120_v6, %s15990_s23  ;;  %14579 = vmatprep.subr.msk.mxu0 %vm430_vm1, %v5047_v49 }
 0x14a   : > { %14580 = vmatpush1.msk.msra.mxu0 %vm430_vm1, %v5046_v2  ;;  %15207 = vmatprep.mubr.msk.f32.mxu1 %vm15976_vm3, %v15966_v0  ;;  %v5365_v50 = vpop.permute.xlu1 %5364 }
 0x14b   : > { %15208 = vmatmul.mubr.msk.f32.vlgmr.msra.gmra.mrb[30].mxu1 %vm426_vm2, %v14572_v44  ;;  %v5363_v51 = vpop.permute.xlu0 %5362  ;;  %5274 = vmatprep.mubr.f32.mxu0 %v15966_v0 }
 0x14c   : > { %8032 = vrot.lane.b32.xlu1 %v16694_v8, %s15990_s23  ;;  %v5376_v52 = vsel %vm5374_vm9, %v5363_v51, %v5365_v50  ;;  %14581 = vmatmul.mubr.msk.f32.vlgmr.msra.gmra.mrb[2].mxu0 %vm426_vm2, %v14572_v44 }
 0x14d   : > { %8030 = vrot.lane.b32.xlu0 %v16105_v3, %s15990_s23  ;;  %14585 = vmatprep.subr.msk.mxu0 %vm430_vm1, %v5376_v52 }
 0x14e   : > { %v5369_v1 = vpop.permute.xlu1 %5368  ;;  %5536 = vmatprep.mubr.f32.mxu1 %v15966_v0  ;;  %5465 = vmatprep.mubr.f32.mxu0 %v15966_v0 }
 0x14f   : > { %v5367_v53 = vpop.permute.xlu0 %5366 }
 0x150   : > { %v5377_v54 = vsel %vm5374_vm9, %v5365_v50, %v5367_v53  ;;  %8034 = vrot.lane.b32.xlu1 %v16116_v5, %s15990_s23  ;;  %v5378_v55 = vsel %vm5374_vm9, %v5367_v53, %v5369_v1 }
 0x151   : > { %8024 = vrot.lane.b32.xlu0 %v16687_v62, %s15990_s23  ;;  %14588 = vmatprep.subr.msk.mxu1 %vm430_vm1, %v5378_v55 }
 0x152   : > { %14589 = vmatpush1.msk.msra.mxu1 %vm430_vm1, %v5377_v54  ;;  %v5371_v56 = vpop.permute.xlu1 %5370 }
 0x153   : > { %v5361_v57 = vpop.permute.xlu0 %5360  ;;  %14590 = vmatmul.mubr.msk.f32.vlgmr.msra.gmra.mrb[0].mxu1 %vm426_vm2, %v14584_v4  ;;  %15210 = vmatprep.subr.mxu1 %v15966_v0  ;;  %v5379_v63 = vsel %vm5374_vm9, %v5369_v1, %v5371_v56 }
 0x154   : > { %v5375_v58 = vsel %vm5374_vm9, %v5361_v57, %v5363_v51  ;;  %8359 = vrot.lane.b32.xlu1 %v16120_v6, %s15991_s15  ;;  %15212 = vmatprep.mubr.msk.f32.mxu1 %vm15976_vm3, %v15966_v0 }
 0x155   : > { %8036 = vrot.lane.b32.xlu0 %v16702_v12, %s15990_s23  ;;  %14586 = vmatpush1.msk.msra.mxu0 %vm430_vm1, %v5375_v58  ;;  %s15994_s23 = smov 120  }
 0x156   : > { %v5696_v59 = vpop.permute.xlu1 %5695  ;;  %14587 = vmatmul.mubr.msk.f32.vlgmr.msra.gmra.mrb[0].mxu0 %vm426_vm2, %v14584_v4 }
 0x157   : > { %v5373_v60 = vpop.permute.xlu0 %5372  ;;  %5607 = vmatprep.mubr.f32.mxu0 %v15966_v0 }
 0x158   : > { %v5382_v61 = vsel %vm5374_vm9, %v5373_v60, 0.0  ;;  %8363 = vrot.lane.b32.xlu1 %v16105_v3, %s15991_s15  ;;  %v5380_v6 = vsel %vm5374_vm9, %v5371_v56, %v5373_v60  ;;  %vm7039_vm9 = vcmask 130048  }
 0x159   : > { %8361 = vrot.lane.b32.xlu0 %v16677_v7, %s15991_s15  ;;  %14591 = vmatprep.subr.msk.mxu0 %vm430_vm1, %v5380_v6 }
 0x15a   : > { %15211 = vmatpush3.msk.msra.mxu1 %vm430_vm1, %v5382_v61  ;;  %14592 = vmatpush1.msk.msra.mxu0 %vm430_vm1, %v5379_v63  ;;  %v5700_v9 = vpop.permute.xlu1 %5699  ;;  %v14632_v63 = vld [vmem:[%s18633_s1 + $0x98] sm:$0x3f] }
 0x15b   : > { %15213 = vmatmul.mubr.msk.f32.vlgmr.msra.gmra.mrb[32].mxu1 %vm426_vm2, %v14584_v4  ;;  %v5698_v10 = vpop.permute.xlu0 %5697  ;;  %14593 = vmatmul.mubr.msk.f32.vlgmr.msra.gmra.mrb[2].mxu0 %vm426_vm2, %v14584_v4 }
 0x15c   : > { %8357 = vrot.lane.b32.xlu1 %v16687_v62, %s15991_s15  ;;  %v5709_v3 = vsel %vm5707_vm10, %v5696_v59, %v5698_v10  ;;  %5869 = vmatprep.mubr.f32.mxu1 %v15966_v0 }
 0x15d   : > { %8365 = vrot.lane.b32.xlu0 %v16694_v8, %s15991_s15  ;;  %14597 = vmatprep.subr.msk.mxu0 %vm430_vm1, %v5709_v3  ;;  %v5710_v8 = vsel %vm5707_vm10, %v5698_v10, %v5700_v9 }
 0x15e   : > { %v5694_v7 = vpop.permute.xlu1 %5693  ;;  %5798 = vmatprep.mubr.f32.mxu0 %v15966_v0 }
 0x15f   : > { %v5708_v11 = vsel %vm5707_vm10, %v5694_v7, %v5696_v59  ;;  %v5702_v13 = vpop.permute.xlu0 %5701 }
 0x160   : > { %8369 = vrot.lane.b32.xlu1 %v16702_v12, %s15991_s15  ;;  %14598 = vmatpush1.msk.msra.mxu0 %vm430_vm1, %v5708_v11  ;;  %v5711_v62 = vsel %vm5707_vm10, %v5700_v9, %v5702_v13 }
 0x161   : > { %8367 = vrot.lane.b32.xlu0 %v16116_v5, %s15991_s15  ;;  %14600 = vmatprep.subr.msk.mxu1 %vm430_vm1, %v5711_v62 }
 0x162   : > { %14601 = vmatpush1.msk.msra.mxu1 %vm430_vm1, %v5710_v8  ;;  %v5706_v15 = vpop.permute.xlu1 %5705  ;;  %14599 = vmatmul.mubr.msk.f32.vlgmr.msra.gmra.mrb[0].mxu0 %vm426_vm2, %v14596_v14 }
 0x163   : > { %v5715_v12 = vsel %vm5707_vm10, %v5706_v15, 0.0  ;;  %14602 = vmatmul.mubr.msk.f32.vlgmr.msra.gmra.mrb[0].mxu1 %vm426_vm2, %v14596_v14  ;;  %v5704_v16 = vpop.permute.xlu0 %5703  ;;  %15215 = vmatprep.subr.mxu1 %v15966_v0 }
 0x164   : > { %v5712_v17 = vsel %vm5707_vm10, %v5702_v13, %v5704_v16  ;;  %v5713_v18 = vsel %vm5707_vm10, %v5704_v16, %v5706_v15  ;;  %15216 = vmatpush3.msk.msra.mxu1 %vm430_vm1, %v5715_v12  ;;  %15217 = vmatprep.mubr.msk.f32.mxu1 %vm15976_vm3, %v15966_v0  ;;  %vm7372_vm10 = vcmask 121856  }
 0x165   : > { %14603 = vmatprep.subr.msk.mxu0 %vm430_vm1, %v5713_v18  ;;  %5940 = vmatprep.mubr.f32.mxu0 %v15966_v0 }
 0x166   : > { %14604 = vmatpush1.msk.msra.mxu0 %vm430_vm1, %v5712_v17  ;;  %v6031_v5 = vpop.permute.xlu1 %6030  ;;  %v725_v19 = vpop.f32.mrb[2].mxu1 }
 0x167   : > { %15218 = vmatmul.mubr.msk.f32.vlgmr.msra.gmra.mrb[34].mxu1 %vm426_vm2, %v14596_v14  ;;  %v6029_v20 = vpop.permute.xlu0 %6028  ;;  %14605 = vmatmul.mubr.msk.f32.vlgmr.msra.gmra.mrb[2].mxu0 %vm426_vm2, %v14596_v14  ;;  %v15139_v21 = vpop.f32.mrb[3].mxu1 }
 0x168   : > { %v6042_v22 = vsel %vm6040_vm11, %v6029_v20, %v6031_v5  ;;  %6202 = vmatprep.mubr.f32.mxu1 %v15966_v0  ;;  %6131 = vmatprep.mubr.f32.mxu0 %v15966_v0 }
 0x169   : > { %14609 = vmatprep.subr.msk.mxu0 %vm430_vm1, %v6042_v22  ;;  %v14644_v22 = vld [vmem:[%s18633_s1 + $0xa0] sm:$0x3f] }
 0x16a   : > { %v6035_v23 = vpop.permute.xlu1 %6034 }
 0x16b   : > { %v6033_v24 = vpop.permute.xlu0 %6032 }
 0x16c   : > { %v6043_v25 = vsel %vm6040_vm11, %v6031_v5, %v6033_v24  ;;  %v6044_v26 = vsel %vm6040_vm11, %v6033_v24, %v6035_v23 }
 0x16d   : > { %14612 = vmatprep.subr.msk.mxu1 %vm430_vm1, %v6044_v26 }
 0x16e   : > { %14613 = vmatpush1.msk.msra.mxu1 %vm430_vm1, %v6043_v25  ;;  %v6037_v28 = vpop.permute.xlu1 %6036 }
 0x16f   : > { %v6027_v29 = vpop.permute.xlu0 %6026  ;;  %14614 = vmatmul.mubr.msk.f32.vlgmr.msra.gmra.mrb[0].mxu1 %vm426_vm2, %v14608_v27  ;;  %15220 = vmatprep.subr.mxu1 %v15966_v0  ;;  %v6045_v38 = vsel %vm6040_vm11, %v6035_v23, %v6037_v28 }
 0x170   : > { %v6041_v30 = vsel %vm6040_vm11, %v6027_v29, %v6029_v20  ;;  %15222 = vmatprep.mubr.msk.f32.mxu1 %vm15976_vm3, %v15966_v0 }
 0x171   : > { %14610 = vmatpush1.msk.msra.mxu0 %vm430_vm1, %v6041_v30  ;;  %v1025_v31 = vpop.f32.mrb[4].mxu1 }
 0x172   : > { %v6362_v32 = vpop.permute.xlu1 %6361  ;;  %14611 = vmatmul.mubr.msk.f32.vlgmr.msra.gmra.mrb[0].mxu0 %vm426_vm2, %v14608_v27  ;;  %v1026_v33 = vadd.f32 %v1025_v31, %v725_v19  ;;  %v15144_v34 = vpop.f32.mrb[5].mxu1 }
 0x173   : > { %v6039_v35 = vpop.permute.xlu0 %6038  ;;  %6273 = vmatprep.mubr.f32.mxu0 %v15966_v0  ;;  %v8688_v34 = vld [vmem:[%s18634_s2] sm:$0x3f] }
 0x174   : > { %v6048_v36 = vsel %vm6040_vm11, %v6039_v35, 0.0  ;;  %v6046_v37 = vsel %vm6040_vm11, %v6037_v28, %v6039_v35  ;;  %vm7705_vm11 = vcmask 113664  }
 0x175   : > { %14615 = vmatprep.subr.msk.mxu0 %vm430_vm1, %v6046_v37  ;;  %15221 = vmatpush3.msk.msra.mxu1 %vm430_vm1, %v6048_v36  ;;  %v15992_v36 = vmov 0  }
 0x176   : > { %14616 = vmatpush1.msk.msra.mxu0 %vm430_vm1, %v6045_v38  ;;  %15223 = vmatmul.mubr.msk.f32.vlgmr.msra.gmra.mrb[36].mxu1 %vm426_vm2, %v14608_v27  ;;  %v6366_v39 = vpop.permute.xlu1 %6365 }
 0x177   : > { %v6364_v40 = vpop.permute.xlu0 %6363  ;;  %14617 = vmatmul.mubr.msk.f32.vlgmr.msra.gmra.mrb[2].mxu0 %vm426_vm2, %v14608_v27  ;;  %6535 = vmatprep.mubr.f32.mxu1 %v15966_v0 }
 0x178   : > { %v6375_v41 = vsel %vm6373_vm13, %v6362_v32, %v6364_v40  ;;  %6464 = vmatprep.mubr.f32.mxu0 %v15966_v0  ;;  %v6376_v48 = vsel %vm6373_vm13, %v6364_v40, %v6366_v39  ;;  %15814 = vset.pattern.permute.xlu0 %v15992_v36 }
 0x179   : > { %14621 = vmatprep.subr.msk.mxu0 %vm430_vm1, %v6375_v41  ;;  %8691 = vperm.xlu0 %15814, %v8688_v34   ;;  %v14656_v41 = vld [vmem:[%s18633_s1 + $0xa8] sm:$0x3f] }
 0x17a   : > { %v6360_v42 = vpop.permute.xlu1 %6359  ;;  %15815 = vset.pattern.permute.xlu1 %v15992_v36 }
 0x17b   : > { %v6374_v43 = vsel %vm6373_vm13, %v6360_v42, %v6362_v32  ;;  %v6368_v44 = vpop.permute.xlu0 %6367 }
 0x17c   : > { %14622 = vmatpush1.msk.msra.mxu0 %vm430_vm1, %v6374_v43  ;;  %v6377_v45 = vsel %vm6373_vm13, %v6366_v39, %v6368_v44  ;;  %v1351_v47 = vpop.f32.mrb[6].mxu1 }
 0x17d   : > { %14624 = vmatprep.subr.msk.mxu1 %vm430_vm1, %v6377_v45  ;;  %14623 = vmatmul.mubr.msk.f32.vlgmr.msra.gmra.mrb[0].mxu0 %vm426_vm2, %v14620_v46  ;;  %v1361_v2 = vadd.f32 %v1351_v47, %v1026_v33  ;;  %v15149_v49 = vpop.f32.mrb[7].mxu1 }
 0x17e   : > { %14625 = vmatpush1.msk.msra.mxu1 %vm430_vm1, %v6376_v48  ;;  %v6372_v50 = vpop.permute.xlu1 %6371  ;;  %6606 = vmatprep.mubr.f32.mxu0 %v15966_v0 }
 0x17f   : > { %v6381_v51 = vsel %vm6373_vm13, %v6372_v50, 0.0  ;;  %14626 = vmatmul.mubr.msk.f32.vlgmr.msra.gmra.mrb[0].mxu1 %vm426_vm2, %v14620_v46  ;;  %v6370_v52 = vpop.permute.xlu0 %6369  ;;  %15225 = vmatprep.subr.mxu1 %v15966_v0 }
 0x180   : > { %v6378_v1 = vsel %vm6373_vm13, %v6368_v44, %v6370_v52  ;;  %v6379_v53 = vsel %vm6373_vm13, %v6370_v52, %v6372_v50  ;;  %15226 = vmatpush3.msk.msra.mxu1 %vm430_vm1, %v6381_v51  ;;  %15227 = vmatprep.mubr.msk.f32.mxu1 %vm15976_vm3, %v15966_v0  ;;  %vm8038_vm13 = vcmask 105472  }
 0x181   : > { %14627 = vmatprep.subr.msk.mxu0 %vm430_vm1, %v6379_v53 }
 0x182   : > { %14628 = vmatpush1.msk.msra.mxu0 %vm430_vm1, %v6378_v1  ;;  %v6697_v54 = vpop.permute.xlu1 %6696 }
 0x183   : > { %15228 = vmatmul.mubr.msk.f32.vlgmr.msra.gmra.mrb[38].mxu1 %vm426_vm2, %v14620_v46  ;;  %v6695_v55 = vpop.permute.xlu0 %6694  ;;  %14629 = vmatmul.mubr.msk.f32.vlgmr.msra.gmra.mrb[2].mxu0 %vm426_vm2, %v14620_v46 }
 0x184   : > { %v6708_v4 = vsel %vm6706_vm15, %v6695_v55, %v6697_v54  ;;  %6868 = vmatprep.mubr.f32.mxu1 %v15966_v0  ;;  %6797 = vmatprep.mubr.f32.mxu0 %v15966_v0 }
 0x185   : > { %14633 = vmatprep.subr.msk.mxu0 %vm430_vm1, %v6708_v4 }
 0x186   : > { %v6701_v56 = vpop.permute.xlu1 %6700  ;;  %v1684_v57 = vpop.f32.mrb[8].mxu1 }
 0x187   : > { %v6699_v58 = vpop.permute.xlu0 %6698  ;;  %v1694_v59 = vadd.f32 %v1684_v57, %v1361_v2  ;;  %v15154_v60 = vpop.f32.mrb[9].mxu1  ;;  %v14668_v57 = vld [vmem:[%s18633_s1 + $0xb0] sm:$0x3f] }
 0x188   : > { %v6709_v61 = vsel %vm6706_vm15, %v6697_v54, %v6699_v58  ;;  %v6710_v6 = vsel %vm6706_vm15, %v6699_v58, %v6701_v56 }
 0x189   : > { %14636 = vmatprep.subr.msk.mxu1 %vm430_vm1, %v6710_v6 }
 0x18a   : > { %14637 = vmatpush1.msk.msra.mxu1 %vm430_vm1, %v6709_v61  ;;  %v6703_v9 = vpop.permute.xlu1 %6702 }
 0x18b   : > { %v6693_v10 = vpop.permute.xlu0 %6692  ;;  %14638 = vmatmul.mubr.msk.f32.vlgmr.msra.gmra.mrb[0].mxu1 %vm426_vm2, %v14632_v63  ;;  %15230 = vmatprep.subr.mxu1 %v15966_v0  ;;  %v6711_v14 = vsel %vm6706_vm15, %v6701_v56, %v6703_v9 }
 0x18c   : > { %v6707_v3 = vsel %vm6706_vm15, %v6693_v10, %v6695_v55  ;;  %15232 = vmatprep.mubr.msk.f32.mxu1 %vm15976_vm3, %v15966_v0 }
 0x18d   : > { %14634 = vmatpush1.msk.msra.mxu0 %vm430_vm1, %v6707_v3 }
 0x18e   : > { %v7028_v7 = vpop.permute.xlu1 %7027  ;;  %14635 = vmatmul.mubr.msk.f32.vlgmr.msra.gmra.mrb[0].mxu0 %vm426_vm2, %v14632_v63 }
 0x18f   : > { %v6705_v11 = vpop.permute.xlu0 %6704  ;;  %6939 = vmatprep.mubr.f32.mxu0 %v15966_v0 }
 0x190   : > { %v6714_v13 = vsel %vm6706_vm15, %v6705_v11, 0.0  ;;  %v6712_v62 = vsel %vm6706_vm15, %v6703_v9, %v6705_v11  ;;  %vm8371_vm15 = vcmask 97280  }
 0x191   : > { %14639 = vmatprep.subr.msk.mxu0 %vm430_vm1, %v6712_v62  ;;  %15231 = vmatpush3.msk.msra.mxu1 %vm430_vm1, %v6714_v13  ;;  %v2017_v8 = vpop.f32.mrb[10].mxu1 }
 0x192   : > { %14640 = vmatpush1.msk.msra.mxu0 %vm430_vm1, %v6711_v14  ;;  %15233 = vmatmul.mubr.msk.f32.vlgmr.msra.gmra.mrb[40].mxu1 %vm426_vm2, %v14632_v63  ;;  %v7032_v15 = vpop.permute.xlu1 %7031  ;;  %v2027_v12 = vadd.f32 %v2017_v8, %v1694_v59  ;;  %v15159_v16 = vpop.f32.mrb[11].mxu1 }
 0x193   : > { %v7030_v17 = vpop.permute.xlu0 %7029  ;;  %14641 = vmatmul.mubr.msk.f32.vlgmr.msra.gmra.mrb[2].mxu0 %vm426_vm2, %v14632_v63  ;;  %7201 = vmatprep.mubr.f32.mxu1 %v15966_v0 }
 0x194   : > { %v7041_v18 = vsel %vm7039_vm9, %v7028_v7, %v7030_v17  ;;  %7130 = vmatprep.mubr.f32.mxu0 %v15966_v0  ;;  %v7042_v23 = vsel %vm7039_vm9, %v7030_v17, %v7032_v15 }
 0x195   : > { %14645 = vmatprep.subr.msk.mxu0 %vm430_vm1, %v7041_v18 }
 0x196   : > { %v7026_v5 = vpop.permute.xlu1 %7025 }
 0x197   : > { %v7040_v19 = vsel %vm7039_vm9, %v7026_v5, %v7028_v7  ;;  %v7034_v20 = vpop.permute.xlu0 %7033 }
 0x198   : > { %14646 = vmatpush1.msk.msra.mxu0 %vm430_vm1, %v7040_v19  ;;  %v7043_v21 = vsel %vm7039_vm9, %v7032_v15, %v7034_v20 }
 0x199   : > { %14648 = vmatprep.subr.msk.mxu1 %vm430_vm1, %v7043_v21  ;;  %14647 = vmatmul.mubr.msk.f32.vlgmr.msra.gmra.mrb[0].mxu0 %vm426_vm2, %v14644_v22 }
 0x19a   : > { %14649 = vmatpush1.msk.msra.mxu1 %vm430_vm1, %v7042_v23  ;;  %v7038_v24 = vpop.permute.xlu1 %7037  ;;  %7272 = vmatprep.mubr.f32.mxu0 %v15966_v0 }
 0x19b   : > { %v7047_v25 = vsel %vm7039_vm9, %v7038_v24, 0.0  ;;  %14650 = vmatmul.mubr.msk.f32.vlgmr.msra.gmra.mrb[0].mxu1 %vm426_vm2, %v14644_v22  ;;  %v7036_v26 = vpop.permute.xlu0 %7035  ;;  %15235 = vmatprep.subr.mxu1 %v15966_v0 }
 0x19c   : > { %v7044_v27 = vsel %vm7039_vm9, %v7034_v20, %v7036_v26  ;;  %v7045_v28 = vsel %vm7039_vm9, %v7036_v26, %v7038_v24  ;;  %15236 = vmatpush3.msk.msra.mxu1 %vm430_vm1, %v7047_v25  ;;  %15237 = vmatprep.mubr.msk.f32.mxu1 %vm15976_vm3, %v15966_v0 }
 0x19d   : > { %14651 = vmatprep.subr.msk.mxu0 %vm430_vm1, %v7045_v28 }
 0x19e   : > { %14652 = vmatpush1.msk.msra.mxu0 %vm430_vm1, %v7044_v27  ;;  %v7363_v29 = vpop.permute.xlu1 %7362  ;;  %v2350_v30 = vpop.f32.mrb[12].mxu1 }
 0x19f   : > { %15238 = vmatmul.mubr.msk.f32.vlgmr.msra.gmra.mrb[42].mxu1 %vm426_vm2, %v14644_v22  ;;  %v7361_v31 = vpop.permute.xlu0 %7360  ;;  %14653 = vmatmul.mubr.msk.f32.vlgmr.msra.gmra.mrb[2].mxu0 %vm426_vm2, %v14644_v22  ;;  %v2360_v32 = vadd.f32 %v2350_v30, %v2027_v12  ;;  %v15164_v33 = vpop.f32.mrb[13].mxu1  ;;  %v14680_v12 = vld [vmem:[%s18633_s1 + $0xb8] sm:$0x3f]  ;;  %v14692_v30 = vld [vmem:[%s18633_s1 + $0xc0] sm:$0x3f] }
 0x1a0   : > { %v7374_v35 = vsel %vm7372_vm10, %v7361_v31, %v7363_v29  ;;  %7534 = vmatprep.mubr.f32.mxu1 %v15966_v0  ;;  %7463 = vmatprep.mubr.f32.mxu0 %v15966_v0 }
 0x1a1   : > { %14657 = vmatprep.subr.msk.mxu0 %vm430_vm1, %v7374_v35 }
 0x1a2   : > { %v7367_v37 = vpop.permute.xlu1 %7366 }
 0x1a3   : > { %v7365_v38 = vpop.permute.xlu0 %7364 }
 0x1a4   : > { %v7375_v39 = vsel %vm7372_vm10, %v7363_v29, %v7365_v38  ;;  %v7376_v40 = vsel %vm7372_vm10, %v7365_v38, %v7367_v37 }
 0x1a5   : > { %14660 = vmatprep.subr.msk.mxu1 %vm430_vm1, %v7376_v40 }
 0x1a6   : > { %14661 = vmatpush1.msk.msra.mxu1 %vm430_vm1, %v7375_v39  ;;  %v7369_v42 = vpop.permute.xlu1 %7368 }
 0x1a7   : > { %v7359_v43 = vpop.permute.xlu0 %7358  ;;  %14662 = vmatmul.mubr.msk.f32.vlgmr.msra.gmra.mrb[0].mxu1 %vm426_vm2, %v14656_v41  ;;  %15240 = vmatprep.subr.mxu1 %v15966_v0  ;;  %v7377_v2 = vsel %vm7372_vm10, %v7367_v37, %v7369_v42 }
 0x1a8   : > { %v7373_v44 = vsel %vm7372_vm10, %v7359_v43, %v7361_v31  ;;  %15242 = vmatprep.mubr.msk.f32.mxu1 %vm15976_vm3, %v15966_v0 }
 0x1a9   : > { %14658 = vmatpush1.msk.msra.mxu0 %vm430_vm1, %v7373_v44 }
 0x1aa   : > { %v7694_v45 = vpop.permute.xlu1 %7693  ;;  %14659 = vmatmul.mubr.msk.f32.vlgmr.msra.gmra.mrb[0].mxu0 %vm426_vm2, %v14656_v41 }
 0x1ab   : > { %v7371_v46 = vpop.permute.xlu0 %7370  ;;  %7605 = vmatprep.mubr.f32.mxu0 %v15966_v0 }
 0x1ac   : > { %v7380_v47 = vsel %vm7372_vm10, %v7371_v46, 0.0  ;;  %v7378_v48 = vsel %vm7372_vm10, %v7369_v42, %v7371_v46  ;;  %vm9379_vm10 = vcmask 998400  }
 0x1ad   : > { %14663 = vmatprep.subr.msk.mxu0 %vm430_vm1, %v7378_v48  ;;  %15241 = vmatpush3.msk.msra.mxu1 %vm430_vm1, %v7380_v47  ;;  %v2683_v49 = vpop.f32.mrb[14].mxu1 }
 0x1ae   : > { %14664 = vmatpush1.msk.msra.mxu0 %vm430_vm1, %v7377_v2  ;;  %15243 = vmatmul.mubr.msk.f32.vlgmr.msra.gmra.mrb[44].mxu1 %vm426_vm2, %v14656_v41  ;;  %v7698_v50 = vpop.permute.xlu1 %7697  ;;  %v2693_v51 = vadd.f32 %v2683_v49, %v2360_v32  ;;  %v15169_v52 = vpop.f32.mrb[15].mxu1 }
 0x1af   : > { %v7696_v1 = vpop.permute.xlu0 %7695  ;;  %14665 = vmatmul.mubr.msk.f32.vlgmr.msra.gmra.mrb[2].mxu0 %vm426_vm2, %v14656_v41  ;;  %7867 = vmatprep.mubr.f32.mxu1 %v15966_v0 }
 0x1b0   : > { %v7707_v53 = vsel %vm7705_vm11, %v7694_v45, %v7696_v1  ;;  %7796 = vmatprep.mubr.f32.mxu0 %v15966_v0  ;;  %v7708_v58 = vsel %vm7705_vm11, %v7696_v1, %v7698_v50 }
 0x1b1   : > { %14669 = vmatprep.subr.msk.mxu0 %vm430_vm1, %v7707_v53 }
 0x1b2   : > { %v7692_v54 = vpop.permute.xlu1 %7691 }
 0x1b3   : > { %v7706_v55 = vsel %vm7705_vm11, %v7692_v54, %v7694_v45  ;;  %v7700_v4 = vpop.permute.xlu0 %7699 }
 0x1b4   : > { %14670 = vmatpush1.msk.msra.mxu0 %vm430_vm1, %v7706_v55  ;;  %v7709_v56 = vsel %vm7705_vm11, %v7698_v50, %v7700_v4 }
 0x1b5   : > { %14672 = vmatprep.subr.msk.mxu1 %vm430_vm1, %v7709_v56  ;;  %14671 = vmatmul.mubr.msk.f32.vlgmr.msra.gmra.mrb[0].mxu0 %vm426_vm2, %v14668_v57 }
 0x1b6   : > { %14673 = vmatpush1.msk.msra.mxu1 %vm430_vm1, %v7708_v58  ;;  %v7704_v59 = vpop.permute.xlu1 %7703  ;;  %7938 = vmatprep.mubr.f32.mxu0 %v15966_v0 }
 0x1b7   : > { %v7713_v60 = vsel %vm7705_vm11, %v7704_v59, 0.0  ;;  %14674 = vmatmul.mubr.msk.f32.vlgmr.msra.gmra.mrb[0].mxu1 %vm426_vm2, %v14668_v57  ;;  %v7702_v61 = vpop.permute.xlu0 %7701  ;;  %15245 = vmatprep.subr.mxu1 %v15966_v0 }
 0x1b8   : > { %v7710_v6 = vsel %vm7705_vm11, %v7700_v4, %v7702_v61  ;;  %v7711_v63 = vsel %vm7705_vm11, %v7702_v61, %v7704_v59  ;;  %15246 = vmatpush3.msk.msra.mxu1 %vm430_vm1, %v7713_v60  ;;  %15247 = vmatprep.mubr.msk.f32.mxu1 %vm15976_vm3, %v15966_v0 }
 0x1b9   : > { %14675 = vmatprep.subr.msk.mxu0 %vm430_vm1, %v7711_v63 }
 0x1ba   : > { %14676 = vmatpush1.msk.msra.mxu0 %vm430_vm1, %v7710_v6  ;;  %v8029_v9 = vpop.permute.xlu1 %8028  ;;  %v3016_v10 = vpop.f32.mrb[16].mxu1 }
 0x1bb   : > { %15248 = vmatmul.mubr.msk.f32.vlgmr.msra.gmra.mrb[46].mxu1 %vm426_vm2, %v14668_v57  ;;  %v8027_v3 = vpop.permute.xlu0 %8026  ;;  %14677 = vmatmul.mubr.msk.f32.vlgmr.msra.gmra.mrb[2].mxu0 %vm426_vm2, %v14668_v57  ;;  %v3026_v7 = vadd.f32 %v3016_v10, %v2693_v51  ;;  %v15174_v11 = vpop.f32.mrb[17].mxu1 }
 0x1bc   : > { %v8040_v13 = vsel %vm8038_vm13, %v8027_v3, %v8029_v9  ;;  %8200 = vmatprep.mubr.f32.mxu1 %v15966_v0  ;;  %8129 = vmatprep.mubr.f32.mxu0 %v15966_v0 }
 0x1bd   : > { %14681 = vmatprep.subr.msk.mxu0 %vm430_vm1, %v8040_v13 }
 0x1be   : > { %v8033_v62 = vpop.permute.xlu1 %8032 }
 0x1bf   : > { %v8031_v14 = vpop.permute.xlu0 %8030 }
 0x1c0   : > { %v8041_v8 = vsel %vm8038_vm13, %v8029_v9, %v8031_v14  ;;  %v8042_v15 = vsel %vm8038_vm13, %v8031_v14, %v8033_v62 }
 0x1c1   : > { %14684 = vmatprep.subr.msk.mxu1 %vm430_vm1, %v8042_v15 }
 0x1c2   : > { %14685 = vmatpush1.msk.msra.mxu1 %vm430_vm1, %v8041_v8  ;;  %v8035_v16 = vpop.permute.xlu1 %8034 }
 0x1c3   : > { %v8025_v17 = vpop.permute.xlu0 %8024  ;;  %14686 = vmatmul.mubr.msk.f32.vlgmr.msra.gmra.mrb[0].mxu1 %vm426_vm2, %v14680_v12  ;;  %15250 = vmatprep.subr.mxu1 %v15966_v0  ;;  %v8043_v22 = vsel %vm8038_vm13, %v8033_v62, %v8035_v16 }
 0x1c4   : > { %v8039_v18 = vsel %vm8038_vm13, %v8025_v17, %v8027_v3  ;;  %15252 = vmatprep.mubr.msk.f32.mxu1 %vm15976_vm3, %v15966_v0 }
 0x1c5   : > { %14682 = vmatpush1.msk.msra.mxu0 %vm430_vm1, %v8039_v18 }
 0x1c6   : > { %v8360_v5 = vpop.permute.xlu1 %8359  ;;  %14683 = vmatmul.mubr.msk.f32.vlgmr.msra.gmra.mrb[0].mxu0 %vm426_vm2, %v14680_v12 }
 0x1c7   : > { %v8037_v19 = vpop.permute.xlu0 %8036  ;;  %8271 = vmatprep.mubr.f32.mxu0 %v15966_v0 }
 0x1c8   : > { %v8046_v20 = vsel %vm8038_vm13, %v8037_v19, 0.0  ;;  %v8044_v21 = vsel %vm8038_vm13, %v8035_v16, %v8037_v19  ;;  %vm9573_vm13 = vcmask 982016  }
 0x1c9   : > { %14687 = vmatprep.subr.msk.mxu0 %vm430_vm1, %v8044_v21  ;;  %15251 = vmatpush3.msk.msra.mxu1 %vm430_vm1, %v8046_v20  ;;  %v3349_v23 = vpop.f32.mrb[18].mxu1 }
 0x1ca   : > { %14688 = vmatpush1.msk.msra.mxu0 %vm430_vm1, %v8043_v22  ;;  %15253 = vmatmul.mubr.msk.f32.vlgmr.msra.gmra.mrb[48].mxu1 %vm426_vm2, %v14680_v12  ;;  %v8364_v24 = vpop.permute.xlu1 %8363  ;;  %v3359_v25 = vadd.f32 %v3349_v23, %v3026_v7  ;;  %v15179_v26 = vpop.f32.mrb[19].mxu1 }
 0x1cb   : > { %v8362_v27 = vpop.permute.xlu0 %8361  ;;  %14689 = vmatmul.mubr.msk.f32.vlgmr.msra.gmra.mrb[2].mxu0 %vm426_vm2, %v14680_v12  ;;  %8533 = vmatprep.mubr.f32.mxu1 %v15966_v0 }
 0x1cc   : > { %v8373_v28 = vsel %vm8371_vm15, %v8360_v5, %v8362_v27  ;;  %8462 = vmatprep.mubr.f32.mxu0 %v15966_v0  ;;  %v8374_v34 = vsel %vm8371_vm15, %v8362_v27, %v8364_v24 }
 0x1cd   : > { %14693 = vmatprep.subr.msk.mxu0 %vm430_vm1, %v8373_v28 }
 0x1ce   : > { %v8358_v29 = vpop.permute.xlu1 %8357 }
 0x1cf   : > { %v8372_v31 = vsel %vm8371_vm15, %v8358_v29, %v8360_v5  ;;  %v8366_v32 = vpop.permute.xlu0 %8365 }
 0x1d0   : > { %14694 = vmatpush1.msk.msra.mxu0 %vm430_vm1, %v8372_v31  ;;  %v8375_v33 = vsel %vm8371_vm15, %v8364_v24, %v8366_v32 }
 0x1d1   : > { %14696 = vmatprep.subr.msk.mxu1 %vm430_vm1, %v8375_v33  ;;  %14695 = vmatmul.mubr.msk.f32.vlgmr.msra.gmra.mrb[0].mxu0 %vm426_vm2, %v14692_v30 }
 0x1d2   : > { %14697 = vmatpush1.msk.msra.mxu1 %vm430_vm1, %v8374_v34  ;;  %v8370_v35 = vpop.permute.xlu1 %8369  ;;  %8604 = vmatprep.mubr.f32.mxu0 %v15966_v0 }
 0x1d3   : > { %v8379_v36 = vsel %vm8371_vm15, %v8370_v35, 0.0  ;;  %14698 = vmatmul.mubr.msk.f32.vlgmr.msra.gmra.mrb[0].mxu1 %vm426_vm2, %v14692_v30  ;;  %v8368_v37 = vpop.permute.xlu0 %8367  ;;  %15255 = vmatprep.subr.mxu1 %v15966_v0 }
 0x1d4   : > { %v8376_v38 = vsel %vm8371_vm15, %v8366_v32, %v8368_v37  ;;  %v8377_v39 = vsel %vm8371_vm15, %v8368_v37, %v8370_v35  ;;  %15256 = vmatpush3.msk.msra.mxu1 %vm430_vm1, %v8379_v36  ;;  %15257 = vmatprep.mubr.msk.f32.mxu1 %vm15976_vm3, %v15966_v0 }
 0x1d5   : > { %14699 = vmatprep.subr.msk.mxu0 %vm430_vm1, %v8377_v39 }
 0x1d6   : > { %14700 = vmatpush1.msk.msra.mxu0 %vm430_vm1, %v8376_v38  ;;  %v3682_v40 = vpop.f32.mrb[20].mxu1  ;;  %vm8842_vm1 = vcmask 1045504  }
 0x1d7   : > { %14701 = vmatmul.mubr.msk.f32.vlgmr.msra.gmra.mrb[2].mxu0 %vm426_vm2, %v14692_v30  ;;  %15258 = vmatmul.mubr.msk.f32.vlgmr.msra.gmra.mrb[50].mxu1 %vm426_vm2, %v14692_v30  ;;  %v3692_v41 = vadd.f32 %v3682_v40, %v3359_v25  ;;  %v15184_v42 = vpop.f32.mrb[21].mxu1  ;;  %vm8835_vm2 = vcmask 48128  }
 0x1d8   : > { %9083 = vmatprep.mubr.f32.mxu0 %v15966_v0  ;;  %8915 = vmatprep.mubr.f32.mxu1 %v15966_v0 }
 0x1e6   : > { %v4015_v43 = vpop.f32.mrb[22].mxu1 }
 0x1e7   : > { %v4025_v44 = vadd.f32 %v4015_v43, %v3692_v41  ;;  %v15189_v45 = vpop.f32.mrb[23].mxu1 }
 0x1f6   : > { %v4348_v46 = vpop.f32.mrb[24].mxu1 }
 0x1f7   : > { %v4358_v47 = vadd.f32 %v4348_v46, %v4025_v44  ;;  %v15194_v48 = vpop.f32.mrb[25].mxu1 }
 0x1f8   : > { %v17115_v23 = vpop.permute.xlu0 %8691 }
 0x202   : > { %v4681_v2 = vpop.f32.mrb[26].mxu1 }
 0x203   : > { %v4691_v49 = vadd.f32 %v4681_v2, %v4358_v47  ;;  %v15199_v50 = vpop.f32.mrb[27].mxu1 }
 0x212   : > { %v5014_v51 = vpop.f32.mrb[28].mxu1 }
 0x213   : > { %v5024_v52 = vadd.f32 %v5014_v51, %v4691_v49  ;;  %v15204_v1 = vpop.f32.mrb[29].mxu1 }
 0x21e   : > { %v5347_v53 = vpop.f32.mrb[30].mxu1 }
 0x21f   : > { %v5357_v54 = vadd.f32 %v5347_v53, %v5024_v52  ;;  %v15209_v55 = vpop.f32.mrb[31].mxu1 }
 0x22e   : > { %v5680_v4 = vpop.f32.mrb[32].mxu1 }
 0x22f   : > { %v5690_v56 = vadd.f32 %v5680_v4, %v5357_v54  ;;  %v15214_v57 = vpop.f32.mrb[33].mxu1 }
 0x23a   : > { %v6013_v58 = vpop.f32.mrb[34].mxu1 }
 0x23b   : > { %v6023_v59 = vadd.f32 %v6013_v58, %v5690_v56  ;;  %v15219_v60 = vpop.f32.mrb[35].mxu1 }
 0x249   : > { %v6346_v61 = vpop.f32.mrb[36].mxu1 }
 0x24a   : > { %v6356_v6 = vadd.f32 %v6346_v61, %v6023_v59  ;;  %v15224_v63 = vpop.f32.mrb[37].mxu1 }
 0x256   : > { %v6679_v9 = vpop.f32.mrb[38].mxu1 }
 0x257   : > { %v6689_v10 = vadd.f32 %v6679_v9, %v6356_v6  ;;  %v15229_v3 = vpop.f32.mrb[39].mxu1 }
 0x265   : > { %v7012_v7 = vpop.f32.mrb[40].mxu1 }
 0x266   : > { %v7022_v11 = vadd.f32 %v7012_v7, %v6689_v10  ;;  %v15234_v13 = vpop.f32.mrb[41].mxu1 }
 0x272   : > { %v7345_v62 = vpop.f32.mrb[42].mxu1 }
 0x273   : > { %v7355_v14 = vadd.f32 %v7345_v62, %v7022_v11  ;;  %v15239_v8 = vpop.f32.mrb[43].mxu1  ;;  %v17179_v11 = vld [vmem:[%s18635_s3] sm:$0xff] }
 0x274   : > { %v17196_v8 = vld [vmem:[%s18635_s3 + $0x8] sm:$0xff] }
 0x281   : > { %v7678_v15 = vpop.f32.mrb[44].mxu1 }
 0x282   : > { %v7688_v12 = vadd.f32 %v7678_v15, %v7355_v14  ;;  %v15244_v16 = vpop.f32.mrb[45].mxu1 }
 0x28e   : > { %v8011_v17 = vpop.f32.mrb[46].mxu1 }
 0x28f   : > { %v8021_v18 = vadd.f32 %v8011_v17, %v7688_v12  ;;  %v15249_v5 = vpop.f32.mrb[47].mxu1 }
 0x29d   : > { %v8344_v19 = vpop.f32.mrb[48].mxu1 }
 0x29e   : > { %v8354_v20 = vadd.f32 %v8344_v19, %v8021_v18  ;;  %v15254_v21 = vpop.f32.mrb[49].mxu1 }
 0x2a4   : > { %v8464_v22 = vpop.f32.mrb[0].mxu0 }
 0x2a5   : > { %v8466_v24 = vpop.f32.mrb[1].mxu0  ;;  %v8694_v29 = vadd.f32 %v17115_v23, %v8464_v22 }
 0x2a6   : > { %v8535_v25 = vpop.f32.mrb[0].mxu1  ;;  %v8695_v37 = vadd.f32 %v17115_v23, %v8466_v24 }
 0x2a7   : > { %v8696_v26 = vadd.f32 %v17115_v23, %v8535_v25  ;;  %v8537_v27 = vpop.f32.mrb[1].mxu1  ;;  %v8701_v36 = vmax.f32 %v8694_v29, 0.0 }
 0x2a8   : > { %v8697_v35 = vadd.f32 %v17115_v23, %v8537_v27  ;;  %v8702_v39 = vmax.f32 %v8695_v37, 0.0 }
 0x2a9   : > { %v17118_v28 = vmax.f32 %v8696_v26, 0.0 }
 0x2aa   : > { %v8606_v30 = vpop.f32.mrb[2].mxu0  ;;  %v8677_v31 = vpop.f32.mrb[50].mxu1  ;;  %v17132_v38 = vmax.f32 %v8697_v35, 0.0 }
 0x2ab   : > { %v17121_v32 = vadd.f32 %v8677_v31, %v8354_v20  ;;  %v8608_v33 = vpop.f32.mrb[3].mxu0  ;;  %8751 = vrot.lane.b32.xlu0 %v17118_v28, %s15971_s28  ;;  %8719 = vrot.lane.b32.xlu1 %v17118_v28, %s15967_s24  ;;  %v15259_v34 = vpop.f32.mrb[51].mxu1  ;;  %v8698_v40 = vadd.f32 %v17115_v23, %v8606_v30 }
 0x2ac   : > { %v8699_v42 = vadd.f32 %v17115_v23, %v8608_v33 }
 0x2ad   : > { %v17143_v41 = vmax.f32 %v8698_v40, 0.0  ;;  %v8700_v33 = vadd.f32 %v17115_v23, %v17121_v32 }
 0x2ae   : > { %v17153_v43 = vmax.f32 %v8699_v42, 0.0  ;;  %v17361_v42 = vld [vmem:[%s18635_s3 + $0x18] sm:$0xff] }
 0x2af   : > { %8777 = vrot.lane.b32.xlu1 %v17118_v28, %s15972_s29  ;;  %8747 = vrot.lane.b32.xlu0 %v8701_v36, %s15971_s28  ;;  %v8707_v34 = vmax.f32 %v8700_v33, 0.0 }
 0x2b3   : > { %8721 = vrot.lane.b32.xlu0 %v17132_v38, %s15967_s24  ;;  %8715 = vrot.lane.b32.xlu1 %v8701_v36, %s15967_s24 }
 0x2b7   : > { %8775 = vrot.lane.b32.xlu0 %v8702_v39, %s15972_s29  ;;  %8773 = vrot.lane.b32.xlu1 %v8701_v36, %s15972_s29 }
 0x2bb   : > { %8779 = vrot.lane.b32.xlu0 %v17132_v38, %s15972_s29  ;;  %8717 = vrot.lane.b32.xlu1 %v8702_v39, %s15967_s24 }
 0x2bf   : > { %8723 = vrot.lane.b32.xlu0 %v17143_v41, %s15967_s24  ;;  %8749 = vrot.lane.b32.xlu1 %v8702_v39, %s15971_s28 }
 0x2c3   : > { %8755 = vrot.lane.b32.xlu0 %v17143_v41, %s15971_s28  ;;  %8753 = vrot.lane.b32.xlu1 %v17132_v38, %s15971_s28 }
 0x2c7   : > { %8781 = vrot.lane.b32.xlu0 %v17143_v41, %s15972_s29  ;;  %8725 = vrot.lane.b32.xlu1 %v17153_v43, %s15967_s24 }
 0x2cb   : > { %8757 = vrot.lane.b32.xlu1 %v17153_v43, %s15971_s28 }
 0x2cf   : > { %8783 = vrot.lane.b32.xlu1 %v17153_v43, %s15972_s29 }
 0x31d   : > { %v8752_v44 = vpop.permute.xlu0 %8751  ;;  %v8720_v45 = vpop.permute.xlu1 %8719 }
 0x321   : > { %v8778_v46 = vpop.permute.xlu1 %8777  ;;  %v8748_v47 = vpop.permute.xlu0 %8747 }
 0x325   : > { %v8716_v48 = vpop.permute.xlu1 %8715  ;;  %v8722_v2 = vpop.permute.xlu0 %8721 }
 0x326   : > { %v8731_v6 = vsel %vm417_vm0, %v8720_v45, %v8722_v2 }
 0x327   : > { %v8743_v13 = vmax.f32 %v17118_v28, %v8731_v6 }
 0x329   : > { %v8774_v49 = vpop.permute.xlu1 %8773  ;;  %v8776_v50 = vpop.permute.xlu0 %8775 }
 0x32a   : > { %v8788_v54 = vsel %vm2377_vm8, %v8776_v50, %v8778_v46  ;;  %v8787_v55 = vsel %vm2377_vm8, %v8774_v49, %v8776_v50  ;;  %v17389_v50 = vld [vmem:[%s18635_s3 + $0x28] sm:$0xff] }
 0x32d   : > { %v8718_v51 = vpop.permute.xlu1 %8717  ;;  %v8780_v57 = vpop.permute.xlu0 %8779 }
 0x32e   : > { %v8729_v52 = vsel %vm417_vm0, %v8716_v48, %v8718_v51  ;;  %v8730_v1 = vsel %vm417_vm0, %v8718_v51, %v8720_v45  ;;  %v8789_v3 = vsel %vm2377_vm8, %v8778_v46, %v8780_v57 }
 0x32f   : > { %v8741_v58 = vmax.f32 %v8701_v36, %v8729_v52  ;;  %v8742_v59 = vmax.f32 %v8702_v39, %v8730_v1 }
 0x331   : > { %v8750_v53 = vpop.permute.xlu1 %8749  ;;  %v8724_v15 = vpop.permute.xlu0 %8723 }
 0x332   : > { %v8761_v4 = vsel %vm2044_vm7, %v8748_v47, %v8750_v53  ;;  %v8762_v56 = vsel %vm2044_vm7, %v8750_v53, %v8752_v44  ;;  %v8732_v5 = vsel %vm417_vm0, %v8722_v2, %v8724_v15  ;;  %v17369_v47 = vld [vmem:[%s18635_s3 + $0x20] sm:$0xff] }
 0x333   : > { %v8799_v60 = vmax.f32 %v8761_v4, %v8787_v55  ;;  %v8800_v61 = vmax.f32 %v8762_v56, %v8788_v54  ;;  %v8744_v22 = vmax.f32 %v17132_v38, %v8732_v5  ;;  %v17344_v38 = vld [vmem:[%s18635_s3 + $0x10] sm:$0xff] }
 0x334   : > { %v17408_v54 = vld [vmem:[%s18635_s3 + $0x30] sm:$0xff] }
 0x335   : > { %v17170_v63 = vmax.f32 %v8741_v58, %v8799_v60  ;;  %v17172_v9 = vmax.f32 %v8742_v59, %v8800_v61  ;;  %v8754_v10 = vpop.permute.xlu1 %8753  ;;  %v8756_v12 = vpop.permute.xlu0 %8755  ;;  %v17439_v61 = vld [vmem:[%s18635_s3 + $0x40] sm:$0xff] }
 0x336   : > { %v8763_v7 = vsel %vm2044_vm7, %v8752_v44, %v8754_v10  ;;  %v8764_v19 = vsel %vm2044_vm7, %v8754_v10, %v8756_v12 }
 0x337   : > { %v8801_v62 = vmax.f32 %v8763_v7, %v8789_v3  ;;  %8823 = vrot.lane.b32.xlu0 %v17172_v9, %s15968_s25  ;;  %14714 = vmatprep.subr.msk.mxu0 %vm8842_vm1, %v17172_v9  ;;  %v17458_v7 = vld [vmem:[%s18635_s3 + $0x48] sm:$0xff] }
 0x338   : > { %14715 = vmatpush1.msk.msra.mxu0 %vm8842_vm1, %v17170_v63 }
 0x339   : > { %v17188_v14 = vmax.f32 %v8743_v13, %v8801_v62  ;;  %14716 = vmatmul.mubr.msk.f32.vlgmr.msra.gmra.mrb[4].mxu0 %vm8835_vm2, %v17179_v11  ;;  %v8782_v16 = vpop.permute.xlu0 %8781  ;;  %v17225_v17 = vpop.permute.xlu1 %8725 }
 0x33a   : > { %9089 = vmatprep.mubr.f32.mxu0 %v15966_v0  ;;  %v8790_v18 = vsel %vm2377_vm8, %v8780_v57, %v8782_v16  ;;  %v8733_v27 = vsel %vm417_vm0, %v8724_v15, %v17225_v17  ;;  %v17422_v57 = vld [vmem:[%s18635_s3 + $0x38] sm:$0xff]  ;;  %v17471_v15 = vld [vmem:[%s18635_s3 + $0x50] sm:$0xff] }
 0x33b   : > { %8821 = vrot.lane.b32.xlu0 %v17170_v63, %s15968_s25  ;;  %8825 = vrot.lane.b32.xlu1 %v17188_v14, %s15968_s25  ;;  %v8802_v20 = vmax.f32 %v8764_v19, %v8790_v18  ;;  %v8745_v30 = vmax.f32 %v17143_v41, %v8733_v27  ;;  %v17491_v19 = vld [vmem:[%s18635_s3 + $0x58] sm:$0xff] }
 0x33d   : > { %14717 = vmatmul.mubr.msk.f32.gmra.mrb[6].mxu0 %vm8835_vm2, %v17196_v8  ;;  %v17238_v21 = vpop.permute.xlu1 %8757  ;;  %v17245_v24 = vmax.f32 %v8744_v22, %v8802_v20 }
 0x33e   : > { %9268 = vmatprep.mubr.f32.mxu0 %v15966_v0  ;;  %v8765_v28 = vsel %vm2044_vm7, %v8756_v12, %v17238_v21 }
 0x33f   : > { %9180 = vrot.lane.b32.xlu0 %v17188_v14, %s15970_s27  ;;  %9178 = vrot.lane.b32.xlu1 %v17172_v9, %s15970_s27 }
 0x341   : > { %v17247_v25 = vpop.permute.xlu1 %8783 }
 0x342   : > { %v8791_v26 = vsel %vm2377_vm8, %v8782_v16, %v17247_v25 }
 0x343   : > { %9371 = vrot.lane.b32.xlu0 %v17172_v9, %s15993_s19  ;;  %9176 = vrot.lane.b32.xlu1 %v17170_v63, %s15970_s27  ;;  %v8803_v29 = vmax.f32 %v8765_v28, %v8791_v26  ;;  %v17506_v26 = vld [vmem:[%s18635_s3 + $0x60] sm:$0xff] }
 0x345   : > { %v17268_v31 = vmax.f32 %v8745_v30, %v8803_v29  ;;  %v17522_v29 = vld [vmem:[%s18635_s3 + $0x68] sm:$0xff] }
 0x347   : > { %9369 = vrot.lane.b32.xlu0 %v17170_v63, %s15993_s19  ;;  %9373 = vrot.lane.b32.xlu1 %v17188_v14, %s15993_s19 }
 0x34b   : > { %9567 = vrot.lane.b32.xlu0 %v17188_v14, %s15994_s23  ;;  %9565 = vrot.lane.b32.xlu1 %v17172_v9, %s15994_s23 }
 0x34f   : > { %9759 = vrot.lane.b32.xlu0 %v17172_v9, %s15977_s16  ;;  %9563 = vrot.lane.b32.xlu1 %v17170_v63, %s15994_s23 }
 0x353   : > { %9757 = vrot.lane.b32.xlu0 %v17170_v63, %s15977_s16  ;;  %9761 = vrot.lane.b32.xlu1 %v17188_v14, %s15977_s16 }
 0x357   : > { %9954 = vrot.lane.b32.xlu0 %v17188_v14, %s15979_s13  ;;  %9952 = vrot.lane.b32.xlu1 %v17172_v9, %s15979_s13 }
 0x35b   : > { %10145 = vrot.lane.b32.xlu0 %v17172_v9, %s15981_s22  ;;  %9950 = vrot.lane.b32.xlu1 %v17170_v63, %s15979_s13 }
 0x35f   : > { %9182 = vrot.lane.b32.xlu0 %v17245_v24, %s15970_s27  ;;  %10147 = vrot.lane.b32.xlu1 %v17188_v14, %s15981_s22 }
 0x363   : > { %9569 = vrot.lane.b32.xlu0 %v17245_v24, %s15994_s23  ;;  %8827 = vrot.lane.b32.xlu1 %v17245_v24, %s15968_s25 }
 0x367   : > { %9956 = vrot.lane.b32.xlu0 %v17245_v24, %s15979_s13  ;;  %9375 = vrot.lane.b32.xlu1 %v17245_v24, %s15993_s19 }
 0x36b   : > { %9763 = vrot.lane.b32.xlu1 %v17245_v24, %s15977_s16  ;;  %8829 = vrot.lane.b32.xlu0 %v17268_v31, %s15968_s25 }
 0x36f   : > { %10149 = vrot.lane.b32.xlu1 %v17245_v24, %s15981_s22  ;;  %10143 = vrot.lane.b32.xlu0 %v17170_v63, %s15981_s22 }
 0x373   : > { %8727 = vrot.lane.b32.xlu1 %v8707_v34, %s15967_s24  ;;  %8759 = vrot.lane.b32.xlu0 %v8707_v34, %s15971_s28  ;;  %s15997_s24 = smov 10   ;;  %s16006_s28 = smov 28  }
 0x377   : > { %8785 = vrot.lane.b32.xlu1 %v8707_v34, %s15972_s29  ;;  %10338 = vrot.lane.b32.xlu0 %v17172_v9, %s15995_s20  ;;  %s16008_s29 = smov 24  }
 0x37b   : > { %9184 = vrot.lane.b32.xlu1 %v17268_v31, %s15970_s27  ;;  %10336 = vrot.lane.b32.xlu0 %v17170_v63, %s15995_s20 }
 0x37f   : > { %10340 = vrot.lane.b32.xlu1 %v17188_v14, %s15995_s20  ;;  %10534 = vrot.lane.b32.xlu0 %v17188_v14, %s15996_s26 }
 0x383   : > { %10342 = vrot.lane.b32.xlu1 %v17245_v24, %s15995_s20  ;;  %9377 = vrot.lane.b32.xlu0 %v17268_v31, %s15993_s19  ;;  %s16001_s19 = smov 84  }
 0x387   : > { %10532 = vrot.lane.b32.xlu1 %v17172_v9, %s15996_s26  ;;  %10536 = vrot.lane.b32.xlu0 %v17245_v24, %s15996_s26 }
 0x38b   : > { %9571 = vrot.lane.b32.xlu1 %v17268_v31, %s15994_s23  ;;  %10726 = vrot.lane.b32.xlu0 %v17172_v9, %s15987_s14 }
 0x38f   : > { %10530 = vrot.lane.b32.xlu1 %v17170_v63, %s15996_s26  ;;  %10724 = vrot.lane.b32.xlu0 %v17170_v63, %s15987_s14 }
 0x393   : > { %10728 = vrot.lane.b32.xlu1 %v17188_v14, %s15987_s14  ;;  %9765 = vrot.lane.b32.xlu0 %v17268_v31, %s15977_s16 }
 0x397   : > { %10730 = vrot.lane.b32.xlu1 %v17245_v24, %s15987_s14  ;;  %10921 = vrot.lane.b32.xlu0 %v17188_v14, %s15989_s30 }
 0x39b   : > { %9958 = vrot.lane.b32.xlu1 %v17268_v31, %s15979_s13  ;;  %10923 = vrot.lane.b32.xlu0 %v17245_v24, %s15989_s30 }
 0x39f   : > { %10919 = vrot.lane.b32.xlu1 %v17172_v9, %s15989_s30  ;;  %11112 = vrot.lane.b32.xlu0 %v17172_v9, %s15991_s15 }
 0x3a3   : > { %10917 = vrot.lane.b32.xlu1 %v17170_v63, %s15989_s30  ;;  %10151 = vrot.lane.b32.xlu0 %v17268_v31, %s15981_s22  ;;  %s15999_s22 = smov 88  }
 0x3a7   : > { %11114 = vrot.lane.b32.xlu1 %v17188_v14, %s15991_s15  ;;  %11110 = vrot.lane.b32.xlu0 %v17170_v63, %s15991_s15 }
 0x3a9   : > { %v8824_v23 = vpop.permute.xlu0 %8823 }
 0x3ab   : > { %11116 = vrot.lane.b32.xlu1 %v17245_v24, %s15991_s15  ;;  %10344 = vrot.lane.b32.xlu0 %v17268_v31, %s15995_s20 }
 0x3ad   : > { %v8822_v32 = vpop.permute.xlu0 %8821  ;;  %v17332_v35 = vpop.permute.xlu1 %8825 }
 0x3ae   : > { %v8831_v36 = vsel %vm1045_vm4, %v8822_v32, %v8824_v23  ;;  %v8832_v37 = vsel %vm1045_vm4, %v8824_v23, %v17332_v35 }
 0x3af   : > { %11305 = vrot.lane.b32.xlu1 %v17172_v9, %s15997_s24  ;;  %11307 = vrot.lane.b32.xlu0 %v17188_v14, %s15997_s24 }
 0x3b0   : > { %14706 = vmatprep.subr.msk.mxu1 %vm8842_vm1, %v8832_v37 }
 0x3b1   : > { %14707 = vmatpush1.msk.msra.mxu1 %vm8842_vm1, %v8831_v36  ;;  %v17348_v39 = vpop.permute.xlu0 %9180  ;;  %v9179_v40 = vpop.permute.xlu1 %9178 }
 0x3b2   : > { %v9187_v41 = vsel %vm1711_vm6, %v9179_v40, %v17348_v39  ;;  %14708 = vmatmul.mubr.msk.f32.vlgmr.msra.gmra.mrb[52].mxu1 %vm8835_vm2, %v17344_v38 }
 0x3b3   : > { %10538 = vrot.lane.b32.xlu1 %v17268_v31, %s15996_s26  ;;  %11309 = vrot.lane.b32.xlu0 %v17245_v24, %s15997_s24  ;;  %s18644_s26 = smov 8  }
 0x3b4   : > { %14724 = vmatprep.subr.msk.mxu0 %vm8842_vm1, %v9187_v41  ;;  %8921 = vmatprep.mubr.f32.mxu1 %v15966_v0 }
 0x3b5   : > { %v9372_v44 = vpop.permute.xlu0 %9371  ;;  %v9177_v45 = vpop.permute.xlu1 %9176 }
 0x3b6   : > { %v9186_v46 = vsel %vm1711_vm6, %v9177_v45, %v9179_v40  ;;  %14709 = vmatmul.mubr.msk.f32.gmra.mrb[54].mxu1 %vm8835_vm2, %v17361_v42  ;;  %v17552_v40 = vld [vmem:[%s18635_s3 + $0x70] sm:$0xff] }
 0x3b7   : > { %11303 = vrot.lane.b32.xlu1 %v17170_v63, %s15997_s24  ;;  %11499 = vrot.lane.b32.xlu0 %v17172_v9, %s18644_s26 }
 0x3b8   : > { %14725 = vmatpush1.msk.msra.mxu0 %vm8842_vm1, %v9186_v46  ;;  %8992 = vmatprep.mubr.f32.mxu1 %v15966_v0 }
 0x3b9   : > { %14726 = vmatmul.mubr.msk.f32.vlgmr.msra.gmra.mrb[4].mxu0 %vm8835_vm2, %v17369_v47  ;;  %v9370_v48 = vpop.permute.xlu0 %9369  ;;  %v17381_v2 = vpop.permute.xlu1 %9373 }
 0x3ba   : > { %9274 = vmatprep.mubr.f32.mxu0 %v15966_v0  ;;  %v9381_v49 = vsel %vm9379_vm10, %v9372_v44, %v17381_v2  ;;  %v9380_v51 = vsel %vm9379_vm10, %v9370_v48, %v9372_v44 }
 0x3bb   : > { %11501 = vrot.lane.b32.xlu1 %v17188_v14, %s18644_s26  ;;  %10732 = vrot.lane.b32.xlu0 %v17268_v31, %s15987_s14 }
 0x3bc   : > { %14734 = vmatprep.subr.msk.mxu0 %vm8842_vm1, %v9381_v49 }
 0x3bd   : > { %14727 = vmatmul.mubr.msk.f32.gmra.mrb[6].mxu0 %vm8835_vm2, %v17389_v50  ;;  %v17399_v52 = vpop.permute.xlu0 %9567  ;;  %v9566_v1 = vpop.permute.xlu1 %9565 }
 0x3be   : > { %14735 = vmatpush1.msk.msra.mxu0 %vm8842_vm1, %v9380_v51  ;;  %9462 = vmatprep.mubr.f32.mxu0 %v15966_v0  ;;  %v9575_v53 = vsel %vm9573_vm13, %v9566_v1, %v17399_v52 }
 0x3bf   : > { %11503 = vrot.lane.b32.xlu1 %v17245_v24, %s18644_s26  ;;  %11497 = vrot.lane.b32.xlu0 %v17170_v63, %s18644_s26 }
 0x3c0   : > { %14744 = vmatprep.subr.msk.mxu0 %vm8842_vm1, %v9575_v53 }
 0x3c1   : > { %14736 = vmatmul.mubr.msk.f32.vlgmr.msra.gmra.mrb[4].mxu0 %vm8835_vm2, %v17408_v54  ;;  %v9760_v55 = vpop.permute.xlu0 %9759  ;;  %v9564_v4 = vpop.permute.xlu1 %9563 }
 0x3c2   : > { %v9574_v56 = vsel %vm9573_vm13, %v9564_v4, %v9566_v1  ;;  %9468 = vmatprep.mubr.f32.mxu0 %v15966_v0 }
 0x3c3   : > { %10925 = vrot.lane.b32.xlu1 %v17268_v31, %s15989_s30  ;;  %11696 = vrot.lane.b32.xlu0 %v17245_v24, %s15999_s22  ;;  %s16000_s30 = smov 86  }
 0x3c4   : > { %14745 = vmatpush1.msk.msra.mxu0 %vm8842_vm1, %v9574_v56 }
 0x3c5   : > { %14737 = vmatmul.mubr.msk.f32.gmra.mrb[6].mxu0 %vm8835_vm2, %v17422_v57  ;;  %v9758_v58 = vpop.permute.xlu0 %9757  ;;  %v17431_v59 = vpop.permute.xlu1 %9761 }
 0x3c6   : > { %9656 = vmatprep.mubr.f32.mxu0 %v15966_v0  ;;  %v9768_v60 = vsel %vm3709_vm12, %v9760_v55, %v17431_v59  ;;  %v9767_v6 = vsel %vm3709_vm12, %v9758_v58, %v9760_v55  ;;  %v17638_v58 = vld [vmem:[%s18635_s3 + $0x88] sm:$0xff] }
 0x3c7   : > { %11694 = vrot.lane.b32.xlu1 %v17188_v14, %s15999_s22  ;;  %11888 = vrot.lane.b32.xlu0 %v17188_v14, %s16000_s30 }
 0x3c8   : > { %14754 = vmatprep.subr.msk.mxu0 %vm8842_vm1, %v9768_v60 }
 0x3c9   : > { %14746 = vmatmul.mubr.msk.f32.vlgmr.msra.gmra.mrb[4].mxu0 %vm8835_vm2, %v17439_v61  ;;  %v17449_v63 = vpop.permute.xlu0 %9954  ;;  %v9953_v10 = vpop.permute.xlu1 %9952 }
 0x3ca   : > { %14755 = vmatpush1.msk.msra.mxu0 %vm8842_vm1, %v9767_v6  ;;  %9662 = vmatprep.mubr.f32.mxu0 %v15966_v0  ;;  %v9961_v3 = vsel %vm4375_vm14, %v9953_v10, %v17449_v63 }
 0x3cb   : > { %11692 = vrot.lane.b32.xlu1 %v17172_v9, %s15999_s22  ;;  %11118 = vrot.lane.b32.xlu0 %v17268_v31, %s15991_s15 }
 0x3cc   : > { %14764 = vmatprep.subr.msk.mxu0 %vm8842_vm1, %v9961_v3 }
 0x3cd   : > { %14747 = vmatmul.mubr.msk.f32.gmra.mrb[6].mxu0 %vm8835_vm2, %v17458_v7  ;;  %v10146_v13 = vpop.permute.xlu0 %10145  ;;  %v9951_v62 = vpop.permute.xlu1 %9950 }
 0x3ce   : > { %9849 = vmatprep.mubr.f32.mxu0 %v15966_v0  ;;  %v9960_v12 = vsel %vm4375_vm14, %v9951_v62, %v9953_v10 }
 0x3cf   : > { %11890 = vrot.lane.b32.xlu1 %v17245_v24, %s16000_s30  ;;  %11886 = vrot.lane.b32.xlu0 %v17172_v9, %s16000_s30 }
 0x3d1   : > { %14756 = vmatmul.mubr.msk.f32.vlgmr.msra.gmra.mrb[4].mxu0 %vm8835_vm2, %v17471_v15  ;;  %v17480_v16 = vpop.permute.xlu0 %9182  ;;  %v17482_v18 = vpop.permute.xlu1 %10147 }
 0x3d2   : > { %14765 = vmatpush1.msk.msra.mxu0 %vm8842_vm1, %v9960_v12  ;;  %v10154_v5 = vsel %vm5041_vm5, %v10146_v13, %v17482_v18  ;;  %9855 = vmatprep.mubr.f32.mxu0 %v15966_v0 }
 0x3d3   : > { %11311 = vrot.lane.b32.xlu1 %v17268_v31, %s15997_s24  ;;  %12084 = vrot.lane.b32.xlu0 %v17245_v24, %s16001_s19  ;;  %s16002_s24 = smov 82  }
 0x3d4   : > { %14774 = vmatprep.subr.msk.mxu0 %vm8842_vm1, %v10154_v5 }
 0x3d5   : > { %v17498_v20 = vpop.permute.xlu0 %9569  ;;  %v8828_v22 = vpop.permute.xlu1 %8827  ;;  %14757 = vmatmul.mubr.msk.f32.gmra.mrb[6].mxu0 %vm8835_vm2, %v17491_v19 }
 0x3d6   : > { %10042 = vmatprep.mubr.f32.mxu0 %v15966_v0  ;;  %v8833_v23 = vsel %vm1045_vm4, %v17332_v35, %v8828_v22 }
 0x3d7   : > { %12082 = vrot.lane.b32.xlu1 %v17188_v14, %s16001_s19  ;;  %12276 = vrot.lane.b32.xlu0 %v17188_v14, %s16002_s24 }
 0x3d9   : > { %v17512_v27 = vpop.permute.xlu0 %9956  ;;  %v17514_v28 = vpop.permute.xlu1 %9375  ;;  %14766 = vmatmul.mubr.msk.f32.vlgmr.msra.gmra.mrb[4].mxu0 %vm8835_vm2, %v17506_v26 }
 0x3da   : > { %10048 = vmatprep.mubr.f32.mxu0 %v15966_v0  ;;  %v9382_v60 = vsel %vm9379_vm10, %v17381_v2, %v17514_v28 }
 0x3db   : > { %12080 = vrot.lane.b32.xlu1 %v17172_v9, %s16001_s19  ;;  %11505 = vrot.lane.b32.xlu0 %v17268_v31, %s18644_s26 }
 0x3dd   : > { %v8830_v30 = vpop.permute.xlu0 %8829  ;;  %v17528_v33 = vpop.permute.xlu1 %9763  ;;  %14767 = vmatmul.mubr.msk.f32.gmra.mrb[6].mxu0 %vm8835_vm2, %v17522_v29 }
 0x3de   : > { %v8834_v34 = vsel %vm1045_vm4, %v8828_v22, %v8830_v30  ;;  %10235 = vmatprep.mubr.f32.mxu0 %v15966_v0  ;;  %v17708_v22 = vld [vmem:[%s18635_s3 + $0x98] sm:$0xff] }
 0x3df   : > { %11892 = vrot.lane.b32.xlu1 %v17268_v31, %s16000_s30  ;;  %11698 = vrot.lane.b32.xlu0 %v17268_v31, %s15999_s22 }
 0x3e0   : > { %14710 = vmatprep.subr.msk.mxu1 %vm8842_vm1, %v8834_v34 }
 0x3e1   : > { %14711 = vmatpush1.msk.msra.mxu1 %vm8842_vm1, %v8833_v23  ;;  %v10144_v32 = vpop.permute.xlu0 %10143  ;;  %v17542_v36 = vpop.permute.xlu1 %10149 }
 0x3e2   : > { %v10153_v37 = vsel %vm5041_vm5, %v10144_v32, %v10146_v13  ;;  %14718 = vmatprep.subr.msk.mxu1 %vm8842_vm1, %v17245_v24  ;;  %14712 = vmatmul.mubr.msk.f32.vlgmr.msra.gmra.mrb[56].mxu1 %vm8835_vm2, %v17344_v38  ;;  %v17568_v38 = vld [vmem:[%s18635_s3 + $0x78] sm:$0xff]  ;;  %v9576_v13 = vsel %vm9573_vm13, %v17399_v52, %v17498_v20 }
 0x3e3   : > { %14719 = vmatpush1.msk.msra.mxu1 %vm8842_vm1, %v17188_v14  ;;  %12086 = vrot.lane.b32.xlu0 %v17268_v31, %s16001_s19 }
 0x3e4   : > { %14775 = vmatpush1.msk.msra.mxu0 %vm8842_vm1, %v10153_v37  ;;  %8998 = vmatprep.mubr.f32.mxu1 %v15966_v0 }
 0x3e5   : > { %v8760_v35 = vpop.permute.xlu0 %8759  ;;  %v8728_v41 = vpop.permute.xlu1 %8727  ;;  %14776 = vmatmul.mubr.msk.f32.vlgmr.msra.gmra.mrb[4].mxu0 %vm8835_vm2, %v17552_v40 }
 0x3e6   : > { %14713 = vmatmul.mubr.msk.f32.gmra.mrb[58].mxu1 %vm8835_vm2, %v17361_v42  ;;  %10241 = vmatprep.mubr.f32.mxu0 %v15966_v0  ;;  %v8734_v44 = vsel %vm417_vm0, %v17225_v17, %v8728_v41  ;;  %v8766_v42 = vsel %vm2044_vm7, %v17238_v21, %v8760_v35  ;;  %vm10346_vm0 = vcmask 539648   ;;  %vm11313_vm7 = vcmask 80896  }
 0x3e7   : > { %12274 = vrot.lane.b32.xlu0 %v17172_v9, %s16002_s24  ;;  %9160 = vmatprep.mubr.f32.mxu1 %v15966_v0  ;;  %v8746_v49 = vmax.f32 %v17153_v43, %v8734_v44  ;;  %v9188_v43 = vsel %vm1711_vm6, %v17348_v39, %v17480_v16  ;;  %v17617_v39 = vld [vmem:[%s18635_s3 + $0x80] sm:$0xff] }
 0x3e9   : > { %v10339_v45 = vpop.permute.xlu0 %10338  ;;  %v8786_v46 = vpop.permute.xlu1 %8785  ;;  %14777 = vmatmul.mubr.msk.f32.gmra.mrb[6].mxu0 %vm8835_vm2, %v17568_v38 }
 0x3ea   : > { %v8792_v48 = vsel %vm2377_vm8, %v17247_v25, %v8786_v46  ;;  %14720 = vmatmul.mubr.msk.f32.vlgmr.msra.gmra.mrb[56].mxu1 %vm8835_vm2, %v17179_v11  ;;  %10429 = vmatprep.mubr.f32.mxu0 %v15966_v0  ;;  %v17781_v46 = vld [vmem:[%s18635_s3 + $0xb0] sm:$0xff]  ;;  %vm11507_vm8 = vcmask 64512  }
 0x3eb   : > { %v8804_v51 = vmax.f32 %v8766_v42, %v8792_v48  ;;  %9166 = vmatprep.mubr.f32.mxu1 %v15966_v0 }
 0x3ed   : > { %v17586_v17 = vmax.f32 %v8746_v49, %v8804_v51  ;;  %v10337_v1 = vpop.permute.xlu0 %10336  ;;  %v9185_v53 = vpop.permute.xlu1 %9184 }
 0x3ee   : > { %v9189_v21 = vsel %vm1711_vm6, %v17480_v16, %v9185_v53  ;;  %14721 = vmatmul.mubr.msk.f32.gmra.mrb[58].mxu1 %vm8835_vm2, %v17196_v8  ;;  %v10347_v55 = vsel %vm10346_vm0, %v10337_v1, %v10339_v45  ;;  %vm10540_vm6 = vcmask 523264   ;;  %v17682_v16 = vld [vmem:[%s18635_s3 + $0x90] sm:$0xff]  ;;  %v17830_v53 = vld [vmem:[%s18635_s3 + $0xc0] sm:$0xff] }
 0x3ef   : > { %11894 = vrot.lane.b32.xlu0 %v17586_v17, %s16000_s30  ;;  %11700 = vrot.lane.b32.xlu1 %v17586_v17, %s15999_s22  ;;  %s16003_s22 = smov 80   ;;  %s16004_s30 = smov 32  }
 0x3f0   : > { %14728 = vmatprep.subr.msk.mxu1 %vm8842_vm1, %v9189_v21  ;;  %9345 = vmatprep.mubr.f32.mxu1 %v15966_v0 }
 0x3f1   : > { %14729 = vmatpush1.msk.msra.mxu1 %vm8842_vm1, %v9188_v43  ;;  %v17602_v11 = vpop.permute.xlu0 %10534  ;;  %v17604_v8 = vpop.permute.xlu1 %10340 }
 0x3f2   : > { %v10348_v25 = vsel %vm10346_vm0, %v10339_v45, %v17604_v8  ;;  %14730 = vmatmul.mubr.msk.f32.vlgmr.msra.gmra.mrb[56].mxu1 %vm8835_vm2, %v17369_v47 }
 0x3f3   : > { %12472 = vrot.lane.b32.xlu0 %v17245_v24, %s16003_s22  ;;  %12278 = vrot.lane.b32.xlu1 %v17245_v24, %s16002_s24 }
 0x3f4   : > { %14784 = vmatprep.subr.msk.mxu0 %vm8842_vm1, %v10348_v25  ;;  %9351 = vmatprep.mubr.f32.mxu1 %v15966_v0 }
 0x3f5   : > { %14785 = vmatpush1.msk.msra.mxu0 %vm8842_vm1, %v10347_v55  ;;  %v9378_v47 = vpop.permute.xlu0 %9377  ;;  %v17623_v4 = vpop.permute.xlu1 %10342 }
 0x3f6   : > { %v9383_v56 = vsel %vm9379_vm10, %v17514_v28, %v9378_v47  ;;  %14731 = vmatmul.mubr.msk.f32.gmra.mrb[58].mxu1 %vm8835_vm2, %v17389_v50  ;;  %14786 = vmatmul.mubr.msk.f32.vlgmr.msra.gmra.mrb[4].mxu0 %vm8835_vm2, %v17617_v39  ;;  %v9769_v28 = vsel %vm3709_vm12, %v17431_v59, %v17528_v33  ;;  %v17732_v59 = vld [vmem:[%s18635_s3 + $0xa0] sm:$0xff]  ;;  %v10349_v21 = vsel %vm10346_vm0, %v17604_v8, %v17623_v4  ;;  %v17854_v8 = vld [vmem:[%s18635_s3 + $0xc8] sm:$0xff]  ;;  %vm12478_vm10 = vcmask 654336  }
 0x3f7   : > { %12474 = vrot.lane.b32.xlu0 %v17268_v31, %s16003_s22  ;;  %12280 = vrot.lane.b32.xlu1 %v17268_v31, %s16002_s24 }
 0x3f8   : > { %14738 = vmatprep.subr.msk.mxu1 %vm8842_vm1, %v9383_v56  ;;  %9539 = vmatprep.mubr.f32.mxu1 %v15966_v0 }
 0x3f9   : > { %14739 = vmatpush1.msk.msra.mxu1 %vm8842_vm1, %v9382_v60  ;;  %v17646_v50 = vpop.permute.xlu0 %10536  ;;  %v10533_v6 = vpop.permute.xlu1 %10532  ;;  %10435 = vmatprep.mubr.f32.mxu0 %v15966_v0 }
 0x3fa   : > { %v10542_v10 = vsel %vm10540_vm6, %v10533_v6, %v17602_v11  ;;  %14740 = vmatmul.mubr.msk.f32.vlgmr.msra.gmra.mrb[56].mxu1 %vm8835_vm2, %v17408_v54  ;;  %14787 = vmatmul.mubr.msk.f32.gmra.mrb[6].mxu0 %vm8835_vm2, %v17638_v58 }
 0x3fb   : > { %12664 = vrot.lane.b32.xlu0 %v17188_v14, %s16004_s30  ;;  %12470 = vrot.lane.b32.xlu1 %v17188_v14, %s16003_s22 }
 0x3fc   : > { %14794 = vmatprep.subr.msk.mxu0 %vm8842_vm1, %v10542_v10  ;;  %9545 = vmatprep.mubr.f32.mxu1 %v15966_v0 }
 0x3fd   : > { %v10727_v2 = vpop.permute.xlu0 %10726  ;;  %v9572_v3 = vpop.permute.xlu1 %9571  ;;  %10623 = vmatprep.mubr.f32.mxu0 %v15966_v0 }
 0x3fe   : > { %v9577_v54 = vsel %vm9573_vm13, %v17498_v20, %v9572_v3  ;;  %14741 = vmatmul.mubr.msk.f32.gmra.mrb[58].mxu1 %vm8835_vm2, %v17422_v57 }
 0x3ff   : > { %12282 = vrot.lane.b32.xlu0 %v17586_v17, %s16002_s24  ;;  %12088 = vrot.lane.b32.xlu1 %v17586_v17, %s16001_s19  ;;  %s16005_s19 = smov 30  }
 0x400   : > { %14748 = vmatprep.subr.msk.mxu1 %vm8842_vm1, %v9577_v54  ;;  %9733 = vmatprep.mubr.f32.mxu1 %v15966_v0 }
 0x401   : > { %14749 = vmatpush1.msk.msra.mxu1 %vm8842_vm1, %v9576_v13  ;;  %v10725_v62 = vpop.permute.xlu0 %10724  ;;  %v10531_v12 = vpop.permute.xlu1 %10530  ;;  %v17934_v13 = vld [vmem:[%s18635_s3 + $0xe0] sm:$0xff] }
 0x402   : > { %v10541_v57 = vsel %vm10540_vm6, %v10531_v12, %v10533_v6  ;;  %14750 = vmatmul.mubr.msk.f32.vlgmr.msra.gmra.mrb[56].mxu1 %vm8835_vm2, %v17439_v61 }
 0x403   : > { %12662 = vrot.lane.b32.xlu0 %v17172_v9, %s16004_s30  ;;  %12468 = vrot.lane.b32.xlu1 %v17172_v9, %s16003_s22 }
 0x404   : > { %14795 = vmatpush1.msk.msra.mxu0 %vm8842_vm1, %v10541_v57  ;;  %9739 = vmatprep.mubr.f32.mxu1 %v15966_v0 }
 0x405   : > { %v9766_v52 = vpop.permute.xlu0 %9765  ;;  %v17690_v5 = vpop.permute.xlu1 %10728  ;;  %14796 = vmatmul.mubr.msk.f32.vlgmr.msra.gmra.mrb[4].mxu0 %vm8835_vm2, %v17682_v16 }
 0x406   : > { %v9770_v61 = vsel %vm3709_vm12, %v17528_v33, %v9766_v52  ;;  %v10735_v20 = vsel %vm7039_vm9, %v10727_v2, %v17690_v5  ;;  %14751 = vmatmul.mubr.msk.f32.gmra.mrb[58].mxu1 %vm8835_vm2, %v17458_v7  ;;  %10629 = vmatprep.mubr.f32.mxu0 %v15966_v0  ;;  %v10734_v7 = vsel %vm7039_vm9, %v10725_v62, %v10727_v2  ;;  %v13630_v2 = vld [vmem:[%s18636_s4 + $0x8] sm:$0xff] }
 0x407   : > { %12860 = vrot.lane.b32.xlu0 %v17245_v24, %s16005_s19  ;;  %12666 = vrot.lane.b32.xlu1 %v17245_v24, %s16004_s30 }
 0x408   : > { %14758 = vmatprep.subr.msk.mxu1 %vm8842_vm1, %v9770_v61  ;;  %14804 = vmatprep.subr.msk.mxu0 %vm8842_vm1, %v10735_v20 }
 0x409   : > { %14759 = vmatpush1.msk.msra.mxu1 %vm8842_vm1, %v9769_v28  ;;  %14805 = vmatpush1.msk.msra.mxu0 %vm8842_vm1, %v10734_v7  ;;  %v17718_v30 = vpop.permute.xlu0 %10921  ;;  %v17720_v34 = vpop.permute.xlu1 %10730 }
 0x40a   : > { %9926 = vmatprep.mubr.f32.mxu1 %v15966_v0  ;;  %14797 = vmatmul.mubr.msk.f32.gmra.mrb[6].mxu0 %vm8835_vm2, %v17708_v22  ;;  %v10736_v10 = vsel %vm7039_vm9, %v17690_v5, %v17720_v34 }
 0x40b   : > { %12862 = vrot.lane.b32.xlu0 %v17268_v31, %s16005_s19  ;;  %12668 = vrot.lane.b32.xlu1 %v17268_v31, %s16004_s30 }
 0x40c   : > { %14760 = vmatmul.mubr.msk.f32.vlgmr.msra.gmra.mrb[56].mxu1 %vm8835_vm2, %v17471_v15  ;;  %10816 = vmatprep.mubr.f32.mxu0 %v15966_v0  ;;  %v9962_v15 = vsel %vm4375_vm14, %v17449_v63, %v17512_v27  ;;  %v17762_v63 = vld [vmem:[%s18635_s3 + $0xa8] sm:$0xff] }
 0x40d   : > { %v17737_v33 = vpop.permute.xlu0 %10923  ;;  %v9959_v23 = vpop.permute.xlu1 %9958  ;;  %9932 = vmatprep.mubr.f32.mxu1 %v15966_v0 }
 0x40e   : > { %v9963_v32 = vsel %vm4375_vm14, %v17512_v27, %v9959_v23  ;;  %14806 = vmatmul.mubr.msk.f32.vlgmr.msra.gmra.mrb[4].mxu0 %vm8835_vm2, %v17732_v59 }
 0x40f   : > { %12670 = vrot.lane.b32.xlu0 %v17586_v17, %s16004_s30  ;;  %12476 = vrot.lane.b32.xlu1 %v17586_v17, %s16003_s22  ;;  %s16007_s22 = smov 26  }
 0x410   : > { %14768 = vmatprep.subr.msk.mxu1 %vm8842_vm1, %v9963_v32  ;;  %14761 = vmatmul.mubr.msk.f32.gmra.mrb[58].mxu1 %vm8835_vm2, %v17491_v19 }
 0x411   : > { %14769 = vmatpush1.msk.msra.mxu1 %vm8842_vm1, %v9962_v15  ;;  %v11113_v37 = vpop.permute.xlu0 %11112  ;;  %v10920_v35 = vpop.permute.xlu1 %10919  ;;  %10119 = vmatprep.mubr.f32.mxu1 %v15966_v0  ;;  %v18003_v15 = vld [vmem:[%s18635_s3 + $0xf8] sm:$0xff] }
 0x412   : > { %v10928_v41 = vsel %vm7705_vm11, %v10920_v35, %v17718_v30  ;;  %10822 = vmatprep.mubr.f32.mxu0 %v15966_v0 }
 0x413   : > { %13052 = vrot.lane.b32.xlu0 %v17188_v14, %s16006_s28  ;;  %12858 = vrot.lane.b32.xlu1 %v17188_v14, %s16005_s19 }
 0x414   : > { %14814 = vmatprep.subr.msk.mxu0 %vm8842_vm1, %v10928_v41  ;;  %14770 = vmatmul.mubr.msk.f32.vlgmr.msra.gmra.mrb[56].mxu1 %vm8835_vm2, %v17506_v26  ;;  %v10155_v26 = vsel %vm5041_vm5, %v17482_v18, %v17542_v36  ;;  %v17810_v18 = vld [vmem:[%s18635_s3 + $0xb8] sm:$0xff] }
 0x415   : > { %v10152_v19 = vpop.permute.xlu0 %10151  ;;  %v10918_v27 = vpop.permute.xlu1 %10917  ;;  %14807 = vmatmul.mubr.msk.f32.gmra.mrb[6].mxu0 %vm8835_vm2, %v17762_v63  ;;  %10125 = vmatprep.mubr.f32.mxu1 %v15966_v0 }
 0x416   : > { %v10156_v44 = vsel %vm5041_vm5, %v17542_v36, %v10152_v19  ;;  %v10927_v45 = vsel %vm7705_vm11, %v10918_v27, %v10920_v35  ;;  %11009 = vmatprep.mubr.f32.mxu0 %v15966_v0  ;;  %vm11702_vm5 = vcmask 719872  }
 0x417   : > { %13050 = vrot.lane.b32.xlu0 %v17172_v9, %s16006_s28  ;;  %12856 = vrot.lane.b32.xlu1 %v17172_v9, %s16005_s19 }
 0x418   : > { %14778 = vmatprep.subr.msk.mxu1 %vm8842_vm1, %v10156_v44  ;;  %14815 = vmatpush1.msk.msra.mxu0 %vm8842_vm1, %v10927_v45 }
 0x419   : > { %14779 = vmatpush1.msk.msra.mxu1 %vm8842_vm1, %v10155_v26  ;;  %v11111_v42 = vpop.permute.xlu0 %11110  ;;  %v17793_v48 = vpop.permute.xlu1 %11114  ;;  %14816 = vmatmul.mubr.msk.f32.vlgmr.msra.gmra.mrb[4].mxu0 %vm8835_vm2, %v17781_v46 }
 0x41a   : > { %v11120_v49 = vsel %vm8371_vm15, %v11111_v42, %v11113_v37  ;;  %v11121_v51 = vsel %vm8371_vm15, %v11113_v37, %v17793_v48  ;;  %14771 = vmatmul.mubr.msk.f32.gmra.mrb[58].mxu1 %vm8835_vm2, %v17522_v29  ;;  %11015 = vmatprep.mubr.f32.mxu0 %v15966_v0 }
 0x41b   : > { %13248 = vrot.lane.b32.xlu0 %v17245_v24, %s16007_s22  ;;  %13054 = vrot.lane.b32.xlu1 %v17245_v24, %s16006_s28 }
 0x41c   : > { %14824 = vmatprep.subr.msk.mxu0 %vm8842_vm1, %v11121_v51  ;;  %10312 = vmatprep.mubr.f32.mxu1 %v15966_v0  ;;  %v18053_v51 = vld [vmem:[%s18635_s3 + $0x110] sm:$0xff] }
 0x41d   : > { %14825 = vmatpush1.msk.msra.mxu0 %vm8842_vm1, %v11120_v49  ;;  %v10345_v29 = vpop.permute.xlu0 %10344  ;;  %v17815_v36 = vpop.permute.xlu1 %11116 }
 0x41e   : > { %v10350_v1 = vsel %vm10346_vm0, %v17623_v4, %v10345_v29  ;;  %14780 = vmatmul.mubr.msk.f32.vlgmr.msra.gmra.mrb[56].mxu1 %vm8835_vm2, %v17552_v40  ;;  %14817 = vmatmul.mubr.msk.f32.gmra.mrb[6].mxu0 %vm8835_vm2, %v17810_v18  ;;  %v10543_v4 = vsel %vm10540_vm6, %v17602_v11, %v17646_v50  ;;  %vm12672_vm0 = vcmask 261120  }
 0x41f   : > { %13058 = vrot.lane.b32.xlu0 %v17586_v17, %s16006_s28  ;;  %12864 = vrot.lane.b32.xlu1 %v17586_v17, %s16005_s19 }
 0x420   : > { %14788 = vmatprep.subr.msk.mxu1 %vm8842_vm1, %v10350_v1  ;;  %10318 = vmatprep.mubr.f32.mxu1 %v15966_v0 }
 0x421   : > { %14789 = vmatpush1.msk.msra.mxu1 %vm8842_vm1, %v10349_v21  ;;  %v17838_v40 = vpop.permute.xlu0 %11307  ;;  %v11306_v43 = vpop.permute.xlu1 %11305  ;;  %11202 = vmatprep.mubr.f32.mxu0 %v15966_v0 }
 0x422   : > { %v11315_v25 = vsel %vm11313_vm7, %v11306_v43, %v17838_v40  ;;  %14781 = vmatmul.mubr.msk.f32.gmra.mrb[58].mxu1 %vm8835_vm2, %v17568_v38  ;;  %14826 = vmatmul.mubr.msk.f32.vlgmr.msra.gmra.mrb[4].mxu0 %vm8835_vm2, %v17830_v53 }
 0x423   : > { %13250 = vrot.lane.b32.xlu0 %v17268_v31, %s16007_s22  ;;  %13056 = vrot.lane.b32.xlu1 %v17268_v31, %s16006_s28 }
 0x424   : > { %14834 = vmatprep.subr.msk.mxu0 %vm8842_vm1, %v11315_v25  ;;  %10506 = vmatprep.mubr.f32.mxu1 %v15966_v0 }
 0x425   : > { %v17858_v55 = vpop.permute.xlu0 %11309  ;;  %v10539_v38 = vpop.permute.xlu1 %10538  ;;  %11208 = vmatprep.mubr.f32.mxu0 %v15966_v0 }
 0x426   : > { %v10544_v47 = vsel %vm10540_vm6, %v17646_v50, %v10539_v38  ;;  %14790 = vmatmul.mubr.msk.f32.vlgmr.msra.gmra.mrb[56].mxu1 %vm8835_vm2, %v17617_v39  ;;  %14827 = vmatmul.mubr.msk.f32.gmra.mrb[6].mxu0 %vm8835_vm2, %v17854_v8  ;;  %v11316_v19 = vsel %vm11313_vm7, %v17838_v40, %v17858_v55  ;;  %vm12866_vm6 = vcmask 244736  }
 0x427   : > { %13440 = vrot.lane.b32.xlu0 %v17188_v14, %s16008_s29  ;;  %13246 = vrot.lane.b32.xlu1 %v17188_v14, %s16007_s22  ;;  %v17884_v14 = vld [vmem:[%s18635_s3 + $0xd0] sm:$0xff] }
 0x428   : > { %14798 = vmatprep.subr.msk.mxu1 %vm8842_vm1, %v10544_v47  ;;  %10512 = vmatprep.mubr.f32.mxu1 %v15966_v0 }
 0x429   : > { %14799 = vmatpush1.msk.msra.mxu1 %vm8842_vm1, %v10543_v4  ;;  %v11500_v39 = vpop.permute.xlu0 %11499  ;;  %v11304_v56 = vpop.permute.xlu1 %11303  ;;  %11396 = vmatprep.mubr.f32.mxu0 %v15966_v0 }
 0x42a   : > { %v11314_v60 = vsel %vm11313_vm7, %v11304_v56, %v11306_v43  ;;  %14791 = vmatmul.mubr.msk.f32.gmra.mrb[58].mxu1 %vm8835_vm2, %v17638_v58  ;;  %v14882_v56 = vld [vmem:[%s18635_s3 + $0x120] sm:$0xff] }
 0x42b   : > { %13438 = vrot.lane.b32.xlu0 %v17172_v9, %s16008_s29  ;;  %13244 = vrot.lane.b32.xlu1 %v17172_v9, %s16007_s22  ;;  %v17910_v9 = vld [vmem:[%s18635_s3 + $0xd8] sm:$0xff] }
 0x42c   : > { %14835 = vmatpush1.msk.msra.mxu0 %vm8842_vm1, %v11314_v60  ;;  %10700 = vmatprep.mubr.f32.mxu1 %v15966_v0 }
 0x42d   : > { %v10733_v11 = vpop.permute.xlu0 %10732  ;;  %v17892_v50 = vpop.permute.xlu1 %11501  ;;  %14836 = vmatmul.mubr.msk.f32.vlgmr.msra.gmra.mrb[4].mxu0 %vm8835_vm2, %v17884_v14 }
 0x42e   : > { %v10737_v58 = vsel %vm7039_vm9, %v17720_v34, %v10733_v11  ;;  %v11509_v6 = vsel %vm11507_vm8, %v11500_v39, %v17892_v50  ;;  %14800 = vmatmul.mubr.msk.f32.vlgmr.msra.gmra.mrb[56].mxu1 %vm8835_vm2, %v17682_v16  ;;  %11402 = vmatprep.mubr.f32.mxu0 %v15966_v0  ;;  %v17956_v16 = vld [vmem:[%s18635_s3 + $0xe8] sm:$0xff]  ;;  %v11122_v34 = vsel %vm8371_vm15, %v17793_v48, %v17815_v36  ;;  %vm11896_vm9 = vcmask 703488  }
 0x42f   : > { %13446 = vrot.lane.b32.xlu0 %v17586_v17, %s16008_s29  ;;  %13252 = vrot.lane.b32.xlu1 %v17586_v17, %s16007_s22 }
 0x430   : > { %14808 = vmatprep.subr.msk.mxu1 %vm8842_vm1, %v10737_v58  ;;  %14844 = vmatprep.subr.msk.mxu0 %vm8842_vm1, %v11509_v6 }
 0x431   : > { %14809 = vmatpush1.msk.msra.mxu1 %vm8842_vm1, %v10736_v10  ;;  %v11498_v17 = vpop.permute.xlu0 %11497  ;;  %v17921_v3 = vpop.permute.xlu1 %11503  ;;  %10706 = vmatprep.mubr.f32.mxu1 %v15966_v0 }
 0x432   : > { %v11508_v54 = vsel %vm11507_vm8, %v11498_v17, %v11500_v39  ;;  %14801 = vmatmul.mubr.msk.f32.gmra.mrb[58].mxu1 %vm8835_vm2, %v17708_v22  ;;  %14837 = vmatmul.mubr.msk.f32.gmra.mrb[6].mxu0 %vm8835_vm2, %v17910_v9 }
 0x433   : > { %13638 = vperm.xlu0 %15814, %v13630_v2   ;;  %13442 = vrot.lane.b32.xlu1 %v17245_v24, %s16008_s29  ;;  %v10929_v24 = vsel %vm7705_vm11, %v17718_v30, %v17737_v33  ;;  %v17981_v30 = vld [vmem:[%s18635_s3 + $0xf0] sm:$0xff] }
 0x434   : > { %14845 = vmatpush1.msk.msra.mxu0 %vm8842_vm1, %v11508_v54  ;;  %10893 = vmatprep.mubr.f32.mxu1 %v15966_v0 }
 0x435   : > { %v17938_v62 = vpop.permute.xlu0 %11696  ;;  %v10926_v12 = vpop.permute.xlu1 %10925  ;;  %11590 = vmatprep.mubr.f32.mxu0 %v15966_v0 }
 0x436   : > { %v10930_v57 = vsel %vm7705_vm11, %v17737_v33, %v10926_v12  ;;  %14810 = vmatmul.mubr.msk.f32.vlgmr.msra.gmra.mrb[56].mxu1 %vm8835_vm2, %v17732_v59  ;;  %14846 = vmatmul.mubr.msk.f32.vlgmr.msra.gmra.mrb[4].mxu0 %vm8835_vm2, %v17934_v13  ;;  %vm12090_vm11 = vcmask 687104  }
 0x437   : > { %13444 = vrot.lane.b32.xlu1 %v17268_v31, %s16008_s29  ;;  %14818 = vmatprep.subr.msk.mxu1 %vm8842_vm1, %v10930_v57  ;;  %v13629_v31 = vld [vmem:[%s18636_s4] sm:$0xff]  ;;  %v14892_v57 = vld [vmem:[%s18635_s3 + $0x130] sm:$0xff] }
 0x438   : > { %14819 = vmatpush1.msk.msra.mxu1 %vm8842_vm1, %v10929_v24  ;;  %10899 = vmatprep.mubr.f32.mxu1 %v15966_v0 }
 0x439   : > { %v11889_v52 = vpop.permute.xlu0 %11888  ;;  %v11695_v5 = vpop.permute.xlu1 %11694  ;;  %11596 = vmatprep.mubr.f32.mxu0 %v15966_v0 }
 0x43a   : > { %v11704_v61 = vsel %vm11702_vm5, %v11695_v5, %v17938_v62  ;;  %14811 = vmatmul.mubr.msk.f32.gmra.mrb[58].mxu1 %vm8835_vm2, %v17762_v63  ;;  %14847 = vmatmul.mubr.msk.f32.gmra.mrb[6].mxu0 %vm8835_vm2, %v17956_v16  ;;  %v18020_v63 = vld [vmem:[%s18635_s3 + $0x100] sm:$0xff] }
 0x43b   : > { %14854 = vmatprep.subr.msk.mxu0 %vm8842_vm1, %v11704_v61  ;;  %11086 = vmatprep.mubr.f32.mxu1 %v15966_v0 }
 0x43c   : > { %11785 = vmatprep.mubr.f32.mxu0 %v15966_v0  ;;  %13633 = vperm.xlu1 %15815, %v13629_v31   ;;  %v14893_v31 = vld [vmem:[%s18635_s3 + $0x138] sm:$0xff] }
 0x43d   : > { %v11119_v20 = vpop.permute.xlu0 %11118  ;;  %v11693_v22 = vpop.permute.xlu1 %11692 }
 0x43e   : > { %v11123_v28 = vsel %vm8371_vm15, %v17815_v36, %v11119_v20  ;;  %v11703_v7 = vsel %vm11702_vm5, %v11693_v22, %v11695_v5  ;;  %14820 = vmatmul.mubr.msk.f32.vlgmr.msra.gmra.mrb[56].mxu1 %vm8835_vm2, %v17781_v46  ;;  %v18038_v46 = vld [vmem:[%s18635_s3 + $0x108] sm:$0xff]  ;;  %v18070_v36 = vld [vmem:[%s18635_s3 + $0x118] sm:$0xff]  ;;  %vm12284_vm15 = vcmask 670720  }
 0x43f   : > { %14828 = vmatprep.subr.msk.mxu1 %vm8842_vm1, %v11123_v28  ;;  %14855 = vmatpush1.msk.msra.mxu0 %vm8842_vm1, %v11703_v7  ;;  %v14902_v28 = vld [vmem:[%s18635_s3 + $0x140] sm:$0xff] }
 0x440   : > { %14829 = vmatpush1.msk.msra.mxu1 %vm8842_vm1, %v11122_v34  ;;  %11092 = vmatprep.mubr.f32.mxu1 %v15966_v0 }
 0x441   : > { %v11887_v59 = vpop.permute.xlu0 %11886  ;;  %v17990_v33 = vpop.permute.xlu1 %11890  ;;  %14856 = vmatmul.mubr.msk.f32.vlgmr.msra.gmra.mrb[4].mxu0 %vm8835_vm2, %v17981_v30 }
 0x442   : > { %v11897_v23 = vsel %vm11896_vm9, %v11887_v59, %v11889_v52  ;;  %v11898_v32 = vsel %vm11896_vm9, %v11889_v52, %v17990_v33  ;;  %14821 = vmatmul.mubr.msk.f32.gmra.mrb[58].mxu1 %vm8835_vm2, %v17810_v18  ;;  %11791 = vmatprep.mubr.f32.mxu0 %v15966_v0  ;;  %v11510_v18 = vsel %vm11507_vm8, %v17892_v50, %v17921_v3  ;;  %v14883_v50 = vld [vmem:[%s18635_s3 + $0x128] sm:$0xff] }
 0x443   : > { %14864 = vmatprep.subr.msk.mxu0 %vm8842_vm1, %v11898_v32  ;;  %11279 = vmatprep.mubr.f32.mxu1 %v15966_v0 }
 0x444   : > { %14865 = vmatpush1.msk.msra.mxu0 %vm8842_vm1, %v11897_v23  ;;  %v14903_v23 = vld [vmem:[%s18635_s3 + $0x148] sm:$0xff] }
 0x445   : > { %v18008_v37 = vpop.permute.xlu0 %12084  ;;  %v11312_v35 = vpop.permute.xlu1 %11311  ;;  %14857 = vmatmul.mubr.msk.f32.gmra.mrb[6].mxu0 %vm8835_vm2, %v18003_v15 }
 0x446   : > { %v11317_v41 = vsel %vm11313_vm7, %v17858_v55, %v11312_v35  ;;  %14830 = vmatmul.mubr.msk.f32.vlgmr.msra.gmra.mrb[56].mxu1 %vm8835_vm2, %v17830_v53  ;;  %11979 = vmatprep.mubr.f32.mxu0 %v15966_v0  ;;  %vm13060_vm7 = vcmask 228352  }
 0x447   : > { %14838 = vmatprep.subr.msk.mxu1 %vm8842_vm1, %v11317_v41  ;;  %11285 = vmatprep.mubr.f32.mxu1 %v15966_v0 }
 0x448   : > { %14839 = vmatpush1.msk.msra.mxu1 %vm8842_vm1, %v11316_v19 }
 0x449   : > { %v12277_v27 = vpop.permute.xlu0 %12276  ;;  %v12083_v44 = vpop.permute.xlu1 %12082  ;;  %14866 = vmatmul.mubr.msk.f32.vlgmr.msra.gmra.mrb[4].mxu0 %vm8835_vm2, %v18020_v63 }
 0x44a   : > { %v12092_v45 = vsel %vm12090_vm11, %v12083_v44, %v18008_v37  ;;  %14831 = vmatmul.mubr.msk.f32.gmra.mrb[58].mxu1 %vm8835_vm2, %v17854_v8  ;;  %11985 = vmatprep.mubr.f32.mxu0 %v15966_v0 }
 0x44b   : > { %14874 = vmatprep.subr.msk.mxu0 %vm8842_vm1, %v12092_v45  ;;  %11473 = vmatprep.mubr.f32.mxu1 %v15966_v0 }
 0x44d   : > { %v11506_v26 = vpop.permute.xlu0 %11505  ;;  %v12081_v42 = vpop.permute.xlu1 %12080  ;;  %14867 = vmatmul.mubr.msk.f32.gmra.mrb[6].mxu0 %vm8835_vm2, %v18038_v46 }
 0x44e   : > { %v11511_v48 = vsel %vm11507_vm8, %v17921_v3, %v11506_v26  ;;  %v12091_v49 = vsel %vm12090_vm11, %v12081_v42, %v12083_v44  ;;  %14840 = vmatmul.mubr.msk.f32.vlgmr.msra.gmra.mrb[56].mxu1 %vm8835_vm2, %v17884_v14  ;;  %12173 = vmatprep.mubr.f32.mxu0 %v15966_v0  ;;  %v14912_v44 = vld [vmem:[%s18635_s3 + $0x150] sm:$0xff]  ;;  %vm13254_vm8 = vcmask 211968  }
 0x44f   : > { %14848 = vmatprep.subr.msk.mxu1 %vm8842_vm1, %v11511_v48  ;;  %14875 = vmatpush1.msk.msra.mxu0 %vm8842_vm1, %v12091_v49 }
 0x450   : > { %14849 = vmatpush1.msk.msra.mxu1 %vm8842_vm1, %v11510_v18  ;;  %11479 = vmatprep.mubr.f32.mxu1 %v15966_v0 }
 0x451   : > { %v11699_v29 = vpop.permute.xlu0 %11698  ;;  %14876 = vmatmul.mubr.msk.f32.vlgmr.msra.gmra.mrb[4].mxu0 %vm8835_vm2, %v18053_v51  ;;  %v11893_v53 = vpop.permute.xlu1 %11892 }
 0x452   : > { %14841 = vmatmul.mubr.msk.f32.gmra.mrb[58].mxu1 %vm8835_vm2, %v17910_v9  ;;  %12179 = vmatprep.mubr.f32.mxu0 %v15966_v0  ;;  %v11705_v8 = vsel %vm11702_vm5, %v17938_v62, %v11699_v29  ;;  %v11899_v38 = vsel %vm11896_vm9, %v17990_v33, %v11893_v53 }
 0x453   : > { %11667 = vmatprep.mubr.f32.mxu1 %v15966_v0 }
 0x455   : > { %14877 = vmatmul.mubr.msk.f32.gmra.mrb[6].mxu0 %vm8835_vm2, %v18070_v36  ;;  %v12087_v1 = vpop.permute.xlu0 %12086 }
 0x456   : > { %14850 = vmatmul.mubr.msk.f32.vlgmr.msra.gmra.mrb[56].mxu1 %vm8835_vm2, %v17934_v13  ;;  %12367 = vmatprep.mubr.f32.mxu0 %v15966_v0  ;;  %v12093_v3 = vsel %vm12090_vm11, %v18008_v37, %v12087_v1 }
 0x457   : > { %11673 = vmatprep.mubr.f32.mxu1 %v15966_v0 }
 0x459   : > { %v12275_v21 = vpop.permute.xlu0 %12274 }
 0x45a   : > { %14851 = vmatmul.mubr.msk.f32.gmra.mrb[58].mxu1 %vm8835_vm2, %v17956_v16  ;;  %v12285_v60 = vsel %vm12284_vm15, %v12275_v21, %v12277_v27 }
 0x45b   : > { %11862 = vmatprep.mubr.f32.mxu1 %v15966_v0 }
 0x461   : > { %v11895_v40 = vpop.permute.xlu0 %11894  ;;  %v11701_v43 = vpop.permute.xlu1 %11700 }
 0x462   : > { %v11706_v25 = vsel %vm11702_vm5, %v11699_v29, %v11701_v43  ;;  %v11900_v55 = vsel %vm11896_vm9, %v11893_v53, %v11895_v40  ;;  %v14922_v53 = vld [vmem:[%s18635_s3 + $0x160] sm:$0xff]  ;;  %vm13448_vm5 = vcmask 195584  }
 0x463   : > { %14858 = vmatprep.subr.msk.mxu1 %vm8842_vm1, %v11706_v25 }
 0x464   : > { %14859 = vmatpush1.msk.msra.mxu1 %vm8842_vm1, %v11705_v8  ;;  %v14923_v8 = vld [vmem:[%s18635_s3 + $0x168] sm:$0xff] }
 0x465   : > { %v18090_v47 = vpop.permute.xlu0 %12472  ;;  %14860 = vmatmul.mubr.msk.f32.vlgmr.msra.gmra.mrb[56].mxu1 %vm8835_vm2, %v17981_v30  ;;  %14868 = vmatprep.subr.msk.mxu1 %vm8842_vm1, %v11900_v55  ;;  %v12279_v4 = vpop.permute.xlu1 %12278 }
 0x466   : > { %v12286_v39 = vsel %vm12284_vm15, %v12277_v27, %v12279_v4  ;;  %14869 = vmatpush1.msk.msra.mxu1 %vm8842_vm1, %v11899_v38  ;;  %11868 = vmatprep.mubr.f32.mxu1 %v15966_v0 }
 0x467   : > { %14884 = vmatprep.subr.msk.mxu0 %vm8842_vm1, %v12286_v39 }
 0x468   : > { %14885 = vmatpush1.msk.msra.mxu0 %vm8842_vm1, %v12285_v60 }
 0x469   : > { %v12475_v14 = vpop.permute.xlu0 %12474  ;;  %14861 = vmatmul.mubr.msk.f32.gmra.mrb[58].mxu1 %vm8835_vm2, %v18003_v15  ;;  %v12281_v11 = vpop.permute.xlu1 %12280  ;;  %14886 = vmatmul.mubr.msk.f32.vlgmr.msra.gmra.mrb[4].mxu0 %vm8835_vm2, %v14882_v56 }
 0x46a   : > { %12056 = vmatprep.mubr.f32.mxu1 %v15966_v0  ;;  %12373 = vmatprep.mubr.f32.mxu0 %v15966_v0  ;;  %v12287_v13 = vsel %vm12284_vm15, %v12279_v4, %v12281_v11  ;;  %v12481_v59 = vsel %vm12478_vm10, %v18090_v47, %v12475_v14 }
 0x46d   : > { %v12665_v58 = vpop.permute.xlu0 %12664  ;;  %14870 = vmatmul.mubr.msk.f32.vlgmr.msra.gmra.mrb[56].mxu1 %vm8835_vm2, %v18020_v63  ;;  %v12471_v6 = vpop.permute.xlu1 %12470  ;;  %14887 = vmatmul.mubr.msk.f32.gmra.mrb[6].mxu0 %vm8835_vm2, %v14883_v50 }
 0x46e   : > { %v12480_v9 = vsel %vm12478_vm10, %v12471_v6, %v18090_v47  ;;  %12062 = vmatprep.mubr.f32.mxu1 %v15966_v0  ;;  %12561 = vmatprep.mubr.f32.mxu0 %v15966_v0 }
 0x46f   : > { %14894 = vmatprep.subr.msk.mxu0 %vm8842_vm1, %v12480_v9 }
 0x471   : > { %v12283_v10 = vpop.permute.xlu0 %12282  ;;  %14871 = vmatmul.mubr.msk.f32.gmra.mrb[58].mxu1 %vm8835_vm2, %v18038_v46  ;;  %v12089_v2 = vpop.permute.xlu1 %12088 }
 0x472   : > { %v12094_v17 = vsel %vm12090_vm11, %v12087_v1, %v12089_v2  ;;  %12250 = vmatprep.mubr.f32.mxu1 %v15966_v0  ;;  %v12288_v54 = vsel %vm12284_vm15, %v12281_v11, %v12283_v10  ;;  %v14933_v11 = vld [vmem:[%s18635_s3 + $0x178] sm:$0xff]  ;;  %v14942_v2 = vld [vmem:[%s18635_s3 + $0x180] sm:$0xff] }
 0x473   : > { %14878 = vmatprep.subr.msk.mxu1 %vm8842_vm1, %v12094_v17 }
 0x474   : > { %14879 = vmatpush1.msk.msra.mxu1 %vm8842_vm1, %v12093_v3 }
 0x475   : > { %v12663_v62 = vpop.permute.xlu0 %12662  ;;  %14880 = vmatmul.mubr.msk.f32.vlgmr.msra.gmra.mrb[56].mxu1 %vm8835_vm2, %v18053_v51  ;;  %14888 = vmatprep.subr.msk.mxu1 %vm8842_vm1, %v12288_v54  ;;  %v12469_v12 = vpop.permute.xlu1 %12468  ;;  %v14913_v51 = vld [vmem:[%s18635_s3 + $0x158] sm:$0xff] }
 0x476   : > { %v12479_v24 = vsel %vm12478_vm10, %v12469_v12, %v12471_v6  ;;  %14889 = vmatpush1.msk.msra.mxu1 %vm8842_vm1, %v12287_v13  ;;  %12256 = vmatprep.mubr.f32.mxu1 %v15966_v0  ;;  %v12673_v61 = vsel %vm12672_vm0, %v12663_v62, %v12665_v58  ;;  %v14943_v12 = vld [vmem:[%s18635_s3 + $0x188] sm:$0xff] }
 0x477   : > { %14895 = vmatpush1.msk.msra.mxu0 %vm8842_vm1, %v12479_v24 }
 0x478   : > { %14896 = vmatmul.mubr.msk.f32.vlgmr.msra.gmra.mrb[4].mxu0 %vm8835_vm2, %v14892_v57 }
 0x479   : > { %v18141_v16 = vpop.permute.xlu0 %12860  ;;  %14881 = vmatmul.mubr.msk.f32.gmra.mrb[58].mxu1 %vm8835_vm2, %v18070_v36  ;;  %v12667_v52 = vpop.permute.xlu1 %12666  ;;  %12567 = vmatprep.mubr.f32.mxu0 %v15966_v0 }
 0x47a   : > { %v12674_v5 = vsel %vm12672_vm0, %v12665_v58, %v12667_v52  ;;  %12444 = vmatprep.mubr.f32.mxu1 %v15966_v0 }
 0x47b   : > { %14904 = vmatprep.subr.msk.mxu0 %vm8842_vm1, %v12674_v5 }
 0x47c   : > { %14905 = vmatpush1.msk.msra.mxu0 %vm8842_vm1, %v12673_v61 }
 0x47d   : > { %v18154_v20 = vpop.permute.xlu0 %12862  ;;  %14890 = vmatmul.mubr.msk.f32.vlgmr.msra.gmra.mrb[56].mxu1 %vm8835_vm2, %v14882_v56  ;;  %v12669_v22 = vpop.permute.xlu1 %12668  ;;  %14897 = vmatmul.mubr.msk.f32.gmra.mrb[6].mxu0 %vm8835_vm2, %v14893_v31  ;;  %v14932_v56 = vld [vmem:[%s18635_s3 + $0x170] sm:$0xff] }
 0x47e   : > { %12450 = vmatprep.mubr.f32.mxu1 %v15966_v0  ;;  %12755 = vmatprep.mubr.f32.mxu0 %v15966_v0  ;;  %v12675_v32 = vsel %vm12672_vm0, %v12667_v52, %v12669_v22  ;;  %v12869_v21 = vsel %vm12866_vm6, %v18141_v16, %v18154_v20 }
 0x481   : > { %v12671_v7 = vpop.permute.xlu0 %12670  ;;  %14891 = vmatmul.mubr.msk.f32.gmra.mrb[58].mxu1 %vm8835_vm2, %v14883_v50  ;;  %v12477_v30 = vpop.permute.xlu1 %12476  ;;  %14906 = vmatmul.mubr.msk.f32.vlgmr.msra.gmra.mrb[4].mxu0 %vm8835_vm2, %v14902_v28 }
 0x482   : > { %v12482_v34 = vsel %vm12478_vm10, %v12475_v14, %v12477_v30  ;;  %12638 = vmatprep.mubr.f32.mxu1 %v15966_v0  ;;  %12761 = vmatprep.mubr.f32.mxu0 %v15966_v0  ;;  %v12676_v33 = vsel %vm12672_vm0, %v12669_v22, %v12671_v7 }
 0x483   : > { %14898 = vmatprep.subr.msk.mxu1 %vm8842_vm1, %v12482_v34 }
 0x484   : > { %14899 = vmatpush1.msk.msra.mxu1 %vm8842_vm1, %v12481_v59 }
 0x485   : > { %v13053_v15 = vpop.permute.xlu0 %13052  ;;  %14900 = vmatmul.mubr.msk.f32.vlgmr.msra.gmra.mrb[56].mxu1 %vm8835_vm2, %v14892_v57  ;;  %14908 = vmatprep.subr.msk.mxu1 %vm8842_vm1, %v12676_v33  ;;  %v12859_v37 = vpop.permute.xlu1 %12858 }
 0x486   : > { %v12868_v35 = vsel %vm12866_vm6, %v12859_v37, %v18141_v16  ;;  %14909 = vmatpush1.msk.msra.mxu1 %vm8842_vm1, %v12675_v32  ;;  %12644 = vmatprep.mubr.f32.mxu1 %v15966_v0  ;;  %v18183_v41 = vpop.f32.mrb[52].mxu1 }
 0x487   : > { %14914 = vmatprep.subr.msk.mxu0 %vm8842_vm1, %v12868_v35  ;;  %14907 = vmatmul.mubr.msk.f32.gmra.mrb[6].mxu0 %vm8835_vm2, %v14903_v23  ;;  %v18187_v63 = vpop.f32.mrb[53].mxu1 }
 0x488   : > { %12949 = vmatprep.mubr.f32.mxu0 %v15966_v0 }
 0x489   : > { %v13051_v19 = vpop.permute.xlu0 %13050  ;;  %14901 = vmatmul.mubr.msk.f32.gmra.mrb[58].mxu1 %vm8835_vm2, %v14893_v31  ;;  %v12857_v27 = vpop.permute.xlu1 %12856 }
 0x48a   : > { %v12867_v45 = vsel %vm12866_vm6, %v12857_v27, %v12859_v37  ;;  %12832 = vmatprep.mubr.f32.mxu1 %v15966_v0  ;;  %v18196_v46 = vpop.f32.mrb[54].mxu1  ;;  %v13061_v18 = vsel %vm13060_vm7, %v13051_v19, %v13053_v15 }
 0x48b   : > { %14915 = vmatpush1.msk.msra.mxu0 %vm8842_vm1, %v12867_v45  ;;  %v18199_v26 = vpop.f32.mrb[55].mxu1 }
 0x48c   : > { %14916 = vmatmul.mubr.msk.f32.vlgmr.msra.gmra.mrb[4].mxu0 %vm8835_vm2, %v14912_v44 }
 0x48d   : > { %v13249_v42 = vpop.permute.xlu0 %13248  ;;  %14910 = vmatmul.mubr.msk.f32.vlgmr.msra.gmra.mrb[56].mxu1 %vm8835_vm2, %v14902_v28  ;;  %v13055_v48 = vpop.permute.xlu1 %13054  ;;  %12955 = vmatprep.mubr.f32.mxu0 %v15966_v0 }
 0x48e   : > { %v13062_v49 = vsel %vm13060_vm7, %v13053_v15, %v13055_v48  ;;  %12838 = vmatprep.mubr.f32.mxu1 %v15966_v0 }
 0x48f   : > { %14924 = vmatprep.subr.msk.mxu0 %vm8842_vm1, %v13062_v49 }
 0x490   : > { %14925 = vmatpush1.msk.msra.mxu0 %vm8842_vm1, %v13061_v18 }
 0x491   : > { %v13059_v29 = vpop.permute.xlu0 %13058  ;;  %14911 = vmatmul.mubr.msk.f32.gmra.mrb[58].mxu1 %vm8835_vm2, %v14903_v23  ;;  %v12865_v36 = vpop.permute.xlu1 %12864  ;;  %14917 = vmatmul.mubr.msk.f32.gmra.mrb[6].mxu0 %vm8835_vm2, %v14913_v51 }
 0x492   : > { %v12870_v1 = vsel %vm12866_vm6, %v18154_v20, %v12865_v36  ;;  %13026 = vmatprep.mubr.f32.mxu1 %v15966_v0  ;;  %13143 = vmatprep.mubr.f32.mxu0 %v15966_v0 }
 0x493   : > { %14918 = vmatprep.subr.msk.mxu1 %vm8842_vm1, %v12870_v1 }
 0x494   : > { %14919 = vmatpush1.msk.msra.mxu1 %vm8842_vm1, %v12869_v21 }
 0x495   : > { %14920 = vmatmul.mubr.msk.f32.vlgmr.msra.gmra.mrb[56].mxu1 %vm8835_vm2, %v14912_v44  ;;  %v13057_v40 = vpop.permute.xlu1 %13056  ;;  %14926 = vmatmul.mubr.msk.f32.vlgmr.msra.gmra.mrb[4].mxu0 %vm8835_vm2, %v14922_v53  ;;  %v13251_v55 = vpop.permute.xlu0 %13250 }
 0x496   : > { %v13063_v43 = vsel %vm13060_vm7, %v13055_v48, %v13057_v40  ;;  %v13064_v25 = vsel %vm13060_vm7, %v13057_v40, %v13059_v29  ;;  %13032 = vmatprep.mubr.f32.mxu1 %v15966_v0  ;;  %13149 = vmatprep.mubr.f32.mxu0 %v15966_v0  ;;  %v13257_v58 = vsel %vm13254_vm8, %v13249_v42, %v13251_v55 }
 0x497   : > { %14928 = vmatprep.subr.msk.mxu1 %vm8842_vm1, %v13064_v25 }
 0x498   : > { %14929 = vmatpush1.msk.msra.mxu1 %vm8842_vm1, %v13063_v43 }
 0x499   : > { %14921 = vmatmul.mubr.msk.f32.gmra.mrb[58].mxu1 %vm8835_vm2, %v14913_v51  ;;  %v13247_v38 = vpop.permute.xlu1 %13246  ;;  %14927 = vmatmul.mubr.msk.f32.gmra.mrb[6].mxu0 %vm8835_vm2, %v14923_v8  ;;  %v13441_v4 = vpop.permute.xlu0 %13440 }
 0x49a   : > { %v13256_v47 = vsel %vm13254_vm8, %v13247_v38, %v13249_v42  ;;  %13220 = vmatprep.mubr.f32.mxu1 %v15966_v0  ;;  %13337 = vmatprep.mubr.f32.mxu0 %v15966_v0 }
 0x49b   : > { %14934 = vmatprep.subr.msk.mxu0 %vm8842_vm1, %v13256_v47 }
 0x49d   : > { %14930 = vmatmul.mubr.msk.f32.vlgmr.msra.gmra.mrb[56].mxu1 %vm8835_vm2, %v14922_v53  ;;  %v13245_v39 = vpop.permute.xlu1 %13244  ;;  %v13439_v6 = vpop.permute.xlu0 %13438 }
 0x49e   : > { %v13255_v60 = vsel %vm13254_vm8, %v13245_v39, %v13247_v38  ;;  %13226 = vmatprep.mubr.f32.mxu1 %v15966_v0  ;;  %v13449_v17 = vsel %vm13448_vm5, %v13439_v6, %v13441_v4 }
 0x49f   : > { %14935 = vmatpush1.msk.msra.mxu0 %vm8842_vm1, %v13255_v60 }
 0x4a0   : > { %14936 = vmatmul.mubr.msk.f32.vlgmr.msra.gmra.mrb[4].mxu0 %vm8835_vm2, %v14932_v56 }
 0x4a1   : > { %14931 = vmatmul.mubr.msk.f32.gmra.mrb[58].mxu1 %vm8835_vm2, %v14923_v8  ;;  %v13253_v14 = vpop.permute.xlu1 %13252  ;;  %13343 = vmatprep.mubr.f32.mxu0 %v15966_v0  ;;  %v13447_v3 = vpop.permute.xlu0 %13446 }
 0x4a2   : > { %v13258_v50 = vsel %vm13254_vm8, %v13251_v55, %v13253_v14  ;;  %13414 = vmatprep.mubr.f32.mxu1 %v15966_v0 }
 0x4a3   : > { %14938 = vmatprep.subr.msk.mxu1 %vm8842_vm1, %v13258_v50 }
 0x4a4   : > { %14939 = vmatpush1.msk.msra.mxu1 %vm8842_vm1, %v13257_v58  ;;  %14937 = vmatmul.mubr.msk.f32.gmra.mrb[6].mxu0 %vm8835_vm2, %v14933_v11 }
 0x4a5   : > { %14940 = vmatmul.mubr.msk.f32.vlgmr.msra.gmra.mrb[56].mxu1 %vm8835_vm2, %v14932_v56  ;;  %v13443_v9 = vpop.permute.xlu1 %13442  ;;  %13531 = vmatprep.mubr.f32.mxu0 %v15966_v0 }
 0x4a6   : > { %v13450_v10 = vsel %vm13448_vm5, %v13441_v4, %v13443_v9  ;;  %13420 = vmatprep.mubr.f32.mxu1 %v15966_v0 }
 0x4a7   : > { %14944 = vmatprep.subr.msk.mxu0 %vm8842_vm1, %v13450_v10 }
 0x4a8   : > { %14945 = vmatpush1.msk.msra.mxu0 %vm8842_vm1, %v13449_v17 }
 0x4a9   : > { %14941 = vmatmul.mubr.msk.f32.gmra.mrb[58].mxu1 %vm8835_vm2, %v14933_v11  ;;  %14946 = vmatmul.mubr.msk.f32.vlgmr.msra.gmra.mrb[4].mxu0 %vm8835_vm2, %v14942_v2  ;;  %v13445_v54 = vpop.permute.xlu1 %13444 }
 0x4aa   : > { %v13451_v13 = vsel %vm13448_vm5, %v13443_v9, %v13445_v54  ;;  %v13452_v62 = vsel %vm13448_vm5, %v13445_v54, %v13447_v3  ;;  %13537 = vmatprep.mubr.f32.mxu0 %v15966_v0  ;;  %13608 = vmatprep.mubr.f32.mxu1 %v15966_v0 }
 0x4ab   : > { %14948 = vmatprep.subr.msk.mxu1 %vm8842_vm1, %v13452_v62 }
 0x4ac   : > { %14949 = vmatpush1.msk.msra.mxu1 %vm8842_vm1, %v13451_v13 }
 0x4ad   : > { %14947 = vmatmul.mubr.msk.f32.gmra.mrb[6].mxu0 %vm8835_vm2, %v14943_v12  ;;  %14950 = vmatmul.mubr.msk.f32.vlgmr.msra.gmra.mrb[56].mxu1 %vm8835_vm2, %v14942_v2 }
 0x4ae   : > { %13614 = vmatprep.mubr.f32.mxu1 %v15966_v0 }
 0x4b1   : > { %14951 = vmatmul.mubr.msk.f32.gmra.mrb[58].mxu1 %vm8835_vm2, %v14943_v12 }
 0x4b2   : > { %15290 = vmatprep.mubr.msk.f32.mxu1 %vm15976_vm3, %v15966_v0  ;;  %v13639_v33 = vpop.permute.xlu0 %13638 }
 0x4bb   : > { %v13634_v52 = vpop.permute.xlu1 %13633 }
 0x57c   : > { %v13533_v57 = vpop.f32.mrb[4].mxu0 }
 0x57d   : > { %v15421_v24 = vadd.f32 %v13533_v57, %v18183_v41  ;;  %v13535_v16 = vpop.f32.mrb[5].mxu0 }
 0x57e   : > { %v15422_v5 = vadd.f32 %v13535_v16, %v18187_v63 }
 0x57f   : > { %v13641_v49 = vadd.f32 %v15421_v24, %v13634_v52 }
 0x580   : > { %v18291_v31 = vadd.f32 %v15422_v5, %v13634_v52  ;;  %v13539_v61 = vpop.f32.mrb[6].mxu0  ;;  %v13610_v20 = vpop.f32.mrb[56].mxu1 }
 0x581   : > { %v15423_v22 = vadd.f32 %v13539_v61, %v18196_v46  ;;  %v18294_v28 = vadd.f32 %v13634_v52, %v13610_v20  ;;  %v13541_v7 = vpop.f32.mrb[7].mxu0  ;;  %v13612_v30 = vpop.f32.mrb[57].mxu1  ;;  %v13649_v18 = vmax.f32 %v13641_v49, 0.0 }
 0x582   : > { %v13650_v34 = vmax.f32 %v18291_v31, 0.0  ;;  %v15424_v59 = vadd.f32 %v13541_v7, %v18199_v26  ;;  %v13644_v15 = vadd.f32 %v13634_v52, %v13612_v30 }
 0x583   : > { %v13651_v23 = vmax.f32 %v18294_v28, 0.0  ;;  %v13645_v26 = vadd.f32 %v15423_v22, %v13639_v33  ;;  %v13864_v28 = vld [vmem:[%s18637_s5 + $0x8] sm:$0xff] }
 0x584   : > { %v13646_v32 = vadd.f32 %v15424_v59, %v13639_v33  ;;  %v13616_v37 = vpop.f32.mrb[58].mxu1  ;;  %v13652_v45 = vmax.f32 %v13644_v15, 0.0  ;;  %13972 = vmatprep.mubr.f32.mxu0 %v13864_v28  ;;  %v13865_v28 = vld [vmem:[%s18637_s5 + $0x10] sm:$0xff] }
 0x585   : > { %v18299_v35 = vadd.f32 %v13639_v33, %v13616_v37  ;;  %v13618_v41 = vpop.f32.mrb[59].mxu1  ;;  %v15816_v63 = vpack.i.bf16 %v13651_v23, %v13650_v34  ;;  %v13653_v51 = vmax.f32 %v13645_v26, 0.0 }
 0x586   : > { %v13654_v19 = vmax.f32 %v13646_v32, 0.0  ;;  %v13648_v27 = vadd.f32 %v13639_v33, %v13618_v41 }
 0x587   : > { %v13655_v44 = vmax.f32 %v18299_v35, 0.0  ;;  %15817 = vrot.lane.b32.xlu1 %v15816_v63, %s15968_s25  ;;  %v15846_v29 = vpack.i.bf16 %v13653_v51, %v13649_v18 }
 0x588   : > { %v13656_v46 = vmax.f32 %v13648_v27, 0.0 }
 0x589   : > { %v15831_v42 = vpack.i.bf16 %v13655_v44, %v13654_v19 }
 0x58a   : > { %v15871_v48 = vpack.i.bf16 %v13656_v46, %v13652_v45 }
 0x58b   : > { %15832 = vrot.lane.b32.xlu0 %v15831_v42, %s15968_s25  ;;  %15822 = vrot.lane.b32.xlu1 %v15816_v63, %s15977_s16 }
 0x58f   : > { %15837 = vrot.lane.b32.xlu0 %v15831_v42, %s15977_s16  ;;  %15827 = vrot.lane.b32.xlu1 %v15816_v63, %s15979_s13 }
 0x593   : > { %15842 = vrot.lane.b32.xlu0 %v15831_v42, %s15979_s13  ;;  %15847 = vrot.lane.b32.xlu1 %v15846_v29, %s15968_s25 }
 0x597   : > { %15852 = vrot.lane.b32.xlu0 %v15846_v29, %s15977_s16  ;;  %15857 = vrot.lane.b32.xlu1 %v15846_v29, %s15979_s13 }
 0x59b   : > { %15862 = vrot.lane.b32.xlu0 %v15871_v48, %s15968_s25  ;;  %15867 = vrot.lane.b32.xlu1 %v15871_v48, %s15977_s16  ;;  %s16009_s25 = smov 20   ;;  %s16011_s16 = smov 116  }
 0x59f   : > { %15872 = vrot.lane.b32.xlu0 %v15871_v48, %s15979_s13 }
 0x5f9   : > { %v18320_v36 = vpop.permute.xlu1 %15817 }
 0x5fa   : > { %v15820_v21 = vunpack.i.h.bf16 %v18320_v36  ;;  %v15819_v40 = vunpack.i.l.bf16 %v18320_v36 }
 0x5fc   : > { %v13682_v11 = vsel %vm1045_vm4, %v15819_v40, %v15820_v21 }
 0x5fd   : > { %v15833_v1 = vpop.permute.xlu0 %15832  ;;  %v18322_v53 = vpop.permute.xlu1 %15822  ;;  %v13694_v24 = vmax.f32 %v13650_v34, %v13682_v11 }
 0x5fe   : > { %v15835_v43 = vunpack.i.h.bf16 %v15833_v1  ;;  %v15834_v25 = vunpack.i.l.bf16 %v15833_v1  ;;  %v15825_v8 = vunpack.i.h.bf16 %v18322_v53  ;;  %v15824_v55 = vunpack.i.l.bf16 %v18322_v53 }
 0x600   : > { %v13685_v50 = vsel %vm1045_vm4, %v15834_v25, %v15835_v43  ;;  %v13716_v58 = vsel %vm3709_vm12, %v15824_v55, %v15825_v8 }
 0x601   : > { %v15838_v38 = vpop.permute.xlu0 %15837  ;;  %v18328_v47 = vpop.permute.xlu1 %15827  ;;  %v13697_v16 = vmax.f32 %v13654_v19, %v13685_v50 }
 0x602   : > { %v15830_v4 = vunpack.i.h.bf16 %v18328_v47  ;;  %v15829_v39 = vunpack.i.l.bf16 %v18328_v47  ;;  %v15840_v56 = vunpack.i.h.bf16 %v15838_v38  ;;  %v15839_v60 = vunpack.i.l.bf16 %v15838_v38 }
 0x604   : > { %v13744_v14 = vsel %vm4375_vm14, %v15829_v39, %v15830_v4  ;;  %v13719_v13 = vsel %vm3709_vm12, %v15839_v60, %v15840_v56 }
 0x605   : > { %v15843_v6 = vpop.permute.xlu0 %15842  ;;  %v15848_v9 = vpop.permute.xlu1 %15847  ;;  %v13756_v54 = vmax.f32 %v13716_v58, %v13744_v14 }
 0x606   : > { %v15845_v10 = vunpack.i.h.bf16 %v15843_v6  ;;  %v15844_v2 = vunpack.i.l.bf16 %v15843_v6  ;;  %v15850_v17 = vunpack.i.h.bf16 %v15848_v9  ;;  %v15849_v3 = vunpack.i.l.bf16 %v15848_v9 }
 0x607   : > { %v13762_v59 = vmax.f32 %v13694_v24, %v13756_v54 }
 0x608   : > { %v13747_v62 = vsel %vm4375_vm14, %v15844_v2, %v15845_v10  ;;  %v13684_v12 = vsel %vm1045_vm4, %v15850_v17, %v15834_v25  ;;  %v13681_v57 = vsel %vm1045_vm4, %v15849_v3, %v15819_v40 }
 0x609   : > { %v13759_v52 = vmax.f32 %v13719_v13, %v13747_v62  ;;  %v15853_v5 = vpop.permute.xlu0 %15852  ;;  %v15858_v61 = vpop.permute.xlu1 %15857  ;;  %v13696_v32 = vmax.f32 %v13653_v51, %v13684_v12  ;;  %v13693_v15 = vmax.f32 %v13649_v18, %v13681_v57 }
 0x60a   : > { %v15855_v20 = vunpack.i.h.bf16 %v15853_v5  ;;  %v15854_v22 = vunpack.i.l.bf16 %v15853_v5  ;;  %v15860_v7 = vunpack.i.h.bf16 %v15858_v61  ;;  %v15859_v30 = vunpack.i.l.bf16 %v15858_v61 }
 0x60b   : > { %v13765_v33 = vmax.f32 %v13697_v16, %v13759_v52 }
 0x60c   : > { %v13718_v37 = vsel %vm3709_vm12, %v15855_v20, %v15839_v60  ;;  %v13715_v41 = vsel %vm3709_vm12, %v15854_v22, %v15824_v55  ;;  %v13746_v63 = vsel %vm4375_vm14, %v15860_v7, %v15844_v2  ;;  %v13743_v31 = vsel %vm4375_vm14, %v15859_v30, %v15829_v39 }
 0x60d   : > { %v13758_v34 = vmax.f32 %v13718_v37, %v13746_v63  ;;  %v13755_v19 = vmax.f32 %v13715_v41, %v13743_v31  ;;  %v15863_v27 = vpop.permute.xlu0 %15862  ;;  %v15868_v45 = vpop.permute.xlu1 %15867  ;;  %v15911_v46 = vpack.i.bf16 %v13765_v33, %v13762_v59 }
 0x60e   : > { %v15865_v26 = vunpack.i.h.bf16 %v15863_v27  ;;  %v15864_v42 = vunpack.i.l.bf16 %v15863_v27  ;;  %v15870_v29 = vunpack.i.h.bf16 %v15868_v45  ;;  %v15869_v51 = vunpack.i.l.bf16 %v15868_v45 }
 0x60f   : > { %v13761_v48 = vmax.f32 %v13693_v15, %v13755_v19  ;;  %v13764_v49 = vmax.f32 %v13696_v32, %v13758_v34  ;;  %15912 = vrot.lane.b32.xlu0 %v15911_v46, %s16006_s28  ;;  %15877 = vrot.lane.b32.xlu1 %v15911_v46, %s16004_s30  ;;  %s16012_s28 = smov 36  }
 0x610   : > { %v13686_v18 = vsel %vm1045_vm4, %v15835_v43, %v15865_v26  ;;  %v13683_v36 = vsel %vm1045_vm4, %v15820_v21, %v15864_v42  ;;  %v13720_v38 = vsel %vm3709_vm12, %v15840_v56, %v15870_v29  ;;  %v13717_v39 = vsel %vm3709_vm12, %v15825_v8, %v15869_v51 }
 0x611   : > { %v15873_v1 = vpop.permute.xlu0 %15872  ;;  %v15881_v53 = vpack.i.bf16 %v13764_v49, %v13761_v48  ;;  %v13698_v55 = vmax.f32 %v13655_v44, %v13686_v18  ;;  %v13695_v43 = vmax.f32 %v13651_v23, %v13683_v36  ;;  %v15350_v14 = vpack.c.bf16 %v13764_v49, %v13761_v48 }
 0x612   : > { %v15875_v40 = vunpack.i.h.bf16 %v15873_v1  ;;  %v15874_v25 = vunpack.i.l.bf16 %v15873_v1  ;;  %vm14340_vm4 = vcmask 1024   ;;  %vm14338_vm12 = vcmask 7168  }
 0x613   : > { %15917 = vrot.lane.b32.xlu0 %v15911_v46, %s16008_s29  ;;  %15882 = vrot.lane.b32.xlu1 %v15881_v53, %s15970_s27  ;;  %s16010_s27 = smov 48   ;;  %s16013_s29 = smov 4  }
 0x614   : > { %v13748_v21 = vsel %vm4375_vm14, %v15845_v10, %v15875_v40  ;;  %v13745_v60 = vsel %vm4375_vm14, %v15830_v4, %v15874_v25 }
 0x615   : > { %v13757_v35 = vmax.f32 %v13717_v39, %v13745_v60  ;;  %v13760_v44 = vmax.f32 %v13720_v38, %v13748_v21 }
 0x617   : > { %v13763_v11 = vmax.f32 %v13695_v43, %v13757_v35  ;;  %v13766_v56 = vmax.f32 %v13698_v55, %v13760_v44  ;;  %15922 = vrot.lane.b32.xlu0 %v15911_v46, %s16009_s25  ;;  %15887 = vrot.lane.b32.xlu1 %v15881_v53, %s15994_s23  ;;  %s18645_s23 = smov 8  }
 0x619   : > { %v15926_v8 = vpack.i.bf16 %v13766_v56, %v13763_v11  ;;  %v13863_v56 = vld [vmem:[%s18637_s5] sm:$0xff] }
 0x61b   : > { %15927 = vrot.lane.b32.xlu0 %v15926_v8, %s16010_s27  ;;  %15892 = vrot.lane.b32.xlu1 %v15881_v53, %s16011_s16 }
 0x61f   : > { %15932 = vrot.lane.b32.xlu0 %v15926_v8, %s15982_s12  ;;  %15897 = vrot.lane.b32.xlu1 %v15881_v53, %s15987_s14  ;;  %s14968_s12 = sshll.u32 %s18649_s18, 4 }
 0x620   : > { %s388_s19 = scalar_lea.vmem %s18643_s11, %s14968_s12 }
 0x623   : > { %15937 = vrot.lane.b32.xlu0 %v15926_v8, %s15986_s21  ;;  %15902 = vrot.lane.b32.xlu1 %v15881_v53, %s15991_s15 }
 0x627   : > { %15942 = vrot.lane.b32.xlu0 %v15926_v8, %s16012_s28  ;;  %15907 = vrot.lane.b32.xlu1 %v15881_v53, %s18645_s23  ;;  %v13866_v8 = vld [vmem:[%s18637_s5 + $0x18] sm:$0xff] }
 0x62b   : > { %15947 = vrot.lane.b32.xlu1 %v15881_v53, %s16013_s29 }
 0x681   : > { %v15913_v23 = vpop.permute.xlu0 %15912  ;;  %v15878_v47 = vpop.permute.xlu1 %15877 }
 0x682   : > { %v15915_v4 = vunpack.i.h.bf16 %v15913_v23  ;;  %v15914_v50 = vunpack.i.l.bf16 %v15913_v23  ;;  %v15880_v58 = vunpack.i.h.bf16 %v15878_v47  ;;  %v15879_v6 = vunpack.i.l.bf16 %v15878_v47  ;;  %v13868_v23 = vld [vmem:[%s18637_s5 + $0x28] sm:$0xff]  ;;  %v13867_v47 = vld [vmem:[%s18637_s5 + $0x20] sm:$0xff] }
 0x684   : > { %v15348_v9 = vpack.c.bf16 %v15880_v58, %v15879_v6  ;;  %v15352_v10 = vpack.c.bf16 %v15915_v4, %v15914_v50  ;;  %v13870_v4 = vld [vmem:[%s18637_s5 + $0x38] sm:$0xff]  ;;  %v13869_v50 = vld [vmem:[%s18637_s5 + $0x30] sm:$0xff]  ;;  %v13872_v58 = vld [vmem:[%s18637_s5 + $0x48] sm:$0xff] }
 0x685   : > { %v15918_v2 = vpop.permute.xlu0 %15917  ;;  %v15883_v17 = vpop.permute.xlu1 %15882  ;;  %v13871_v6 = vld [vmem:[%s18637_s5 + $0x40] sm:$0xff] }
 0x686   : > { %v15920_v3 = vunpack.i.h.bf16 %v15918_v2  ;;  %v15919_v54 = vunpack.i.l.bf16 %v15918_v2  ;;  %v15885_v13 = vunpack.i.h.bf16 %v15883_v17  ;;  %v15884_v62 = vunpack.i.l.bf16 %v15883_v17  ;;  %15349 = vmatprep.subr.bf16.mxu0 %v15348_v9  ;;  %v13874_v9 = vld [vmem:[%s18637_s5 + $0x58] sm:$0xff]  ;;  %v13876_v2 = vld [vmem:[%s18637_s5 + $0x68] sm:$0xff]  ;;  %v13875_v17 = vld [vmem:[%s18637_s5 + $0x60] sm:$0xff] }
 0x687   : > { %15351 = vmatpush3.bf16.msra.mxu0 %v15350_v14 }
 0x688   : > { %v15354_v12 = vpack.c.bf16 %v15885_v13, %v15884_v62  ;;  %15353 = vmatprep.subr.bf16.mxu0 %v15352_v10  ;;  %v15356_v57 = vpack.c.bf16 %v15920_v3, %v15919_v54  ;;  %v13873_v10 = vld [vmem:[%s18637_s5 + $0x50] sm:$0xff]  ;;  %v13878_v3 = vld [vmem:[%s18637_s5 + $0x78] sm:$0xff]  ;;  %v13880_v13 = vld [vmem:[%s18637_s5 + $0x88] sm:$0xff] }
 0x689   : > { %v15923_v24 = vpop.permute.xlu0 %15922  ;;  %v15888_v16 = vpop.permute.xlu1 %15887  ;;  %v13877_v54 = vld [vmem:[%s18637_s5 + $0x70] sm:$0xff]  ;;  %v13879_v62 = vld [vmem:[%s18637_s5 + $0x80] sm:$0xff] }
 0x68a   : > { %v15925_v52 = vunpack.i.h.bf16 %v15923_v24  ;;  %v15924_v5 = vunpack.i.l.bf16 %v15923_v24  ;;  %v15890_v61 = vunpack.i.h.bf16 %v15888_v16  ;;  %v15889_v20 = vunpack.i.l.bf16 %v15888_v16  ;;  %v13884_v24 = vld [vmem:[%s18637_s5 + $0xa8] sm:$0xff]  ;;  %v13883_v16 = vld [vmem:[%s18637_s5 + $0xa0] sm:$0xff] }
 0x68b   : > { %15355 = vmatpush3.bf16.msra.mxu0 %v15354_v12  ;;  %v13882_v12 = vld [vmem:[%s18637_s5 + $0x98] sm:$0xff] }
 0x68c   : > { %v15358_v22 = vpack.c.bf16 %v15890_v61, %v15889_v20  ;;  %15357 = vmatprep.subr.bf16.mxu0 %v15356_v57  ;;  %v15360_v7 = vpack.c.bf16 %v15925_v52, %v15924_v5  ;;  %v13881_v57 = vld [vmem:[%s18637_s5 + $0x90] sm:$0xff]  ;;  %v13886_v52 = vld [vmem:[%s18637_s5 + $0xb8] sm:$0xff]  ;;  %v13888_v61 = vld [vmem:[%s18637_s5 + $0xc8] sm:$0xff] }
 0x68d   : > { %v15928_v30 = vpop.permute.xlu0 %15927  ;;  %v15893_v59 = vpop.permute.xlu1 %15892  ;;  %v13885_v5 = vld [vmem:[%s18637_s5 + $0xb0] sm:$0xff]  ;;  %v13887_v20 = vld [vmem:[%s18637_s5 + $0xc0] sm:$0xff] }
 0x68e   : > { %v15930_v33 = vunpack.i.h.bf16 %v15928_v30  ;;  %v15929_v32 = vunpack.i.l.bf16 %v15928_v30  ;;  %v15895_v15 = vunpack.i.h.bf16 %v15893_v59  ;;  %v15894_v37 = vunpack.i.l.bf16 %v15893_v59  ;;  %v13892_v30 = vld [vmem:[%s18637_s5 + $0xe8] sm:$0xff]  ;;  %v13891_v59 = vld [vmem:[%s18637_s5 + $0xe0] sm:$0xff] }
 0x68f   : > { %15359 = vmatpush3.bf16.msra.mxu0 %v15358_v22  ;;  %v13890_v22 = vld [vmem:[%s18637_s5 + $0xd8] sm:$0xff] }
 0x690   : > { %v15362_v41 = vpack.c.bf16 %v15895_v15, %v15894_v37  ;;  %15361 = vmatprep.subr.bf16.mxu0 %v15360_v7  ;;  %v15364_v63 = vpack.c.bf16 %v15930_v33, %v15929_v32  ;;  %v13889_v7 = vld [vmem:[%s18637_s5 + $0xd0] sm:$0xff]  ;;  %v16014_v33 = vmov 0.0|0.0  }
 0x691   : > { %v15933_v31 = vpop.permute.xlu0 %15932  ;;  %v15898_v34 = vpop.permute.xlu1 %15897  ;;  %15380 = vmatprep.subr.bf16.mxu1 %v16014_v33 }
 0x692   : > { %v15935_v19 = vunpack.i.h.bf16 %v15933_v31  ;;  %v15934_v27 = vunpack.i.l.bf16 %v15933_v31  ;;  %v15900_v45 = vunpack.i.h.bf16 %v15898_v34  ;;  %v15899_v46 = vunpack.i.l.bf16 %v15898_v34  ;;  %v13894_v31 = vld [vmem:[%s18638_s6 + $0x8] sm:$0xff] }
 0x693   : > { %15363 = vmatpush3.bf16.msra.mxu0 %v15362_v41  ;;  %v13893_v41 = vld [vmem:[%s18638_s6] sm:$0xff] }
 0x694   : > { %v15366_v26 = vpack.c.bf16 %v15900_v45, %v15899_v46  ;;  %15365 = vmatprep.subr.bf16.mxu0 %v15364_v63  ;;  %v15368_v42 = vpack.c.bf16 %v15935_v19, %v15934_v27 }
 0x695   : > { %v15938_v48 = vpop.permute.xlu0 %15937  ;;  %v15903_v49 = vpop.permute.xlu1 %15902 }
 0x696   : > { %v15940_v29 = vunpack.i.h.bf16 %v15938_v48  ;;  %v15939_v51 = vunpack.i.l.bf16 %v15938_v48  ;;  %v15905_v18 = vunpack.i.h.bf16 %v15903_v49  ;;  %v15904_v36 = vunpack.i.l.bf16 %v15903_v49 }
 0x697   : > { %15367 = vmatpush3.bf16.msra.mxu0 %v15366_v26 }
 0x698   : > { %v15370_v1 = vpack.c.bf16 %v15905_v18, %v15904_v36  ;;  %15369 = vmatprep.subr.bf16.mxu0 %v15368_v42  ;;  %v15372_v53 = vpack.c.bf16 %v15940_v29, %v15939_v51  ;;  %v13895_v29 = vld [vmem:[%s18638_s6 + $0x10] sm:$0xff]  ;;  %v13896_v36 = vld [vmem:[%s18638_s6 + $0x18] sm:$0xff] }
 0x699   : > { %v15943_v40 = vpop.permute.xlu0 %15942  ;;  %v15908_v25 = vpop.permute.xlu1 %15907 }
 0x69a   : > { %v15945_v55 = vunpack.i.h.bf16 %v15943_v40  ;;  %v15944_v38 = vunpack.i.l.bf16 %v15943_v40  ;;  %v15910_v39 = vunpack.i.h.bf16 %v15908_v25  ;;  %v15909_v43 = vunpack.i.l.bf16 %v15908_v25 }
 0x69b   : > { %15371 = vmatpush3.bf16.msra.mxu0 %v15370_v1 }
 0x69c   : > { %v15374_v21 = vpack.c.bf16 %v15910_v39, %v15909_v43  ;;  %15373 = vmatprep.subr.bf16.mxu0 %v15372_v53  ;;  %v15376_v14 = vpack.c.bf16 %v15945_v55, %v15944_v38 }
 0x69d   : > { %v15948_v60 = vpop.permute.xlu1 %15947 }
 0x69e   : > { %v15950_v35 = vunpack.i.h.bf16 %v15948_v60  ;;  %v15949_v44 = vunpack.i.l.bf16 %v15948_v60  ;;  %v13897_v60 = vld [vmem:[%s18638_s6 + $0x20] sm:$0xff] }
 0x69f   : > { %15375 = vmatpush3.bf16.msra.mxu0 %v15374_v21 }
 0x6a0   : > { %v15378_v11 = vpack.c.bf16 %v15950_v35, %v15949_v44  ;;  %15377 = vmatprep.subr.bf16.mxu0 %v15376_v14  ;;  %v13898_v44 = vld [vmem:[%s18638_s6 + $0x28] sm:$0xff] }
 0x6a3   : > { %15379 = vmatpush3.bf16.msra.mxu0 %v15378_v11 }
 0x6a6   : > { %13973 = vmatmul.mubr.f32.vlgmr.msra.gmra.mrb[8].mxu0 %v13863_v56 }
 0x6a7   : > { %13977 = vmatprep.mubr.f32.mxu0 %v13866_v8 }
 0x6aa   : > { %13978 = vmatmul.mubr.f32.gmra.mrb[10].mxu0 %v13865_v28 }
 0x6ab   : > { %13982 = vmatprep.mubr.f32.mxu0 %v13868_v23 }
 0x6ae   : > { %13983 = vmatmul.mubr.f32.gmra.mrb[12].mxu0 %v13867_v47 }
 0x6af   : > { %13987 = vmatprep.mubr.f32.mxu0 %v13870_v4 }
 0x6b2   : > { %13988 = vmatmul.mubr.f32.gmra.mrb[14].mxu0 %v13869_v50 }
 0x6b3   : > { %13992 = vmatprep.mubr.f32.mxu0 %v13872_v58 }
 0x6b6   : > { %13993 = vmatmul.mubr.f32.gmra.mrb[16].mxu0 %v13871_v6  ;;  %v13899_v6 = vld [vmem:[%s18638_s6 + $0x30] sm:$0xff] }
 0x6b7   : > { %13997 = vmatprep.mubr.f32.mxu0 %v13874_v9 }
 0x6ba   : > { %13998 = vmatmul.mubr.f32.gmra.mrb[18].mxu0 %v13873_v10 }
 0x6bb   : > { %14002 = vmatprep.mubr.f32.mxu0 %v13876_v2  ;;  %v13900_v2 = vld [vmem:[%s18638_s6 + $0x38] sm:$0xff] }
 0x6be   : > { %14003 = vmatmul.mubr.f32.gmra.mrb[20].mxu0 %v13875_v17 }
 0x6bf   : > { %14007 = vmatprep.mubr.f32.mxu0 %v13878_v3 }
 0x6c2   : > { %14008 = vmatmul.mubr.f32.gmra.mrb[22].mxu0 %v13877_v54 }
 0x6c3   : > { %14012 = vmatprep.mubr.f32.mxu0 %v13880_v13 }
 0x6c6   : > { %14013 = vmatmul.mubr.f32.gmra.mrb[24].mxu0 %v13879_v62 }
 0x6c7   : > { %14017 = vmatprep.mubr.f32.mxu0 %v13882_v12 }
 0x6ca   : > { %14018 = vmatmul.mubr.f32.gmra.mrb[26].mxu0 %v13881_v57 }
 0x6cb   : > { %14022 = vmatprep.mubr.f32.mxu0 %v13884_v24 }
 0x6ce   : > { %14023 = vmatmul.mubr.f32.gmra.mrb[28].mxu0 %v13883_v16 }
 0x6cf   : > { %14027 = vmatprep.mubr.f32.mxu0 %v13886_v52  ;;  %v13901_v52 = vld [vmem:[%s18638_s6 + $0x40] sm:$0xff] }
 0x6d2   : > { %14028 = vmatmul.mubr.f32.gmra.mrb[30].mxu0 %v13885_v5 }
 0x6d3   : > { %14032 = vmatprep.mubr.f32.mxu0 %v13888_v61 }
 0x6d6   : > { %14033 = vmatmul.mubr.f32.gmra.mrb[32].mxu0 %v13887_v20  ;;  %v13902_v20 = vld [vmem:[%s18638_s6 + $0x48] sm:$0xff] }
 0x6d7   : > { %14037 = vmatprep.mubr.f32.mxu0 %v13890_v22 }
 0x6da   : > { %14038 = vmatmul.mubr.f32.gmra.mrb[34].mxu0 %v13889_v7 }
 0x6db   : > { %14042 = vmatprep.mubr.f32.mxu0 %v13892_v30 }
 0x6de   : > { %14043 = vmatmul.mubr.f32.gmra.mrb[36].mxu0 %v13891_v59 }
 0x779   : > { %v15051_v32 = vpop.f32.mrb[8].mxu0 }
 0x77a   : > { %v15052_v15 = vpop.f32.mrb[9].mxu0 }
 0x77b   : > { %v15053_v37 = vadd.f32 %v15052_v15, %v15051_v32 }
 0x77d   : > { %v15054_v63 = vpop.f32.mrb[10].mxu0  ;;  %v13975_v19 = vadd.f32 %v15053_v37, %v13893_v41 }
 0x77e   : > { %v15055_v34 = vpop.f32.mrb[11].mxu0 }
 0x77f   : > { %v15056_v27 = vadd.f32 %v15055_v34, %v15054_v63  ;;  %v14048_v42 = vmax.f32 %v13975_v19, 0.0 }
 0x781   : > { %v13980_v45 = vadd.f32 %v15056_v27, %v13894_v31  ;;  %v15057_v46 = vpop.f32.mrb[12].mxu0  ;;  %v13903_v31 = vld [vmem:[%s18638_s6 + $0x50] sm:$0xff]  ;;  %v13904_v27 = vld [vmem:[%s18638_s6 + $0x58] sm:$0xff] }
 0x782   : > { %v15058_v26 = vpop.f32.mrb[13].mxu0 }
 0x783   : > { %v14049_v48 = vmax.f32 %v13980_v45, 0.0  ;;  %v15059_v49 = vadd.f32 %v15058_v26, %v15057_v46 }
 0x785   : > { %v15381_v51 = vpack.c.bf16 %v14049_v48, %v14048_v42  ;;  %v15060_v18 = vpop.f32.mrb[14].mxu0  ;;  %v13985_v53 = vadd.f32 %v15059_v49, %v13895_v29 }
 0x786   : > { %v15061_v1 = vpop.f32.mrb[15].mxu0 }
 0x787   : > { %v15062_v40 = vadd.f32 %v15061_v1, %v15060_v18  ;;  %15382 = vmatpush3.bf16.msra.mxu1 %v15381_v51  ;;  %v14050_v39 = vmax.f32 %v13985_v53, 0.0 }
 0x788   : > { %15383 = vmatprep.subr.bf16.mxu1 %v16014_v33 }
 0x789   : > { %v13990_v25 = vadd.f32 %v15062_v40, %v13896_v36  ;;  %v15063_v55 = vpop.f32.mrb[16].mxu0  ;;  %v13905_v36 = vld [vmem:[%s18638_s6 + $0x60] sm:$0xff]  ;;  %v13906_v40 = vld [vmem:[%s18638_s6 + $0x68] sm:$0xff] }
 0x78a   : > { %v15064_v38 = vpop.f32.mrb[17].mxu0 }
 0x78b   : > { %v14051_v43 = vmax.f32 %v13990_v25, 0.0  ;;  %v15065_v21 = vadd.f32 %v15064_v38, %v15063_v55 }
 0x78d   : > { %v15384_v14 = vpack.c.bf16 %v14051_v43, %v14050_v39  ;;  %v15066_v35 = vpop.f32.mrb[18].mxu0  ;;  %v13995_v56 = vadd.f32 %v15065_v21, %v13897_v60  ;;  %v13907_v21 = vld [vmem:[%s18638_s6 + $0x70] sm:$0xff] }
 0x78e   : > { %v15067_v11 = vpop.f32.mrb[19].mxu0 }
 0x78f   : > { %v15068_v8 = vadd.f32 %v15067_v11, %v15066_v35  ;;  %15385 = vmatpush3.bf16.msra.mxu1 %v15384_v14  ;;  %v14052_v4 = vmax.f32 %v13995_v56, 0.0 }
 0x790   : > { %15386 = vmatprep.subr.bf16.mxu1 %v16014_v33 }
 0x791   : > { %v14000_v28 = vadd.f32 %v15068_v8, %v13898_v44  ;;  %v15069_v23 = vpop.f32.mrb[20].mxu0 }
 0x792   : > { %v15070_v47 = vpop.f32.mrb[21].mxu0 }
 0x793   : > { %v14053_v50 = vmax.f32 %v14000_v28, 0.0  ;;  %v15071_v58 = vadd.f32 %v15070_v47, %v15069_v23  ;;  %v14064_v28 = vld [vmem:[%s18639_s7 + $0x8] sm:$0xff]  ;;  %v14065_v23 = vld [vmem:[%s18639_s7 + $0x10] sm:$0xff]  ;;  %v14066_v47 = vld [vmem:[%s18639_s7 + $0x18] sm:$0xff] }
 0x795   : > { %v15387_v9 = vpack.c.bf16 %v14053_v50, %v14052_v4  ;;  %v15072_v10 = vpop.f32.mrb[22].mxu0  ;;  %v14005_v3 = vadd.f32 %v15071_v58, %v13899_v6  ;;  %v14067_v4 = vld [vmem:[%s18639_s7 + $0x20] sm:$0xff]  ;;  %v14068_v50 = vld [vmem:[%s18639_s7 + $0x28] sm:$0xff]  ;;  %v14069_v58 = vld [vmem:[%s18639_s7 + $0x30] sm:$0xff] }
 0x796   : > { %v15073_v17 = vpop.f32.mrb[23].mxu0  ;;  %v14070_v6 = vld [vmem:[%s18639_s7 + $0x38] sm:$0xff] }
 0x797   : > { %v15074_v54 = vadd.f32 %v15073_v17, %v15072_v10  ;;  %15388 = vmatpush3.bf16.msra.mxu1 %v15387_v9  ;;  %v14054_v57 = vmax.f32 %v14005_v3, 0.0  ;;  %v14071_v9 = vld [vmem:[%s18639_s7 + $0x40] sm:$0xff]  ;;  %v14072_v10 = vld [vmem:[%s18639_s7 + $0x48] sm:$0xff] }
 0x798   : > { %15389 = vmatprep.subr.bf16.mxu1 %v16014_v33  ;;  %v14249_v17 = vld [vmem:[%s18641_s9] sm:$0xff] }
 0x799   : > { %v14010_v13 = vadd.f32 %v15074_v54, %v13900_v2  ;;  %v15075_v62 = vpop.f32.mrb[24].mxu0  ;;  %v14073_v2 = vld [vmem:[%s18639_s7 + $0x50] sm:$0xf]  ;;  %v14074_v3 = vld [vmem:[%s18640_s8] sm:$0xff] }
 0x79a   : > { %v15076_v12 = vpop.f32.mrb[25].mxu0 }
 0x79b   : > { %v14055_v24 = vmax.f32 %v14010_v13, 0.0  ;;  %v15077_v16 = vadd.f32 %v15076_v12, %v15075_v62 }
 0x79d   : > { %v15390_v5 = vpack.c.bf16 %v14055_v24, %v14054_v57  ;;  %v15078_v61 = vpop.f32.mrb[26].mxu0  ;;  %v14015_v7 = vadd.f32 %v15077_v16, %v13901_v52 }
 0x79e   : > { %v15079_v22 = vpop.f32.mrb[27].mxu0 }
 0x79f   : > { %v15080_v30 = vadd.f32 %v15079_v22, %v15078_v61  ;;  %15391 = vmatpush3.bf16.msra.mxu1 %v15390_v5  ;;  %v14056_v37 = vmax.f32 %v14015_v7, 0.0  ;;  %v14076_v5 = vld [vmem:[%s18640_s8 + $0x10] sm:$0xff]  ;;  %v14077_v7 = vld [vmem:[%s18640_s8 + $0x18] sm:$0xff] }
 0x7a0   : > { %15392 = vmatprep.subr.bf16.mxu1 %v16014_v33 }
 0x7a1   : > { %v14020_v59 = vadd.f32 %v15080_v30, %v13902_v20  ;;  %v15081_v32 = vpop.f32.mrb[28].mxu0 }
 0x7a2   : > { %v15082_v15 = vpop.f32.mrb[29].mxu0 }
 0x7a3   : > { %v14057_v41 = vmax.f32 %v14020_v59, 0.0  ;;  %v15083_v63 = vadd.f32 %v15082_v15, %v15081_v32 }
 0x7a5   : > { %v15393_v34 = vpack.c.bf16 %v14057_v41, %v14056_v37  ;;  %v15084_v19 = vpop.f32.mrb[30].mxu0  ;;  %v14025_v46 = vadd.f32 %v15083_v63, %v13903_v31  ;;  %v14078_v63 = vld [vmem:[%s18640_s8 + $0x20] sm:$0xff] }
 0x7a6   : > { %v15085_v45 = vpop.f32.mrb[31].mxu0 }
 0x7a7   : > { %v15086_v26 = vadd.f32 %v15085_v45, %v15084_v19  ;;  %15394 = vmatpush3.bf16.msra.mxu1 %v15393_v34  ;;  %v14058_v29 = vmax.f32 %v14025_v46, 0.0 }
 0x7a8   : > { %15395 = vmatprep.subr.bf16.mxu1 %v16014_v33 }
 0x7a9   : > { %v14030_v42 = vadd.f32 %v15086_v26, %v13904_v27  ;;  %v15087_v48 = vpop.f32.mrb[32].mxu0  ;;  %v14079_v27 = vld [vmem:[%s18640_s8 + $0x28] sm:$0xff] }
 0x7aa   : > { %v15088_v49 = vpop.f32.mrb[33].mxu0 }
 0x7ab   : > { %v14059_v51 = vmax.f32 %v14030_v42, 0.0  ;;  %v15089_v18 = vadd.f32 %v15088_v49, %v15087_v48 }
 0x7ad   : > { %v15396_v1 = vpack.c.bf16 %v14059_v51, %v14058_v29  ;;  %v15090_v53 = vpop.f32.mrb[34].mxu0  ;;  %v14035_v55 = vadd.f32 %v15089_v18, %v13905_v36  ;;  %v14080_v29 = vld [vmem:[%s18640_s8 + $0x30] sm:$0xff] }
 0x7ae   : > { %v15091_v25 = vpop.f32.mrb[35].mxu0 }
 0x7af   : > { %v15092_v38 = vadd.f32 %v15091_v25, %v15090_v53  ;;  %15397 = vmatpush3.bf16.msra.mxu1 %v15396_v1  ;;  %v14060_v14 = vmax.f32 %v14035_v55, 0.0  ;;  %v14081_v1 = vld [vmem:[%s18640_s8 + $0x38] sm:$0xff] }
 0x7b0   : > { %15398 = vmatprep.subr.bf16.mxu1 %v16014_v33  ;;  %v14063_v33 = vld [vmem:[%s18639_s7] sm:$0xff] }
 0x7b1   : > { %v14040_v39 = vadd.f32 %v15092_v38, %v13906_v40  ;;  %v15093_v43 = vpop.f32.mrb[36].mxu0 }
 0x7b2   : > { %v15094_v60 = vpop.f32.mrb[37].mxu0 }
 0x7b3   : > { %v14061_v35 = vmax.f32 %v14040_v39, 0.0  ;;  %v15095_v44 = vadd.f32 %v15094_v60, %v15093_v43  ;;  %v14082_v43 = vld [vmem:[%s18640_s8 + $0x40] sm:$0xff] }
 0x7b5   : > { %v15399_v11 = vpack.c.bf16 %v14061_v35, %v14060_v14  ;;  %v14045_v56 = vadd.f32 %v15095_v44, %v13907_v21  ;;  %v14083_v35 = vld [vmem:[%s18640_s8 + $0x48] sm:$0xff] }
 0x7b7   : > { %v14062_v8 = vmax.f32 %v14045_v56, 0.0  ;;  %15400 = vmatpush3.bf16.msra.mxu1 %v15399_v11 }
 0x7b8   : > { %15288 = vmatprep.subr.mxu1 %v15966_v0 }
 0x7bb   : > { %15289 = vmatpush3.msra.mxu1 %v14062_v8 }
 0x7bc   : > { %15291 = vmatmul.mubr.msk.f32.vlgmr.msra.gmra.mrb[60].mxu1 %vm9573_vm13, %v14063_v33  ;;  %v14084_v33 = vld [vmem:[%s18640_s8 + $0x50] sm:$0xf] }
 0x7bd   : > { %15293 = vmatprep.mubr.msk.f32.mxu1 %vm15976_vm3, %v15966_v0 }
 0x7c0   : > { %15294 = vmatmul.mubr.msk.f32.gmra.mrb[62].mxu1 %vm9573_vm13, %v14064_v28 }
 0x7c1   : > { %15296 = vmatprep.mubr.msk.f32.mxu1 %vm15976_vm3, %v15966_v0 }
 0x7c4   : > { %15297 = vmatmul.mubr.msk.f32.gmra.mrb[64].mxu1 %vm9573_vm13, %v14065_v23 }
 0x7c5   : > { %15299 = vmatprep.mubr.msk.f32.mxu1 %vm15976_vm3, %v15966_v0 }
 0x7c8   : > { %15300 = vmatmul.mubr.msk.f32.gmra.mrb[66].mxu1 %vm9573_vm13, %v14066_v47 }
 0x7c9   : > { %15302 = vmatprep.mubr.msk.f32.mxu1 %vm15976_vm3, %v15966_v0 }
 0x7cc   : > { %15303 = vmatmul.mubr.msk.f32.gmra.mrb[68].mxu1 %vm9573_vm13, %v14067_v4 }
 0x7cd   : > { %15305 = vmatprep.mubr.msk.f32.mxu1 %vm15976_vm3, %v15966_v0 }
 0x7d0   : > { %15306 = vmatmul.mubr.msk.f32.gmra.mrb[70].mxu1 %vm9573_vm13, %v14068_v50 }
 0x7d1   : > { %15308 = vmatprep.mubr.msk.f32.mxu1 %vm15976_vm3, %v15966_v0 }
 0x7d4   : > { %15309 = vmatmul.mubr.msk.f32.gmra.mrb[72].mxu1 %vm9573_vm13, %v14069_v58 }
 0x7d5   : > { %15311 = vmatprep.mubr.msk.f32.mxu1 %vm15976_vm3, %v15966_v0 }
 0x7d8   : > { %15312 = vmatmul.mubr.msk.f32.gmra.mrb[74].mxu1 %vm9573_vm13, %v14070_v6 }
 0x7d9   : > { %15314 = vmatprep.mubr.msk.f32.mxu1 %vm15976_vm3, %v15966_v0 }
 0x7dc   : > { %15315 = vmatmul.mubr.msk.f32.gmra.mrb[76].mxu1 %vm9573_vm13, %v14071_v9  ;;  %v14250_v9 = vld [vmem:[%s18641_s9 + $0x8] sm:$0x3] }
 0x7dd   : > { %15317 = vmatprep.mubr.msk.f32.mxu1 %vm15976_vm3, %v15966_v0 }
 0x7e0   : > { %15318 = vmatmul.mubr.msk.f32.gmra.mrb[78].mxu1 %vm9573_vm13, %v14072_v10  ;;  %v14252_v10 = vld [vmem:[%s18642_s10 + $0x8] sm:$0x3] }
 0x7e1   : > { %15320 = vmatprep.mubr.msk.f32.mxu1 %vm15976_vm3, %v15966_v0  ;;  %v14075_v0 = vld [vmem:[%s18640_s8 + $0x8] sm:$0xff]  ;;  %vm14259_vm3 = vcmask 1043456  }
 0x7e4   : > { %15321 = vmatmul.mubr.msk.f32.gmra.mrb[80].mxu1 %vm9573_vm13, %v14073_v2  ;;  %v14251_v2 = vld [vmem:[%s18642_s10] sm:$0xff] }
 0x7e5   : > { %15345 = vmatprep.mubr.msk.f32.mxu1 %vm12090_vm11, %v14249_v17 }
 0x88f   : > { %v14184_v54 = vpop.f32.mrb[60].mxu1 }
 0x890   : > { %v15292_v13 = vpop.f32.mrb[61].mxu1  ;;  %v14185_v62 = vadd.f32 %v14184_v54, %v14074_v3 }
 0x892   : > { %v14238_v16 = vmax.f32 %v14185_v62, 0.0 }
 0x893   : > { %v14189_v12 = vpop.f32.mrb[62].mxu1 }
 0x894   : > { %v14190_v57 = vadd.f32 %v14189_v12, %v14075_v0  ;;  %v15295_v24 = vpop.f32.mrb[63].mxu1 }
 0x896   : > { %v14239_v52 = vmax.f32 %v14190_v57, 0.0 }
 0x897   : > { %v14194_v61 = vpop.f32.mrb[64].mxu1 }
 0x898   : > { %v15401_v20 = vpack.c.bf16 %v14239_v52, %v14238_v16  ;;  %v15298_v22 = vpop.f32.mrb[65].mxu1  ;;  %v14195_v30 = vadd.f32 %v14194_v61, %v14076_v5 }
 0x89a   : > { %15402 = vmatprep.subr.bf16.mxu1 %v15401_v20  ;;  %v14240_v37 = vmax.f32 %v14195_v30, 0.0 }
 0x89b   : > { %v14199_v59 = vpop.f32.mrb[66].mxu1  ;;  %15404 = vmatpush3.bf16.msra.mxu1 %v15401_v20 }
 0x89c   : > { %v14200_v32 = vadd.f32 %v14199_v59, %v14077_v7  ;;  %v15301_v15 = vpop.f32.mrb[67].mxu1 }
 0x89e   : > { %v14241_v41 = vmax.f32 %v14200_v32, 0.0 }
 0x89f   : > { %v14204_v31 = vpop.f32.mrb[68].mxu1 }
 0x8a0   : > { %v15405_v34 = vpack.c.bf16 %v14241_v41, %v14240_v37  ;;  %v15304_v19 = vpop.f32.mrb[69].mxu1  ;;  %v14205_v45 = vadd.f32 %v14204_v31, %v14078_v63 }
 0x8a2   : > { %15406 = vmatprep.subr.bf16.mxu1 %v15405_v34  ;;  %v14242_v48 = vmax.f32 %v14205_v45, 0.0 }
 0x8a3   : > { %v14209_v46 = vpop.f32.mrb[70].mxu1  ;;  %15408 = vmatpush3.bf16.msra.mxu1 %v15405_v34 }
 0x8a4   : > { %v14210_v26 = vadd.f32 %v14209_v46, %v14079_v27  ;;  %v15307_v42 = vpop.f32.mrb[71].mxu1 }
 0x8a6   : > { %v14243_v49 = vmax.f32 %v14210_v26, 0.0 }
 0x8a7   : > { %v14214_v51 = vpop.f32.mrb[72].mxu1 }
 0x8a8   : > { %v15409_v18 = vpack.c.bf16 %v14243_v49, %v14242_v48  ;;  %v15310_v36 = vpop.f32.mrb[73].mxu1  ;;  %v14215_v53 = vadd.f32 %v14214_v51, %v14080_v29 }
 0x8aa   : > { %15410 = vmatprep.subr.bf16.mxu1 %v15409_v18  ;;  %v14244_v38 = vmax.f32 %v14215_v53, 0.0 }
 0x8ab   : > { %v14219_v40 = vpop.f32.mrb[74].mxu1  ;;  %15412 = vmatpush3.bf16.msra.mxu1 %v15409_v18 }
 0x8ac   : > { %v14220_v25 = vadd.f32 %v14219_v40, %v14081_v1  ;;  %v15313_v55 = vpop.f32.mrb[75].mxu1 }
 0x8ae   : > { %v14245_v39 = vmax.f32 %v14220_v25, 0.0 }
 0x8af   : > { %v14224_v21 = vpop.f32.mrb[76].mxu1 }
 0x8b0   : > { %v15413_v60 = vpack.c.bf16 %v14245_v39, %v14244_v38  ;;  %v15316_v14 = vpop.f32.mrb[77].mxu1  ;;  %v14225_v44 = vadd.f32 %v14224_v21, %v14082_v43 }
 0x8b2   : > { %15414 = vmatprep.subr.bf16.mxu1 %v15413_v60  ;;  %v14246_v28 = vmax.f32 %v14225_v44, 0.0 }
 0x8b3   : > { %v14229_v11 = vpop.f32.mrb[78].mxu1  ;;  %15416 = vmatpush3.bf16.msra.mxu1 %v15413_v60 }
 0x8b4   : > { %v14230_v56 = vadd.f32 %v14229_v11, %v14083_v35  ;;  %v15319_v8 = vpop.f32.mrb[79].mxu1 }
 0x8b6   : > { %v14247_v23 = vmax.f32 %v14230_v56, 0.0 }
 0x8b7   : > { %v14234_v47 = vpop.f32.mrb[80].mxu1 }
 0x8b8   : > { %v15417_v4 = vpack.c.bf16 %v14247_v23, %v14246_v28  ;;  %v14235_v50 = vadd.f32 %v14234_v47, %v14084_v33  ;;  %v15322_v58 = vpop.f32.mrb[81].mxu1 }
 0x8ba   : > { %15418 = vmatprep.subr.bf16.mxu1 %v15417_v4  ;;  %v14248_v6 = vmax.f32 %v14235_v50, 0.0 }
 0x8bb   : > { %15420 = vmatpush3.bf16.msra.mxu1 %v15417_v4 }
 0x8bc   : > { %15343 = vmatprep.subr.msk.mxu1 %vm14259_vm3, %v14248_v6 }
 0x8bf   : > { %15344 = vmatpush3.msk.msra.mxu1 %vm14259_vm3, %v14248_v6 }
 0x8c0   : > { %15346 = vmatmul.mubr.msk.f32.vlgmr.msra.gmra.mrb[82].mxu1 %vm12090_vm11, %v14250_v9 }
 0x993   : > { %v15347_v17 = vpop.f32.mrb[82].mxu1 }
 0x994   : > { %v14335_v3 = vadd.f32 %v15347_v17, %v14252_v10  ;;  %v14329_v54 = vpop.f32.mrb[83].mxu1 }
 0x995   : > { %v14330_v13 = vadd.f32 %v14329_v54, %v14251_v2 }
 0x996   : > { %14341 = vst.msk [vmem:[%s388_s19 + $0x8] sm:$0x3] %vm14340_vm4, %v14335_v3 }
 0x997   : > { %14339 = vst.msk [vmem:[%s388_s19] sm:$0xff] %vm14338_vm12, %v14330_v13 }
 0x998 PF: > { %s21_s17 = sadd.s32 1, %s15964_s17  }
 0x999   : > { %p18_p5 = scmp.ge.s32.totalorder %s21_s17, 4  }
 0x99b   :  { %20 = sbr.rel (!%p18_p5) target bundleno = 1 (0x1), region = 142 }

</bundles_post_ra>
